<compile_context>
chip_gen: v7x
topology: tpu7x:2x2x1
jax: 0.10.0
libtpu: 0.0.40
codegen_flags: <defaults>
</compile_context>

<pallas_src>
import functools

import jax
import jax.numpy as jnp
from jax.experimental import pallas as pl
from jax.experimental.pallas import tpu as pltpu

LEAKY_SLOPE = 0.01     # nn.LeakyReLU default
BN_EPS = 1e-5          # nn.BatchNorm3d default


def _round_up(x, m):
    return (x + m - 1) // m * m


# ----------------------------------------------------------------------------
# Pallas kernels
# ----------------------------------------------------------------------------
def _mm_kernel(x_ref, w_ref, s_ref, b_ref, o_ref, *, act):
    """o = act((x @ w) * scale + bias).  bf16 MXU operands, f32 accumulate."""
    acc = jnp.dot(x_ref[...], w_ref[...], preferred_element_type=jnp.float32)
    y = acc * s_ref[...] + b_ref[...]               # f32 epilogue (v5e-safe)
    if act == "leaky_relu":
        y = jnp.where(y > 0, y, LEAKY_SLOPE * y)
    elif act == "sigmoid":
        y = pl.reciprocal(1.0 + jnp.exp(-y), approx=True)   # EUP exp + rcp
    o_ref[...] = y.astype(o_ref.dtype)


def fused_matmul(x, pw, act="none", out_dtype=jnp.float32):
    """y = act((x @ w) * scale + bias); w/scale/bias are pre-padded in `pw`."""
    M, K = x.shape
    Np = pw["w"].shape[1]

    M16 = _round_up(max(M, 16), 16)
    if M16 >= 512:
        TM = 256                      # 256-aligned tiles keep v6e/v7x MXU full
    elif M16 >= 256:
        TM = 128
    elif M16 >= 64 and M16 % 32 == 0:
        TM = M16 // 2                 # >=2 grid steps -> both v7x TCs get work
    else:
        TM = M16
    Mp = _round_up(M16, TM)

    xb = x.astype(jnp.bfloat16)
    if Mp != M:
        xb = jnp.zeros((Mp, K), jnp.bfloat16).at[:M, :].set(xb)

    out = pl.pallas_call(
        functools.partial(_mm_kernel, act=act),
        out_shape=jax.ShapeDtypeStruct((Mp, Np), out_dtype),
        grid_spec=pltpu.PrefetchScalarGridSpec(
            num_scalar_prefetch=0,
            grid=(Mp // TM,),
            in_specs=[
                pl.BlockSpec((TM, K), lambda i: (i, 0)),   # K left un-padded
                pl.BlockSpec((K, Np), lambda i: (0, 0)),
                pl.BlockSpec((1, Np), lambda i: (0, 0)),
                pl.BlockSpec((1, Np), lambda i: (0, 0)),
            ],
            out_specs=pl.BlockSpec((TM, Np), lambda i: (i, 0)),
        ),
        compiler_params=pltpu.CompilerParams(
            dimension_semantics=("parallel",)),
    )(xb, pw["w"], pw["s"], pw["b"])
    return out[:M, :pw["n"]]


def _latent_kernel(x_ref, w_ref, b_ref, eps_ref, mu_ref, sig_ref, z_ref, *, lp):
    """Fused fc_mu + fc_var + reparameterize (sigma = exp(0.5*lv), z = eps*sigma+mu)."""
    y = jnp.dot(x_ref[...], w_ref[...],
                preferred_element_type=jnp.float32) + b_ref[...]
    mu = y[:, :lp]
    log_var = y[:, lp:]
    sigma = jnp.exp(0.5 * log_var)
    mu_ref[...] = mu
    sig_ref[...] = sigma
    z_ref[...] = eps_ref[...] * sigma + mu


def fc_latent(flat, pw, eps):
    B, F = flat.shape
    L, Lp = pw["latent"], pw["lp"]
    Bp = _round_up(max(B, 16), 16)
    xb = jnp.zeros((Bp, F), jnp.bfloat16).at[:B, :].set(flat.astype(jnp.bfloat16))
    ep = jnp.zeros((Bp, Lp), jnp.float32).at[:B, :L].set(eps.astype(jnp.float32))
    mu, sigma, z = pl.pallas_call(
        functools.partial(_latent_kernel, lp=Lp),
        out_shape=(jax.ShapeDtypeStruct((Bp, Lp), jnp.float32),) * 3,
    )(xb, pw["w"], pw["b"], ep)
    return mu[:B, :L], sigma[:B, :L], z[:B, :L]


# ----------------------------------------------------------------------------
# One-time weight preparation (BN fold, im2col weight layout, bf16 + lane pad)
# ----------------------------------------------------------------------------
def fold_bn(conv_bias, gamma, beta, mean, var):
    s = gamma / jnp.sqrt(var + BN_EPS)
    b = (conv_bias - mean) * s + beta
    return s, b


def prep_matmul_weights(wmat, scale, bias):
    K, N = wmat.shape
    Np = _round_up(N, 128)
    wp = jnp.zeros((K, Np), jnp.bfloat16).at[:, :N].set(wmat.astype(jnp.bfloat16))
    sp = jnp.zeros((1, Np), jnp.float32).at[0, :N].set(scale.astype(jnp.float32))
    bp = jnp.zeros((1, Np), jnp.float32).at[0, :N].set(bias.astype(jnp.float32))
    return dict(w=wp, s=sp, b=bp, n=N, k=K)


def conv_wmat(w):
    """Conv3d weight (C_out, C_in, 3,3,3) -> (27*C_in, C_out); rows=(kd,kh,kw,ci)."""
    C_out, C_in = w.shape[0], w.shape[1]
    return jnp.transpose(w, (2, 3, 4, 1, 0)).reshape(27 * C_in, C_out)


# ConvTranspose3d(k=3, s=2, p=1, op=1) 8-parity decomposition.  Per dimension:
# out[2m+r]: tap delta in {0,1} with kernel index kappa(r=0,d=0)=1,
# kappa(r=1,d=0)=2, kappa(r=1,d=1)=0; (r=0,d=1) contributes zero.
_CT_KIDX = {(0, 0): 1, (1, 0): 2, (1, 1): 0}


def build_ct_wmat(wt):
    """wt: (C_in, C_out, 3,3,3) -> (8*C_in, 8*C_out); rows=(delta_d,delta_h,
    delta_w, c_in), cols=(parity r_d, r_h, r_w, c_out)."""
    C_in, C_out = wt.shape[0], wt.shape[1]
    W = jnp.zeros((8 * C_in, 8 * C_out), jnp.float32)
    for dd in (0, 1):
        for dh in (0, 1):
            for dw in (0, 1):
                g_in = (dd * 2 + dh) * 2 + dw
                for rd in (0, 1):
                    for rh in (0, 1):
                        for rw in (0, 1):
                            if ((rd, dd) not in _CT_KIDX
                                    or (rh, dh) not in _CT_KIDX
                                    or (rw, dw) not in _CT_KIDX):
                                continue
                            g_out = (rd * 2 + rh) * 2 + rw
                            sub = wt[:, :, _CT_KIDX[(rd, dd)],
                                     _CT_KIDX[(rh, dh)], _CT_KIDX[(rw, dw)]]
                            W = W.at[g_in * C_in:(g_in + 1) * C_in,
                                     g_out * C_out:(g_out + 1) * C_out].set(sub)
    return W


def prepare_params(params):
    prepped = {}
    enc = []
    for layer in params["encoder"]:
        s, b = fold_bn(layer["b"], layer["gamma"], layer["beta"],
                       layer["mean"], layer["var"])
        enc.append(prep_matmul_weights(conv_wmat(layer["w"]), s, b))
    prepped["encoder"] = enc

    L = params["fc_mu"]["w"].shape[1]
    F = params["fc_mu"]["w"].shape[0]
    Lp = _round_up(L, 128)
    wcat = jnp.zeros((F, 2 * Lp), jnp.bfloat16)
    wcat = wcat.at[:, :L].set(params["fc_mu"]["w"].astype(jnp.bfloat16))
    wcat = wcat.at[:, Lp:Lp + L].set(params["fc_var"]["w"].astype(jnp.bfloat16))
    bcat = jnp.zeros((1, 2 * Lp), jnp.float32)
    bcat = bcat.at[0, :L].set(params["fc_mu"]["b"])
    bcat = bcat.at[0, Lp:Lp + L].set(params["fc_var"]["b"])
    prepped["latent"] = dict(w=wcat, b=bcat, latent=L, lp=Lp)

    di = params["dec_in"]
    prepped["dec_in"] = prep_matmul_weights(di["w"], jnp.ones_like(di["b"]),
                                            di["b"])

    dec = []
    for layer in params["decoder"]:
        s, b = fold_bn(layer["b"], layer["gamma"], layer["beta"],
                       layer["mean"], layer["var"])
        dec.append(prep_matmul_weights(build_ct_wmat(layer["w"]),
                                       jnp.tile(s, 8), jnp.tile(b, 8)))
    prepped["decoder"] = dec

    fl = params["final_ct"]
    s, b = fold_bn(fl["b"], fl["gamma"], fl["beta"], fl["mean"], fl["var"])
    prepped["final_ct"] = prep_matmul_weights(build_ct_wmat(fl["w"]),
                                              jnp.tile(s, 8), jnp.tile(b, 8))

    fc = params["final_conv"]
    prepped["final_conv"] = prep_matmul_weights(conv_wmat(fc["w"]),
                                                jnp.ones_like(fc["b"]),
                                                fc["b"])
    return prepped


# ----------------------------------------------------------------------------
# Channels-last conv wrappers (im2col -> fused Pallas matmul)
# ----------------------------------------------------------------------------
# TODO(synk): build the im2col taps inside the kernel (halo'd VMEM tile) to
# remove the remaining XLA-side patch materialization.
def conv3d_cl(x, pw, stride, pad, act, out_dtype):
    """x: (B, D, H, W, C) channels-last; 3x3x3 conv."""
    B, D, H, W, C = x.shape
    k = 3
    Do = (D + 2 * pad - k) // stride + 1
    Ho = (H + 2 * pad - k) // stride + 1
    Wo = (W + 2 * pad - k) // stride + 1
    xp = jnp.pad(x, ((0, 0), (pad, pad), (pad, pad), (pad, pad), (0, 0)))
    taps = []
    for kd in range(k):
        for kh in range(k):
            for kw in range(k):
                taps.append(xp[:, kd:kd + stride * Do:stride,
                               kh:kh + stride * Ho:stride,
                               kw:kw + stride * Wo:stride, :])
    patches = jnp.concatenate(taps, axis=-1).reshape(B * Do * Ho * Wo, 27 * C)
    y = fused_matmul(patches, pw, act=act, out_dtype=out_dtype)
    return y.reshape(B, Do, Ho, Wo, pw["n"])


def conv_transpose3d_cl(x, pw, act, out_dtype):
    """ConvTranspose3d(k=3, s=2, p=1, op=1) via 8-parity sub-kernels.
    x: (B, D, H, W, C) -> (B, 2D, 2H, 2W, C_out)."""
    B, D, H, W, C = x.shape
    xp = jnp.pad(x, ((0, 0), (0, 1), (0, 1), (0, 1), (0, 0)))
    taps = []
    for dd in (0, 1):
        for dh in (0, 1):
            for dw in (0, 1):
                taps.append(xp[:, dd:dd + D, dh:dh + H, dw:dw + W, :])
    patches = jnp.concatenate(taps, axis=-1).reshape(B * D * H * W, 8 * C)
    y = fused_matmul(patches, pw, act=act, out_dtype=out_dtype)   # (M, 8*C_out)
    C_out = pw["n"] // 8
    y = y.reshape(B, D, H, W, 2, 2, 2, C_out)
    y = jnp.transpose(y, (0, 1, 4, 2, 5, 3, 6, 7))                # interleave
    return y.reshape(B, 2 * D, 2 * H, 2 * W, C_out)


# ----------------------------------------------------------------------------
# Parameters (deterministic, shapes follow VAE.__init__)
# ----------------------------------------------------------------------------
def init_params(key, in_channels, hidden_dims, latent_dim, flatten_shape):
    def nrm(k, shape, scl):
        return scl * jax.random.normal(k, shape, jnp.float32)

    keys = iter(jax.random.split(key, 64))
    params = {}

    enc, c = [], in_channels
    for h in hidden_dims:
        enc.append(dict(
            w=nrm(next(keys), (h, c, 3, 3, 3), 0.1),
            b=nrm(next(keys), (h,), 0.01),
            gamma=jnp.ones((h,), jnp.float32), beta=jnp.zeros((h,), jnp.float32),
            mean=jnp.zeros((h,), jnp.float32), var=jnp.ones((h,), jnp.float32)))
        c = h
    params["encoder"] = enc

    params["fc_mu"] = dict(w=nrm(next(keys), (flatten_shape, latent_dim), 0.05),
                           b=nrm(next(keys), (latent_dim,), 0.01))
    params["fc_var"] = dict(w=nrm(next(keys), (flatten_shape, latent_dim), 0.05),
                            b=nrm(next(keys), (latent_dim,), 0.01))
    params["dec_in"] = dict(w=nrm(next(keys), (latent_dim, flatten_shape), 0.05),
                            b=nrm(next(keys), (flatten_shape,), 0.01))

    rev = list(reversed(hidden_dims))
    dec = []
    for i in range(len(rev) - 1):
        dec.append(dict(
            w=nrm(next(keys), (rev[i], rev[i + 1], 3, 3, 3), 0.1),   # (C_in,C_out,k,k,k)
            b=nrm(next(keys), (rev[i + 1],), 0.01),
            gamma=jnp.ones((rev[i + 1],), jnp.float32),
            beta=jnp.zeros((rev[i + 1],), jnp.float32),
            mean=jnp.zeros((rev[i + 1],), jnp.float32),
            var=jnp.ones((rev[i + 1],), jnp.float32)))
    params["decoder"] = dec

    cf = rev[-1]
    params["final_ct"] = dict(
        w=nrm(next(keys), (cf, cf, 3, 3, 3), 0.1),
        b=nrm(next(keys), (cf,), 0.01),
        gamma=jnp.ones((cf,), jnp.float32), beta=jnp.zeros((cf,), jnp.float32),
        mean=jnp.zeros((cf,), jnp.float32), var=jnp.ones((cf,), jnp.float32))
    params["final_conv"] = dict(
        w=nrm(next(keys), (in_channels, cf, 3, 3, 3), 0.1),
        b=nrm(next(keys), (in_channels,), 0.01))
    return params


# ----------------------------------------------------------------------------
# Forward pass (mirrors VAE.forward, eval mode)
# ----------------------------------------------------------------------------
def vae_forward(prepped, x, eps):
    B = x.shape[0]
    h = jnp.transpose(x, (0, 2, 3, 4, 1)).astype(jnp.bfloat16)   # NCDHW -> NDHWC

    # ---- encode -------------------------------------------------------------
    for pw in prepped["encoder"]:
        h = conv3d_cl(h, pw, stride=2, pad=1, act="leaky_relu",
                      out_dtype=jnp.bfloat16)
        # TODO(synk): Dropout3d is identity here (eval mode); training-mode
        # channel dropout has no deterministic PyTorch-matching equivalent.
    _, ed, eh, ew, ec = h.shape
    flat = jnp.transpose(h, (0, 4, 1, 2, 3)).reshape(B, -1)      # PyTorch flatten order

    # ---- fc_mu + fc_var + reparameterize (single fused kernel) --------------
    mu, sigma, z = fc_latent(flat, prepped["latent"], eps)

    # ---- decode -------------------------------------------------------------
    d = fused_matmul(z, prepped["dec_in"], act="none", out_dtype=jnp.bfloat16)
    d = d.reshape(B, ec, ed, eh, ew)                  # PyTorch .view (NCDHW)
    d = jnp.transpose(d, (0, 2, 3, 4, 1))             # back to channels-last
    for pw in prepped["decoder"]:
        d = conv_transpose3d_cl(d, pw, act="leaky_relu", out_dtype=jnp.bfloat16)
    d = conv_transpose3d_cl(d, prepped["final_ct"], act="leaky_relu",
                            out_dtype=jnp.bfloat16)
    recon = conv3d_cl(d, prepped["final_conv"], stride=1, pad=1, act="sigmoid",
                      out_dtype=jnp.float32)
    recon = jnp.transpose(recon, (0, 4, 1, 2, 3))     # NDHWC -> NCDHW
    return recon, z, (mu, sigma)


if __name__ == "__main__":
    B, C_in = 2, 1
    D = H = W = 16
    hidden_dims = [4, 8, 16]
    latent_dim = 32

    # spatial after 3 stride-2 convs: 16 -> 8 -> 4 -> 2; flatten = C_last*2*2*2
    flatten_shape = hidden_dims[-1] * 2 * 2 * 2

    key = jax.random.PRNGKey(0)
    k_x, k_eps, k_p = jax.random.split(key, 3)
    x = jax.random.uniform(k_x, (B, C_in, D, H, W), jnp.float32)
    eps = jax.random.normal(k_eps, (B, latent_dim), jnp.float32)
    params = init_params(k_p, C_in, hidden_dims, latent_dim, flatten_shape)
    prepped = prepare_params(params)      # one-time BN fold / reshape / pad

    fwd = jax.jit(functools.partial(vae_forward, prepped))
    recon, z, (mu, sigma) = fwd(x, eps)
    jax.block_until_ready((recon, z, mu, sigma))

    assert recon.shape == (B, C_in, D, H, W), recon.shape
    assert z.shape == (B, latent_dim), z.shape
    assert mu.shape == (B, latent_dim) and sigma.shape == (B, latent_dim)
    assert bool(jnp.all(jnp.isfinite(recon)))
    print("KERNEL_OK")
</pallas_src>

<mosaic_0001>
module attributes {stable_mosaic.version = 11 : i64} {
  func.func @_mm_kernel(%arg0: i32, %arg1: memref<256x27xbf16, #tpu.memory_space<vmem>>, %arg2: memref<27x128xbf16, #tpu.memory_space<vmem>>, %arg3: memref<1x128xf32, #tpu.memory_space<vmem>>, %arg4: memref<1x128xf32, #tpu.memory_space<vmem>>, %arg5: memref<256x128xbf16, #tpu.memory_space<vmem>>) attributes {dimension_semantics = [#tpu.dimension_semantics<parallel>], iteration_bounds = array<i64: 4>, scalar_prefetch = 0 : i64, scratch_operands = 0 : i64, tpu.core_type = #tpu.core_type<tc>, window_params = [{transform_indices = @transform_0, window_bounds = array<i64: 256, 27>}, {pipeline_mode = #tpu.pipeline_mode<synchronous>, transform_indices = @transform_1, window_bounds = array<i64: 27, 128>}, {pipeline_mode = #tpu.pipeline_mode<synchronous>, transform_indices = @transform_2, window_bounds = array<i64: 1, 128>}, {pipeline_mode = #tpu.pipeline_mode<synchronous>, transform_indices = @transform_3, window_bounds = array<i64: 1, 128>}, {transform_indices = @transform_4, window_bounds = array<i64: 256, 128>}]} {
    %c0 = arith.constant 0 : index
    %c0_0 = arith.constant 0 : index
    %0 = vector.load %arg1[%c0, %c0_0] : memref<256x27xbf16, #tpu.memory_space<vmem>>, vector<256x27xbf16>
    %c0_1 = arith.constant 0 : index
    %c0_2 = arith.constant 0 : index
    %1 = vector.load %arg2[%c0_1, %c0_2] : memref<27x128xbf16, #tpu.memory_space<vmem>>, vector<27x128xbf16>
    %cst = arith.constant dense<0.000000e+00> : vector<256x128xf32>
    %2 = tpu.matmul %0, %1, %cst {dimension_numbers = #tpu.dot_dimension_numbers<[1], [0], [0], [1], [0, 0, 1, 1], [], []>} : vector<256x27xbf16>, vector<27x128xbf16>, vector<256x128xf32> -> vector<256x128xf32>
    %c0_3 = arith.constant 0 : index
    %c0_4 = arith.constant 0 : index
    %3 = vector.load %arg3[%c0_3, %c0_4] : memref<1x128xf32, #tpu.memory_space<vmem>>, vector<1x128xf32>
    %4 = vector.broadcast %3 : vector<1x128xf32> to vector<256x128xf32>
    %5 = arith.mulf %2, %4 : vector<256x128xf32>
    %c0_5 = arith.constant 0 : index
    %c0_6 = arith.constant 0 : index
    %6 = vector.load %arg4[%c0_5, %c0_6] : memref<1x128xf32, #tpu.memory_space<vmem>>, vector<1x128xf32>
    %7 = vector.broadcast %6 : vector<1x128xf32> to vector<256x128xf32>
    %8 = arith.addf %5, %7 : vector<256x128xf32>
    %cst_7 = arith.constant 0.000000e+00 : f32
    %9 = vector.broadcast %cst_7 : f32 to vector<256x128xf32>
    %10 = arith.cmpf ogt, %8, %9 : vector<256x128xf32>
    %cst_8 = arith.constant 0.00999999977 : f32
    %11 = vector.broadcast %cst_8 : f32 to vector<256x128xf32>
    %12 = arith.mulf %11, %8 : vector<256x128xf32>
    %13 = arith.select %10, %8, %12 : vector<256x128xi1>, vector<256x128xf32>
    %14 = arith.truncf %13 : vector<256x128xf32> to vector<256x128xbf16>
    %c0_9 = arith.constant 0 : index
    %c0_10 = arith.constant 0 : index
    %15 = vector.load %arg5[%c0_9, %c0_10] : memref<256x128xbf16, #tpu.memory_space<vmem>>, vector<256x128xbf16>
    tpu.vector_store %arg5[%c0_9, %c0_10], %14 {strides = array<i32>} : memref<256x128xbf16, #tpu.memory_space<vmem>>, vector<256x128xbf16>,
    return
  }
  func.func @transform_0(%arg0: i32) -> (i32, i32) {
    %c0_i32 = arith.constant 0 : i32
    %c0_i32_0 = arith.constant 0 : i32
    return %arg0, %c0_i32 : i32, i32
  }
  func.func @transform_1(%arg0: i32) -> (i32, i32) {
    %c0_i32 = arith.constant 0 : i32
    %c0_i32_0 = arith.constant 0 : i32
    %c0_i32_1 = arith.constant 0 : i32
    return %c0_i32, %c0_i32_0 : i32, i32
  }
  func.func @transform_2(%arg0: i32) -> (i32, i32) {
    %c0_i32 = arith.constant 0 : i32
    %c0_i32_0 = arith.constant 0 : i32
    %c0_i32_1 = arith.constant 0 : i32
    return %c0_i32, %c0_i32_0 : i32, i32
  }
  func.func @transform_3(%arg0: i32) -> (i32, i32) {
    %c0_i32 = arith.constant 0 : i32
    %c0_i32_0 = arith.constant 0 : i32
    %c0_i32_1 = arith.constant 0 : i32
    return %c0_i32, %c0_i32_0 : i32, i32
  }
  func.func @transform_4(%arg0: i32) -> (i32, i32) {
    %c0_i32 = arith.constant 0 : i32
    %c0_i32_0 = arith.constant 0 : i32
    return %arg0, %c0_i32 : i32, i32
  }
}

module attributes {stable_mosaic.version = 11 : i64} {
  func.func @_mm_kernel(%arg0: i32, %arg1: memref<64x108xbf16, #tpu.memory_space<vmem>>, %arg2: memref<108x128xbf16, #tpu.memory_space<vmem>>, %arg3: memref<1x128xf32, #tpu.memory_space<vmem>>, %arg4: memref<1x128xf32, #tpu.memory_space<vmem>>, %arg5: memref<64x128xbf16, #tpu.memory_space<vmem>>) attributes {dimension_semantics = [#tpu.dimension_semantics<parallel>], iteration_bounds = array<i64: 2>, scalar_prefetch = 0 : i64, scratch_operands = 0 : i64, tpu.core_type = #tpu.core_type<tc>, window_params = [{transform_indices = @transform_0, window_bounds = array<i64: 64, 108>}, {pipeline_mode = #tpu.pipeline_mode<synchronous>, transform_indices = @transform_1, window_bounds = array<i64: 108, 128>}, {pipeline_mode = #tpu.pipeline_mode<synchronous>, transform_indices = @transform_2, window_bounds = array<i64: 1, 128>}, {pipeline_mode = #tpu.pipeline_mode<synchronous>, transform_indices = @transform_3, window_bounds = array<i64: 1, 128>}, {transform_indices = @transform_4, window_bounds = array<i64: 64, 128>}]} {
    %c0 = arith.constant 0 : index
    %c0_0 = arith.constant 0 : index
    %0 = vector.load %arg1[%c0, %c0_0] : memref<64x108xbf16, #tpu.memory_space<vmem>>, vector<64x108xbf16>
    %c0_1 = arith.constant 0 : index
    %c0_2 = arith.constant 0 : index
    %1 = vector.load %arg2[%c0_1, %c0_2] : memref<108x128xbf16, #tpu.memory_space<vmem>>, vector<108x128xbf16>
    %cst = arith.constant dense<0.000000e+00> : vector<64x128xf32>
    %2 = tpu.matmul %0, %1, %cst {dimension_numbers = #tpu.dot_dimension_numbers<[1], [0], [0], [1], [0, 0, 1, 1], [], []>} : vector<64x108xbf16>, vector<108x128xbf16>, vector<64x128xf32> -> vector<64x128xf32>
    %c0_3 = arith.constant 0 : index
    %c0_4 = arith.constant 0 : index
    %3 = vector.load %arg3[%c0_3, %c0_4] : memref<1x128xf32, #tpu.memory_space<vmem>>, vector<1x128xf32>
    %4 = vector.broadcast %3 : vector<1x128xf32> to vector<64x128xf32>
    %5 = arith.mulf %2, %4 : vector<64x128xf32>
    %c0_5 = arith.constant 0 : index
    %c0_6 = arith.constant 0 : index
    %6 = vector.load %arg4[%c0_5, %c0_6] : memref<1x128xf32, #tpu.memory_space<vmem>>, vector<1x128xf32>
    %7 = vector.broadcast %6 : vector<1x128xf32> to vector<64x128xf32>
    %8 = arith.addf %5, %7 : vector<64x128xf32>
    %cst_7 = arith.constant 0.000000e+00 : f32
    %9 = vector.broadcast %cst_7 : f32 to vector<64x128xf32>
    %10 = arith.cmpf ogt, %8, %9 : vector<64x128xf32>
    %cst_8 = arith.constant 0.00999999977 : f32
    %11 = vector.broadcast %cst_8 : f32 to vector<64x128xf32>
    %12 = arith.mulf %11, %8 : vector<64x128xf32>
    %13 = arith.select %10, %8, %12 : vector<64x128xi1>, vector<64x128xf32>
    %14 = arith.truncf %13 : vector<64x128xf32> to vector<64x128xbf16>
    %c0_9 = arith.constant 0 : index
    %c0_10 = arith.constant 0 : index
    %15 = vector.load %arg5[%c0_9, %c0_10] : memref<64x128xbf16, #tpu.memory_space<vmem>>, vector<64x128xbf16>
    tpu.vector_store %arg5[%c0_9, %c0_10], %14 {strides = array<i32>} : memref<64x128xbf16, #tpu.memory_space<vmem>>, vector<64x128xbf16>,
    return
  }
  func.func @transform_0(%arg0: i32) -> (i32, i32) {
    %c0_i32 = arith.constant 0 : i32
    %c0_i32_0 = arith.constant 0 : i32
    return %arg0, %c0_i32 : i32, i32
  }
  func.func @transform_1(%arg0: i32) -> (i32, i32) {
    %c0_i32 = arith.constant 0 : i32
    %c0_i32_0 = arith.constant 0 : i32
    %c0_i32_1 = arith.constant 0 : i32
    return %c0_i32, %c0_i32_0 : i32, i32
  }
  func.func @transform_2(%arg0: i32) -> (i32, i32) {
    %c0_i32 = arith.constant 0 : i32
    %c0_i32_0 = arith.constant 0 : i32
    %c0_i32_1 = arith.constant 0 : i32
    return %c0_i32, %c0_i32_0 : i32, i32
  }
  func.func @transform_3(%arg0: i32) -> (i32, i32) {
    %c0_i32 = arith.constant 0 : i32
    %c0_i32_0 = arith.constant 0 : i32
    %c0_i32_1 = arith.constant 0 : i32
    return %c0_i32, %c0_i32_0 : i32, i32
  }
  func.func @transform_4(%arg0: i32) -> (i32, i32) {
    %c0_i32 = arith.constant 0 : i32
    %c0_i32_0 = arith.constant 0 : i32
    return %arg0, %c0_i32 : i32, i32
  }
}

module attributes {stable_mosaic.version = 11 : i64} {
  func.func @_mm_kernel(%arg0: i32, %arg1: memref<16x216xbf16, #tpu.memory_space<vmem>>, %arg2: memref<216x128xbf16, #tpu.memory_space<vmem>>, %arg3: memref<1x128xf32, #tpu.memory_space<vmem>>, %arg4: memref<1x128xf32, #tpu.memory_space<vmem>>, %arg5: memref<16x128xbf16, #tpu.memory_space<vmem>>) attributes {dimension_semantics = [#tpu.dimension_semantics<parallel>], iteration_bounds = array<i64: 1>, scalar_prefetch = 0 : i64, scratch_operands = 0 : i64, tpu.core_type = #tpu.core_type<tc>, window_params = [{transform_indices = @transform_0, window_bounds = array<i64: 16, 216>}, {pipeline_mode = #tpu.pipeline_mode<synchronous>, transform_indices = @transform_1, window_bounds = array<i64: 216, 128>}, {pipeline_mode = #tpu.pipeline_mode<synchronous>, transform_indices = @transform_2, window_bounds = array<i64: 1, 128>}, {pipeline_mode = #tpu.pipeline_mode<synchronous>, transform_indices = @transform_3, window_bounds = array<i64: 1, 128>}, {transform_indices = @transform_4, window_bounds = array<i64: 16, 128>}]} {
    %c0 = arith.constant 0 : index
    %c0_0 = arith.constant 0 : index
    %0 = vector.load %arg1[%c0, %c0_0] : memref<16x216xbf16, #tpu.memory_space<vmem>>, vector<16x216xbf16>
    %c0_1 = arith.constant 0 : index
    %c0_2 = arith.constant 0 : index
    %1 = vector.load %arg2[%c0_1, %c0_2] : memref<216x128xbf16, #tpu.memory_space<vmem>>, vector<216x128xbf16>
    %cst = arith.constant dense<0.000000e+00> : vector<16x128xf32>
    %2 = tpu.matmul %0, %1, %cst {dimension_numbers = #tpu.dot_dimension_numbers<[1], [0], [0], [1], [0, 0, 1, 1], [], []>} : vector<16x216xbf16>, vector<216x128xbf16>, vector<16x128xf32> -> vector<16x128xf32>
    %c0_3 = arith.constant 0 : index
    %c0_4 = arith.constant 0 : index
    %3 = vector.load %arg3[%c0_3, %c0_4] : memref<1x128xf32, #tpu.memory_space<vmem>>, vector<1x128xf32>
    %4 = vector.broadcast %3 : vector<1x128xf32> to vector<16x128xf32>
    %5 = arith.mulf %2, %4 : vector<16x128xf32>
    %c0_5 = arith.constant 0 : index
    %c0_6 = arith.constant 0 : index
    %6 = vector.load %arg4[%c0_5, %c0_6] : memref<1x128xf32, #tpu.memory_space<vmem>>, vector<1x128xf32>
    %7 = vector.broadcast %6 : vector<1x128xf32> to vector<16x128xf32>
    %8 = arith.addf %5, %7 : vector<16x128xf32>
    %cst_7 = arith.constant 0.000000e+00 : f32
    %9 = vector.broadcast %cst_7 : f32 to vector<16x128xf32>
    %10 = arith.cmpf ogt, %8, %9 : vector<16x128xf32>
    %cst_8 = arith.constant 0.00999999977 : f32
    %11 = vector.broadcast %cst_8 : f32 to vector<16x128xf32>
    %12 = arith.mulf %11, %8 : vector<16x128xf32>
    %13 = arith.select %10, %8, %12 : vector<16x128xi1>, vector<16x128xf32>
    %14 = arith.truncf %13 : vector<16x128xf32> to vector<16x128xbf16>
    %c0_9 = arith.constant 0 : index
    %c0_10 = arith.constant 0 : index
    %15 = vector.load %arg5[%c0_9, %c0_10] : memref<16x128xbf16, #tpu.memory_space<vmem>>, vector<16x128xbf16>
    tpu.vector_store %arg5[%c0_9, %c0_10], %14 {strides = array<i32>} : memref<16x128xbf16, #tpu.memory_space<vmem>>, vector<16x128xbf16>,
    return
  }
  func.func @transform_0(%arg0: i32) -> (i32, i32) {
    %c0_i32 = arith.constant 0 : i32
    %c0_i32_0 = arith.constant 0 : i32
    return %arg0, %c0_i32 : i32, i32
  }
  func.func @transform_1(%arg0: i32) -> (i32, i32) {
    %c0_i32 = arith.constant 0 : i32
    %c0_i32_0 = arith.constant 0 : i32
    %c0_i32_1 = arith.constant 0 : i32
    return %c0_i32, %c0_i32_0 : i32, i32
  }
  func.func @transform_2(%arg0: i32) -> (i32, i32) {
    %c0_i32 = arith.constant 0 : i32
    %c0_i32_0 = arith.constant 0 : i32
    %c0_i32_1 = arith.constant 0 : i32
    return %c0_i32, %c0_i32_0 : i32, i32
  }
  func.func @transform_3(%arg0: i32) -> (i32, i32) {
    %c0_i32 = arith.constant 0 : i32
    %c0_i32_0 = arith.constant 0 : i32
    %c0_i32_1 = arith.constant 0 : i32
    return %c0_i32, %c0_i32_0 : i32, i32
  }
  func.func @transform_4(%arg0: i32) -> (i32, i32) {
    %c0_i32 = arith.constant 0 : i32
    %c0_i32_0 = arith.constant 0 : i32
    return %arg0, %c0_i32 : i32, i32
  }
}

module attributes {stable_mosaic.version = 11 : i64} {
  func.func @_latent_kernel(%arg0: memref<16x128xbf16, #tpu.memory_space<vmem>>, %arg1: memref<128x256xbf16, #tpu.memory_space<vmem>>, %arg2: memref<1x256xf32, #tpu.memory_space<vmem>>, %arg3: memref<16x128xf32, #tpu.memory_space<vmem>>, %arg4: memref<16x128xf32, #tpu.memory_space<vmem>>, %arg5: memref<16x128xf32, #tpu.memory_space<vmem>>, %arg6: memref<16x128xf32, #tpu.memory_space<vmem>>) attributes {dimension_semantics = [], scalar_prefetch = 0 : i64, scratch_operands = 0 : i64, tpu.core_type = #tpu.core_type<tc>} {
    %c0 = arith.constant 0 : index
    %c0_0 = arith.constant 0 : index
    %0 = vector.load %arg0[%c0, %c0_0] : memref<16x128xbf16, #tpu.memory_space<vmem>>, vector<16x128xbf16>
    %c0_1 = arith.constant 0 : index
    %c0_2 = arith.constant 0 : index
    %1 = vector.load %arg1[%c0_1, %c0_2] : memref<128x256xbf16, #tpu.memory_space<vmem>>, vector<128x256xbf16>
    %cst = arith.constant dense<0.000000e+00> : vector<16x256xf32>
    %2 = tpu.matmul %0, %1, %cst {dimension_numbers = #tpu.dot_dimension_numbers<[1], [0], [0], [1], [0, 0, 1, 1], [], []>} : vector<16x128xbf16>, vector<128x256xbf16>, vector<16x256xf32> -> vector<16x256xf32>
    %c0_3 = arith.constant 0 : index
    %c0_4 = arith.constant 0 : index
    %3 = vector.load %arg2[%c0_3, %c0_4] : memref<1x256xf32, #tpu.memory_space<vmem>>, vector<1x256xf32>
    %4 = vector.broadcast %3 : vector<1x256xf32> to vector<16x256xf32>
    %5 = arith.addf %2, %4 : vector<16x256xf32>
    %6 = vector.extract_strided_slice %5 {offsets = [0, 0], sizes = [16, 128], strides = [1, 1]} : vector<16x256xf32> to vector<16x128xf32>
    %7 = vector.extract_strided_slice %5 {offsets = [0, 128], sizes = [16, 128], strides = [1, 1]} : vector<16x256xf32> to vector<16x128xf32>
    %cst_5 = arith.constant 5.000000e-01 : f32
    %8 = vector.broadcast %cst_5 : f32 to vector<16x128xf32>
    %9 = arith.mulf %8, %7 : vector<16x128xf32>
    %10 = math.exp %9 : vector<16x128xf32>
    %c0_6 = arith.constant 0 : index
    %c0_7 = arith.constant 0 : index
    %11 = vector.load %arg4[%c0_6, %c0_7] : memref<16x128xf32, #tpu.memory_space<vmem>>, vector<16x128xf32>
    tpu.vector_store %arg4[%c0_6, %c0_7], %6 {strides = array<i32>} : memref<16x128xf32, #tpu.memory_space<vmem>>, vector<16x128xf32>,
    %c0_8 = arith.constant 0 : index
    %c0_9 = arith.constant 0 : index
    %12 = vector.load %arg5[%c0_8, %c0_9] : memref<16x128xf32, #tpu.memory_space<vmem>>, vector<16x128xf32>
    tpu.vector_store %arg5[%c0_8, %c0_9], %10 {strides = array<i32>} : memref<16x128xf32, #tpu.memory_space<vmem>>, vector<16x128xf32>,
    %c0_10 = arith.constant 0 : index
    %c0_11 = arith.constant 0 : index
    %13 = vector.load %arg3[%c0_10, %c0_11] : memref<16x128xf32, #tpu.memory_space<vmem>>, vector<16x128xf32>
    %14 = arith.mulf %13, %10 : vector<16x128xf32>
    %15 = arith.addf %14, %6 : vector<16x128xf32>
    %c0_12 = arith.constant 0 : index
    %c0_13 = arith.constant 0 : index
    %16 = vector.load %arg6[%c0_12, %c0_13] : memref<16x128xf32, #tpu.memory_space<vmem>>, vector<16x128xf32>
    tpu.vector_store %arg6[%c0_12, %c0_13], %15 {strides = array<i32>} : memref<16x128xf32, #tpu.memory_space<vmem>>, vector<16x128xf32>,
    return
  }
}

module attributes {stable_mosaic.version = 11 : i64} {
  func.func @_mm_kernel(%arg0: i32, %arg1: memref<16x32xbf16, #tpu.memory_space<vmem>>, %arg2: memref<32x128xbf16, #tpu.memory_space<vmem>>, %arg3: memref<1x128xf32, #tpu.memory_space<vmem>>, %arg4: memref<1x128xf32, #tpu.memory_space<vmem>>, %arg5: memref<16x128xbf16, #tpu.memory_space<vmem>>) attributes {dimension_semantics = [#tpu.dimension_semantics<parallel>], iteration_bounds = array<i64: 1>, scalar_prefetch = 0 : i64, scratch_operands = 0 : i64, tpu.core_type = #tpu.core_type<tc>, window_params = [{transform_indices = @transform_0, window_bounds = array<i64: 16, 32>}, {pipeline_mode = #tpu.pipeline_mode<synchronous>, transform_indices = @transform_1, window_bounds = array<i64: 32, 128>}, {pipeline_mode = #tpu.pipeline_mode<synchronous>, transform_indices = @transform_2, window_bounds = array<i64: 1, 128>}, {pipeline_mode = #tpu.pipeline_mode<synchronous>, transform_indices = @transform_3, window_bounds = array<i64: 1, 128>}, {transform_indices = @transform_4, window_bounds = array<i64: 16, 128>}]} {
    %c0 = arith.constant 0 : index
    %c0_0 = arith.constant 0 : index
    %0 = vector.load %arg1[%c0, %c0_0] : memref<16x32xbf16, #tpu.memory_space<vmem>>, vector<16x32xbf16>
    %c0_1 = arith.constant 0 : index
    %c0_2 = arith.constant 0 : index
    %1 = vector.load %arg2[%c0_1, %c0_2] : memref<32x128xbf16, #tpu.memory_space<vmem>>, vector<32x128xbf16>
    %cst = arith.constant dense<0.000000e+00> : vector<16x128xf32>
    %2 = tpu.matmul %0, %1, %cst {dimension_numbers = #tpu.dot_dimension_numbers<[1], [0], [0], [1], [0, 0, 1, 1], [], []>} : vector<16x32xbf16>, vector<32x128xbf16>, vector<16x128xf32> -> vector<16x128xf32>
    %c0_3 = arith.constant 0 : index
    %c0_4 = arith.constant 0 : index
    %3 = vector.load %arg3[%c0_3, %c0_4] : memref<1x128xf32, #tpu.memory_space<vmem>>, vector<1x128xf32>
    %4 = vector.broadcast %3 : vector<1x128xf32> to vector<16x128xf32>
    %5 = arith.mulf %2, %4 : vector<16x128xf32>
    %c0_5 = arith.constant 0 : index
    %c0_6 = arith.constant 0 : index
    %6 = vector.load %arg4[%c0_5, %c0_6] : memref<1x128xf32, #tpu.memory_space<vmem>>, vector<1x128xf32>
    %7 = vector.broadcast %6 : vector<1x128xf32> to vector<16x128xf32>
    %8 = arith.addf %5, %7 : vector<16x128xf32>
    %9 = arith.truncf %8 : vector<16x128xf32> to vector<16x128xbf16>
    %c0_7 = arith.constant 0 : index
    %c0_8 = arith.constant 0 : index
    %10 = vector.load %arg5[%c0_7, %c0_8] : memref<16x128xbf16, #tpu.memory_space<vmem>>, vector<16x128xbf16>
    tpu.vector_store %arg5[%c0_7, %c0_8], %9 {strides = array<i32>} : memref<16x128xbf16, #tpu.memory_space<vmem>>, vector<16x128xbf16>,
    return
  }
  func.func @transform_0(%arg0: i32) -> (i32, i32) {
    %c0_i32 = arith.constant 0 : i32
    %c0_i32_0 = arith.constant 0 : i32
    return %arg0, %c0_i32 : i32, i32
  }
  func.func @transform_1(%arg0: i32) -> (i32, i32) {
    %c0_i32 = arith.constant 0 : i32
    %c0_i32_0 = arith.constant 0 : i32
    %c0_i32_1 = arith.constant 0 : i32
    return %c0_i32, %c0_i32_0 : i32, i32
  }
  func.func @transform_2(%arg0: i32) -> (i32, i32) {
    %c0_i32 = arith.constant 0 : i32
    %c0_i32_0 = arith.constant 0 : i32
    %c0_i32_1 = arith.constant 0 : i32
    return %c0_i32, %c0_i32_0 : i32, i32
  }
  func.func @transform_3(%arg0: i32) -> (i32, i32) {
    %c0_i32 = arith.constant 0 : i32
    %c0_i32_0 = arith.constant 0 : i32
    %c0_i32_1 = arith.constant 0 : i32
    return %c0_i32, %c0_i32_0 : i32, i32
  }
  func.func @transform_4(%arg0: i32) -> (i32, i32) {
    %c0_i32 = arith.constant 0 : i32
    %c0_i32_0 = arith.constant 0 : i32
    return %arg0, %c0_i32 : i32, i32
  }
}

module attributes {stable_mosaic.version = 11 : i64} {
  func.func @_mm_kernel(%arg0: i32, %arg1: memref<16x128xbf16, #tpu.memory_space<vmem>>, %arg2: memref<128x128xbf16, #tpu.memory_space<vmem>>, %arg3: memref<1x128xf32, #tpu.memory_space<vmem>>, %arg4: memref<1x128xf32, #tpu.memory_space<vmem>>, %arg5: memref<16x128xbf16, #tpu.memory_space<vmem>>) attributes {dimension_semantics = [#tpu.dimension_semantics<parallel>], iteration_bounds = array<i64: 1>, scalar_prefetch = 0 : i64, scratch_operands = 0 : i64, tpu.core_type = #tpu.core_type<tc>, window_params = [{transform_indices = @transform_0, window_bounds = array<i64: 16, 128>}, {pipeline_mode = #tpu.pipeline_mode<synchronous>, transform_indices = @transform_1, window_bounds = array<i64: 128, 128>}, {pipeline_mode = #tpu.pipeline_mode<synchronous>, transform_indices = @transform_2, window_bounds = array<i64: 1, 128>}, {pipeline_mode = #tpu.pipeline_mode<synchronous>, transform_indices = @transform_3, window_bounds = array<i64: 1, 128>}, {transform_indices = @transform_4, window_bounds = array<i64: 16, 128>}]} {
    %c0 = arith.constant 0 : index
    %c0_0 = arith.constant 0 : index
    %0 = vector.load %arg1[%c0, %c0_0] : memref<16x128xbf16, #tpu.memory_space<vmem>>, vector<16x128xbf16>
    %c0_1 = arith.constant 0 : index
    %c0_2 = arith.constant 0 : index
    %1 = vector.load %arg2[%c0_1, %c0_2] : memref<128x128xbf16, #tpu.memory_space<vmem>>, vector<128x128xbf16>
    %cst = arith.constant dense<0.000000e+00> : vector<16x128xf32>
    %2 = tpu.matmul %0, %1, %cst {dimension_numbers = #tpu.dot_dimension_numbers<[1], [0], [0], [1], [0, 0, 1, 1], [], []>} : vector<16x128xbf16>, vector<128x128xbf16>, vector<16x128xf32> -> vector<16x128xf32>
    %c0_3 = arith.constant 0 : index
    %c0_4 = arith.constant 0 : index
    %3 = vector.load %arg3[%c0_3, %c0_4] : memref<1x128xf32, #tpu.memory_space<vmem>>, vector<1x128xf32>
    %4 = vector.broadcast %3 : vector<1x128xf32> to vector<16x128xf32>
    %5 = arith.mulf %2, %4 : vector<16x128xf32>
    %c0_5 = arith.constant 0 : index
    %c0_6 = arith.constant 0 : index
    %6 = vector.load %arg4[%c0_5, %c0_6] : memref<1x128xf32, #tpu.memory_space<vmem>>, vector<1x128xf32>
    %7 = vector.broadcast %6 : vector<1x128xf32> to vector<16x128xf32>
    %8 = arith.addf %5, %7 : vector<16x128xf32>
    %cst_7 = arith.constant 0.000000e+00 : f32
    %9 = vector.broadcast %cst_7 : f32 to vector<16x128xf32>
    %10 = arith.cmpf ogt, %8, %9 : vector<16x128xf32>
    %cst_8 = arith.constant 0.00999999977 : f32
    %11 = vector.broadcast %cst_8 : f32 to vector<16x128xf32>
    %12 = arith.mulf %11, %8 : vector<16x128xf32>
    %13 = arith.select %10, %8, %12 : vector<16x128xi1>, vector<16x128xf32>
    %14 = arith.truncf %13 : vector<16x128xf32> to vector<16x128xbf16>
    %c0_9 = arith.constant 0 : index
    %c0_10 = arith.constant 0 : index
    %15 = vector.load %arg5[%c0_9, %c0_10] : memref<16x128xbf16, #tpu.memory_space<vmem>>, vector<16x128xbf16>
    tpu.vector_store %arg5[%c0_9, %c0_10], %14 {strides = array<i32>} : memref<16x128xbf16, #tpu.memory_space<vmem>>, vector<16x128xbf16>,
    return
  }
  func.func @transform_0(%arg0: i32) -> (i32, i32) {
    %c0_i32 = arith.constant 0 : i32
    %c0_i32_0 = arith.constant 0 : i32
    return %arg0, %c0_i32 : i32, i32
  }
  func.func @transform_1(%arg0: i32) -> (i32, i32) {
    %c0_i32 = arith.constant 0 : i32
    %c0_i32_0 = arith.constant 0 : i32
    %c0_i32_1 = arith.constant 0 : i32
    return %c0_i32, %c0_i32_0 : i32, i32
  }
  func.func @transform_2(%arg0: i32) -> (i32, i32) {
    %c0_i32 = arith.constant 0 : i32
    %c0_i32_0 = arith.constant 0 : i32
    %c0_i32_1 = arith.constant 0 : i32
    return %c0_i32, %c0_i32_0 : i32, i32
  }
  func.func @transform_3(%arg0: i32) -> (i32, i32) {
    %c0_i32 = arith.constant 0 : i32
    %c0_i32_0 = arith.constant 0 : i32
    %c0_i32_1 = arith.constant 0 : i32
    return %c0_i32, %c0_i32_0 : i32, i32
  }
  func.func @transform_4(%arg0: i32) -> (i32, i32) {
    %c0_i32 = arith.constant 0 : i32
    %c0_i32_0 = arith.constant 0 : i32
    return %arg0, %c0_i32 : i32, i32
  }
}

module attributes {stable_mosaic.version = 11 : i64} {
  func.func @_mm_kernel(%arg0: i32, %arg1: memref<64x64xbf16, #tpu.memory_space<vmem>>, %arg2: memref<64x128xbf16, #tpu.memory_space<vmem>>, %arg3: memref<1x128xf32, #tpu.memory_space<vmem>>, %arg4: memref<1x128xf32, #tpu.memory_space<vmem>>, %arg5: memref<64x128xbf16, #tpu.memory_space<vmem>>) attributes {dimension_semantics = [#tpu.dimension_semantics<parallel>], iteration_bounds = array<i64: 2>, scalar_prefetch = 0 : i64, scratch_operands = 0 : i64, tpu.core_type = #tpu.core_type<tc>, window_params = [{transform_indices = @transform_0, window_bounds = array<i64: 64, 64>}, {pipeline_mode = #tpu.pipeline_mode<synchronous>, transform_indices = @transform_1, window_bounds = array<i64: 64, 128>}, {pipeline_mode = #tpu.pipeline_mode<synchronous>, transform_indices = @transform_2, window_bounds = array<i64: 1, 128>}, {pipeline_mode = #tpu.pipeline_mode<synchronous>, transform_indices = @transform_3, window_bounds = array<i64: 1, 128>}, {transform_indices = @transform_4, window_bounds = array<i64: 64, 128>}]} {
    %c0 = arith.constant 0 : index
    %c0_0 = arith.constant 0 : index
    %0 = vector.load %arg1[%c0, %c0_0] : memref<64x64xbf16, #tpu.memory_space<vmem>>, vector<64x64xbf16>
    %c0_1 = arith.constant 0 : index
    %c0_2 = arith.constant 0 : index
    %1 = vector.load %arg2[%c0_1, %c0_2] : memref<64x128xbf16, #tpu.memory_space<vmem>>, vector<64x128xbf16>
    %cst = arith.constant dense<0.000000e+00> : vector<64x128xf32>
    %2 = tpu.matmul %0, %1, %cst {dimension_numbers = #tpu.dot_dimension_numbers<[1], [0], [0], [1], [0, 0, 1, 1], [], []>} : vector<64x64xbf16>, vector<64x128xbf16>, vector<64x128xf32> -> vector<64x128xf32>
    %c0_3 = arith.constant 0 : index
    %c0_4 = arith.constant 0 : index
    %3 = vector.load %arg3[%c0_3, %c0_4] : memref<1x128xf32, #tpu.memory_space<vmem>>, vector<1x128xf32>
    %4 = vector.broadcast %3 : vector<1x128xf32> to vector<64x128xf32>
    %5 = arith.mulf %2, %4 : vector<64x128xf32>
    %c0_5 = arith.constant 0 : index
    %c0_6 = arith.constant 0 : index
    %6 = vector.load %arg4[%c0_5, %c0_6] : memref<1x128xf32, #tpu.memory_space<vmem>>, vector<1x128xf32>
    %7 = vector.broadcast %6 : vector<1x128xf32> to vector<64x128xf32>
    %8 = arith.addf %5, %7 : vector<64x128xf32>
    %cst_7 = arith.constant 0.000000e+00 : f32
    %9 = vector.broadcast %cst_7 : f32 to vector<64x128xf32>
    %10 = arith.cmpf ogt, %8, %9 : vector<64x128xf32>
    %cst_8 = arith.constant 0.00999999977 : f32
    %11 = vector.broadcast %cst_8 : f32 to vector<64x128xf32>
    %12 = arith.mulf %11, %8 : vector<64x128xf32>
    %13 = arith.select %10, %8, %12 : vector<64x128xi1>, vector<64x128xf32>
    %14 = arith.truncf %13 : vector<64x128xf32> to vector<64x128xbf16>
    %c0_9 = arith.constant 0 : index
    %c0_10 = arith.constant 0 : index
    %15 = vector.load %arg5[%c0_9, %c0_10] : memref<64x128xbf16, #tpu.memory_space<vmem>>, vector<64x128xbf16>
    tpu.vector_store %arg5[%c0_9, %c0_10], %14 {strides = array<i32>} : memref<64x128xbf16, #tpu.memory_space<vmem>>, vector<64x128xbf16>,
    return
  }
  func.func @transform_0(%arg0: i32) -> (i32, i32) {
    %c0_i32 = arith.constant 0 : i32
    %c0_i32_0 = arith.constant 0 : i32
    return %arg0, %c0_i32 : i32, i32
  }
  func.func @transform_1(%arg0: i32) -> (i32, i32) {
    %c0_i32 = arith.constant 0 : i32
    %c0_i32_0 = arith.constant 0 : i32
    %c0_i32_1 = arith.constant 0 : i32
    return %c0_i32, %c0_i32_0 : i32, i32
  }
  func.func @transform_2(%arg0: i32) -> (i32, i32) {
    %c0_i32 = arith.constant 0 : i32
    %c0_i32_0 = arith.constant 0 : i32
    %c0_i32_1 = arith.constant 0 : i32
    return %c0_i32, %c0_i32_0 : i32, i32
  }
  func.func @transform_3(%arg0: i32) -> (i32, i32) {
    %c0_i32 = arith.constant 0 : i32
    %c0_i32_0 = arith.constant 0 : i32
    %c0_i32_1 = arith.constant 0 : i32
    return %c0_i32, %c0_i32_0 : i32, i32
  }
  func.func @transform_4(%arg0: i32) -> (i32, i32) {
    %c0_i32 = arith.constant 0 : i32
    %c0_i32_0 = arith.constant 0 : i32
    return %arg0, %c0_i32 : i32, i32
  }
}

module attributes {stable_mosaic.version = 11 : i64} {
  func.func @_mm_kernel(%arg0: i32, %arg1: memref<256x32xbf16, #tpu.memory_space<vmem>>, %arg2: memref<32x128xbf16, #tpu.memory_space<vmem>>, %arg3: memref<1x128xf32, #tpu.memory_space<vmem>>, %arg4: memref<1x128xf32, #tpu.memory_space<vmem>>, %arg5: memref<256x128xbf16, #tpu.memory_space<vmem>>) attributes {dimension_semantics = [#tpu.dimension_semantics<parallel>], iteration_bounds = array<i64: 4>, scalar_prefetch = 0 : i64, scratch_operands = 0 : i64, tpu.core_type = #tpu.core_type<tc>, window_params = [{transform_indices = @transform_0, window_bounds = array<i64: 256, 32>}, {pipeline_mode = #tpu.pipeline_mode<synchronous>, transform_indices = @transform_1, window_bounds = array<i64: 32, 128>}, {pipeline_mode = #tpu.pipeline_mode<synchronous>, transform_indices = @transform_2, window_bounds = array<i64: 1, 128>}, {pipeline_mode = #tpu.pipeline_mode<synchronous>, transform_indices = @transform_3, window_bounds = array<i64: 1, 128>}, {transform_indices = @transform_4, window_bounds = array<i64: 256, 128>}]} {
    %c0 = arith.constant 0 : index
    %c0_0 = arith.constant 0 : index
    %0 = vector.load %arg1[%c0, %c0_0] : memref<256x32xbf16, #tpu.memory_space<vmem>>, vector<256x32xbf16>
    %c0_1 = arith.constant 0 : index
    %c0_2 = arith.constant 0 : index
    %1 = vector.load %arg2[%c0_1, %c0_2] : memref<32x128xbf16, #tpu.memory_space<vmem>>, vector<32x128xbf16>
    %cst = arith.constant dense<0.000000e+00> : vector<256x128xf32>
    %2 = tpu.matmul %0, %1, %cst {dimension_numbers = #tpu.dot_dimension_numbers<[1], [0], [0], [1], [0, 0, 1, 1], [], []>} : vector<256x32xbf16>, vector<32x128xbf16>, vector<256x128xf32> -> vector<256x128xf32>
    %c0_3 = arith.constant 0 : index
    %c0_4 = arith.constant 0 : index
    %3 = vector.load %arg3[%c0_3, %c0_4] : memref<1x128xf32, #tpu.memory_space<vmem>>, vector<1x128xf32>
    %4 = vector.broadcast %3 : vector<1x128xf32> to vector<256x128xf32>
    %5 = arith.mulf %2, %4 : vector<256x128xf32>
    %c0_5 = arith.constant 0 : index
    %c0_6 = arith.constant 0 : index
    %6 = vector.load %arg4[%c0_5, %c0_6] : memref<1x128xf32, #tpu.memory_space<vmem>>, vector<1x128xf32>
    %7 = vector.broadcast %6 : vector<1x128xf32> to vector<256x128xf32>
    %8 = arith.addf %5, %7 : vector<256x128xf32>
    %cst_7 = arith.constant 0.000000e+00 : f32
    %9 = vector.broadcast %cst_7 : f32 to vector<256x128xf32>
    %10 = arith.cmpf ogt, %8, %9 : vector<256x128xf32>
    %cst_8 = arith.constant 0.00999999977 : f32
    %11 = vector.broadcast %cst_8 : f32 to vector<256x128xf32>
    %12 = arith.mulf %11, %8 : vector<256x128xf32>
    %13 = arith.select %10, %8, %12 : vector<256x128xi1>, vector<256x128xf32>
    %14 = arith.truncf %13 : vector<256x128xf32> to vector<256x128xbf16>
    %c0_9 = arith.constant 0 : index
    %c0_10 = arith.constant 0 : index
    %15 = vector.load %arg5[%c0_9, %c0_10] : memref<256x128xbf16, #tpu.memory_space<vmem>>, vector<256x128xbf16>
    tpu.vector_store %arg5[%c0_9, %c0_10], %14 {strides = array<i32>} : memref<256x128xbf16, #tpu.memory_space<vmem>>, vector<256x128xbf16>,
    return
  }
  func.func @transform_0(%arg0: i32) -> (i32, i32) {
    %c0_i32 = arith.constant 0 : i32
    %c0_i32_0 = arith.constant 0 : i32
    return %arg0, %c0_i32 : i32, i32
  }
  func.func @transform_1(%arg0: i32) -> (i32, i32) {
    %c0_i32 = arith.constant 0 : i32
    %c0_i32_0 = arith.constant 0 : i32
    %c0_i32_1 = arith.constant 0 : i32
    return %c0_i32, %c0_i32_0 : i32, i32
  }
  func.func @transform_2(%arg0: i32) -> (i32, i32) {
    %c0_i32 = arith.constant 0 : i32
    %c0_i32_0 = arith.constant 0 : i32
    %c0_i32_1 = arith.constant 0 : i32
    return %c0_i32, %c0_i32_0 : i32, i32
  }
  func.func @transform_3(%arg0: i32) -> (i32, i32) {
    %c0_i32 = arith.constant 0 : i32
    %c0_i32_0 = arith.constant 0 : i32
    %c0_i32_1 = arith.constant 0 : i32
    return %c0_i32, %c0_i32_0 : i32, i32
  }
  func.func @transform_4(%arg0: i32) -> (i32, i32) {
    %c0_i32 = arith.constant 0 : i32
    %c0_i32_0 = arith.constant 0 : i32
    return %arg0, %c0_i32 : i32, i32
  }
}

module attributes {stable_mosaic.version = 11 : i64} {
  func.func @_mm_kernel(%arg0: i32, %arg1: memref<256x108xbf16, #tpu.memory_space<vmem>>, %arg2: memref<108x128xbf16, #tpu.memory_space<vmem>>, %arg3: memref<1x128xf32, #tpu.memory_space<vmem>>, %arg4: memref<1x128xf32, #tpu.memory_space<vmem>>, %arg5: memref<256x128xf32, #tpu.memory_space<vmem>>) attributes {dimension_semantics = [#tpu.dimension_semantics<parallel>], iteration_bounds = array<i64: 32>, scalar_prefetch = 0 : i64, scratch_operands = 0 : i64, tpu.core_type = #tpu.core_type<tc>, window_params = [{transform_indices = @transform_0, window_bounds = array<i64: 256, 108>}, {pipeline_mode = #tpu.pipeline_mode<synchronous>, transform_indices = @transform_1, window_bounds = array<i64: 108, 128>}, {pipeline_mode = #tpu.pipeline_mode<synchronous>, transform_indices = @transform_2, window_bounds = array<i64: 1, 128>}, {pipeline_mode = #tpu.pipeline_mode<synchronous>, transform_indices = @transform_3, window_bounds = array<i64: 1, 128>}, {transform_indices = @transform_4, window_bounds = array<i64: 256, 128>}]} {
    %c0 = arith.constant 0 : index
    %c0_0 = arith.constant 0 : index
    %0 = vector.load %arg1[%c0, %c0_0] : memref<256x108xbf16, #tpu.memory_space<vmem>>, vector<256x108xbf16>
    %c0_1 = arith.constant 0 : index
    %c0_2 = arith.constant 0 : index
    %1 = vector.load %arg2[%c0_1, %c0_2] : memref<108x128xbf16, #tpu.memory_space<vmem>>, vector<108x128xbf16>
    %cst = arith.constant dense<0.000000e+00> : vector<256x128xf32>
    %2 = tpu.matmul %0, %1, %cst {dimension_numbers = #tpu.dot_dimension_numbers<[1], [0], [0], [1], [0, 0, 1, 1], [], []>} : vector<256x108xbf16>, vector<108x128xbf16>, vector<256x128xf32> -> vector<256x128xf32>
    %c0_3 = arith.constant 0 : index
    %c0_4 = arith.constant 0 : index
    %3 = vector.load %arg3[%c0_3, %c0_4] : memref<1x128xf32, #tpu.memory_space<vmem>>, vector<1x128xf32>
    %4 = vector.broadcast %3 : vector<1x128xf32> to vector<256x128xf32>
    %5 = arith.mulf %2, %4 : vector<256x128xf32>
    %c0_5 = arith.constant 0 : index
    %c0_6 = arith.constant 0 : index
    %6 = vector.load %arg4[%c0_5, %c0_6] : memref<1x128xf32, #tpu.memory_space<vmem>>, vector<1x128xf32>
    %7 = vector.broadcast %6 : vector<1x128xf32> to vector<256x128xf32>
    %8 = arith.addf %5, %7 : vector<256x128xf32>
    %cst_7 = arith.constant 0.000000e+00 : f32
    %9 = vector.broadcast %cst_7 : f32 to vector<256x128xf32>
    %10 = arith.subf %9, %8 : vector<256x128xf32>
    %11 = math.exp %10 : vector<256x128xf32>
    %cst_8 = arith.constant 1.000000e+00 : f32
    %12 = vector.broadcast %cst_8 : f32 to vector<256x128xf32>
    %13 = arith.addf %12, %11 : vector<256x128xf32>
    %14 = tpu.reciprocal %13 {approx = true} : vector<256x128xf32> -> vector<256x128xf32>
    %c0_9 = arith.constant 0 : index
    %c0_10 = arith.constant 0 : index
    %15 = vector.load %arg5[%c0_9, %c0_10] : memref<256x128xf32, #tpu.memory_space<vmem>>, vector<256x128xf32>
    tpu.vector_store %arg5[%c0_9, %c0_10], %14 {strides = array<i32>} : memref<256x128xf32, #tpu.memory_space<vmem>>, vector<256x128xf32>,
    return
  }
  func.func @transform_0(%arg0: i32) -> (i32, i32) {
    %c0_i32 = arith.constant 0 : i32
    %c0_i32_0 = arith.constant 0 : i32
    return %arg0, %c0_i32 : i32, i32
  }
  func.func @transform_1(%arg0: i32) -> (i32, i32) {
    %c0_i32 = arith.constant 0 : i32
    %c0_i32_0 = arith.constant 0 : i32
    %c0_i32_1 = arith.constant 0 : i32
    return %c0_i32, %c0_i32_0 : i32, i32
  }
  func.func @transform_2(%arg0: i32) -> (i32, i32) {
    %c0_i32 = arith.constant 0 : i32
    %c0_i32_0 = arith.constant 0 : i32
    %c0_i32_1 = arith.constant 0 : i32
    return %c0_i32, %c0_i32_0 : i32, i32
  }
  func.func @transform_3(%arg0: i32) -> (i32, i32) {
    %c0_i32 = arith.constant 0 : i32
    %c0_i32_0 = arith.constant 0 : i32
    %c0_i32_1 = arith.constant 0 : i32
    return %c0_i32, %c0_i32_0 : i32, i32
  }
  func.func @transform_4(%arg0: i32) -> (i32, i32) {
    %c0_i32 = arith.constant 0 : i32
    %c0_i32_0 = arith.constant 0 : i32
    return %arg0, %c0_i32 : i32, i32
  }
}

</mosaic_0001>

<bundles_post_ra>
// kernel: vae_forward.9
= control target key start
LH: loop header
LB: loop body
LE: loop exit
PB: predicated region body
PF: predicated region fallthrough
CT: control target
= control target key end

     0   :  { %s1261_s15 = smov 0   ;;  %s1423_s0 = inlined_call_operand.vmem [shape: bf16[1024,27], index: 0, kind: input, shape index: {}]   ;;  %s1424_s1 = inlined_call_operand.vmem [shape: bf16[27,128], index: 1, kind: input, shape index: {}]   ;;  %s1425_s2 = inlined_call_operand.vmem [shape: f32[1,128], index: 2, kind: input, shape index: {}]   ;;  %s1426_s3 = inlined_call_operand.vmem [shape: f32[1,128], index: 3, kind: input, shape index: {}]   ;;  %s1427_s4 = inlined_call_operand.vmem [shape: bf16[1024,128], index: 4, kind: output, shape index: {}]  }
   0x1 LB: > { %s936_s16 = sadd.s32 4294967295, %s1233_s15   ;;  %p940_p0 = scmp.ge.s32.totalorder %s1233_s15, 1  ;;  %s1233_s15 = sphi %s1261_s15, %s14_s15  }
   0x2   : > { %p163_p1 = scmp.lt.s32.totalorder %s1233_s15, 5 }
   0x4   : > { %p164_p2 = pnand %p940_p0, %p163_p1 }
   0x5   : > { %v1209_v0 = vld [vmem:[%s1424_s1] sm:$0xff] (!%p164_p2)   ;;  %vm378_vm0 = vcmask (!%p164_p2), 1044480   ;;  %v1210_v1 = vld [vmem:[%s1424_s1 + $0x8] sm:$0x3f] (!%p164_p2)   ;;  %vm379_vm1 = vcmask (!%p164_p2), 1045504   ;;  %s941_s21 = sshll.u32 (!%p164_p2), %s936_s16, 5 }
   0x6   : > { %167 = sbr.rel (%p164_p2) target bundleno = 279 (0x117), region = 36  ;;  %1160 = vmatprep.subr.bf16.mxu0 (!%p164_p2), %v1209_v0  ;;  %1196 = vmatprep.subr.bf16.mxu1 (!%p164_p2), %v1209_v0  ;;  %v1235_v2 = vmov (!%p164_p2), 65535   ;;  %p190_p3 = scmp.lt.s32.totalorder (!%p164_p2), %s941_s21, 127  ;;  %vm329_vm2 = vcmask (!%p164_p2), 220160   ;;  %v1320_v22 = vld [vmem:[%s1425_s2] ss:$0 sm:$0xff] (!%p164_p2) }
   0x7   : > { %1161 = vmatpush3.bf16.msra.mxu0 (!%p164_p2), %v1209_v0  ;;  %1198 = vmatpush3.bf16.msra.mxu1 (!%p164_p2), %v1209_v0  ;;  %v380_v3 = vsel (!%p164_p2), %vm378_vm0, 4294967295, %v1235_v2  ;;  %v1325_v24 = vld [vmem:[%s1426_s3] ss:$0 sm:$0xff] (!%p164_p2) }
   0x8   : > { %v381_v4 = vsel (!%p164_p2), %vm379_vm1, %v380_v3, 0 }
   0x9   : > { %v383_v5 = vand.u32 (!%p164_p2), %v1210_v1, %v381_v4 }
   0xb   : > { %1162 = vmatprep.subr.bf16.mxu0 (!%p164_p2), %v383_v5  ;;  %1197 = vmatprep.subr.bf16.mxu1 (!%p164_p2), %v383_v5 }
   0xc   : > { %1163 = vmatpush3.bf16.msra.mxu0 (!%p164_p2), %v383_v5  ;;  %1199 = vmatpush3.bf16.msra.mxu1 (!%p164_p2), %v383_v5 }
   0xd   : > { %s1429_s21 = smov (!%p190_p3, %s941_s21), 127 }
   0xe   : > { %s942_s22 = sshll.u32 %s1429_s21, 2 }
   0xf   : > { %s1283_s25 = scalar_lea.vmem %s1423_s0, %s942_s22  ;;  %s1348_s6 = scalar_lea.vmem %s1427_s4, %s942_s22 }
  0x10   : > { %v1211_v6 = vld [vmem:[%s1283_s25] sm:$0xff]   ;;  %v1213_v8 = vld [vmem:[%s1283_s25 + $0x8] sm:$0xff]   ;;  %v1215_v10 = vld [vmem:[%s1283_s25 + $0x10] sm:$0xff]  }
  0x11   : > { %v1212_v7 = vld [vmem:[%s1283_s25 + $0x40] sm:$0xff]   ;;  %1164 = vmatprep.mubr.msk.bf16.mxu0 %vm329_vm2, %v1211_v6  ;;  %v1214_v9 = vld [vmem:[%s1283_s25 + $0x48] sm:$0xff]   ;;  %v1216_v11 = vld [vmem:[%s1283_s25 + $0x50] sm:$0xff]  }
  0x12   : > { %1180 = vmatprep.mubr.msk.bf16.mxu1 %vm329_vm2, %v1212_v7  ;;  %1165 = vmatmul.mubr.msk.bf16.vlgmr.msra.gmra.mrb[0].mxu0 %vm329_vm2, %v1213_v8  ;;  %v1217_v12 = vld [vmem:[%s1283_s25 + $0x18] sm:$0xff]   ;;  %v1219_v14 = vld [vmem:[%s1283_s25 + $0x20] sm:$0xff]   ;;  %v1221_v16 = vld [vmem:[%s1283_s25 + $0x28] sm:$0xff]  }
  0x13   : > { %1181 = vmatmul.mubr.msk.bf16.vlgmr.msra.gmra.mrb[0].mxu1 %vm329_vm2, %v1214_v9  ;;  %1168 = vmatprep.mubr.msk.bf16.mxu0 %vm329_vm2, %v1215_v10  ;;  %v1218_v13 = vld [vmem:[%s1283_s25 + $0x58] sm:$0xff]   ;;  %v1220_v15 = vld [vmem:[%s1283_s25 + $0x60] sm:$0xff]   ;;  %v1222_v17 = vld [vmem:[%s1283_s25 + $0x68] sm:$0xff]  }
  0x14   : > { %1184 = vmatprep.mubr.msk.bf16.mxu1 %vm329_vm2, %v1216_v11  ;;  %v1223_v18 = vld [vmem:[%s1283_s25 + $0x30] sm:$0xff]   ;;  %v1225_v20 = vld [vmem:[%s1283_s25 + $0x38] sm:$0xff]  }
  0x15   : > { %v1224_v19 = vld [vmem:[%s1283_s25 + $0x70] sm:$0xff]   ;;  %v1226_v21 = vld [vmem:[%s1283_s25 + $0x78] sm:$0xff]  }
  0x1a   : > { %1169 = vmatmul.mubr.msk.bf16.gmra.mrb[4].mxu0 %vm329_vm2, %v1217_v12 }
  0x1b   : > { %1185 = vmatmul.mubr.msk.bf16.gmra.mrb[4].mxu1 %vm329_vm2, %v1218_v13  ;;  %1172 = vmatprep.mubr.msk.bf16.mxu0 %vm329_vm2, %v1219_v14 }
  0x1c   : > { %1188 = vmatprep.mubr.msk.bf16.mxu1 %vm329_vm2, %v1220_v15 }
  0x22   : > { %1173 = vmatmul.mubr.msk.bf16.gmra.mrb[8].mxu0 %vm329_vm2, %v1221_v16 }
  0x23   : > { %1189 = vmatmul.mubr.msk.bf16.gmra.mrb[8].mxu1 %vm329_vm2, %v1222_v17  ;;  %1176 = vmatprep.mubr.msk.bf16.mxu0 %vm329_vm2, %v1223_v18 }
  0x24   : > { %1192 = vmatprep.mubr.msk.bf16.mxu1 %vm329_vm2, %v1224_v19 }
  0x2a   : > { %1177 = vmatmul.mubr.msk.bf16.gmra.mrb[12].mxu0 %vm329_vm2, %v1225_v20 }
  0x2b   : > { %1193 = vmatmul.mubr.msk.bf16.gmra.mrb[12].mxu1 %vm329_vm2, %v1226_v21 }
  0xe5   : > { %v1166_v23 = vpop.f32.mrb[0].mxu0 }
  0xe6   : > { %v555_v25 = vmul.f32 %v1166_v23, %v1320_v22  ;;  %v1182_v26 = vpop.f32.mrb[0].mxu1  ;;  %v419_v27 = vpop.f32.mrb[1].mxu0 }
  0xe7   : > { %v571_v28 = vmul.f32 %v1182_v26, %v1320_v22  ;;  %v553_v29 = vmul.f32 %v1320_v22, %v419_v27  ;;  %v483_v30 = vpop.f32.mrb[1].mxu1  ;;  %v1167_v31 = vpop.f32.mrb[2].mxu0 }
  0xe8   : > { %v594_v32 = vadd.f32 %v1325_v24, %v555_v25  ;;  %v569_v33 = vmul.f32 %v1320_v22, %v483_v30  ;;  %v556_v34 = vmul.f32 %v1167_v31, %v1320_v22  ;;  %v1183_v35 = vpop.f32.mrb[2].mxu1  ;;  %v422_v36 = vpop.f32.mrb[3].mxu0 }
  0xe9   : > { %v610_v37 = vadd.f32 %v1325_v24, %v571_v28  ;;  %v592_v38 = vadd.f32 %v1325_v24, %v553_v29  ;;  %v572_v39 = vmul.f32 %v1183_v35, %v1320_v22  ;;  %v554_v40 = vmul.f32 %v1320_v22, %v422_v36  ;;  %v486_v41 = vpop.f32.mrb[3].mxu1 }
  0xea   : > { %vm626_vm3 = vcmp.gt.f32.partialorder %v594_v32, 0.0  ;;  %v658_v42 = vmul.f32 0.01, %v594_v32  ;;  %v608_v43 = vadd.f32 %v1325_v24, %v569_v33  ;;  %v595_v44 = vadd.f32 %v1325_v24, %v556_v34 }
  0xeb   : > { %vm642_vm4 = vcmp.gt.f32.partialorder %v610_v37, 0.0  ;;  %v674_v45 = vmul.f32 0.01, %v610_v37  ;;  %vm624_vm5 = vcmp.gt.f32.partialorder %v592_v38, 0.0  ;;  %v656_v46 = vmul.f32 0.01, %v592_v38 }
  0xec   : > { %v690_v47 = vsel %vm626_vm3, %v594_v32, %v658_v42  ;;  %vm640_vm6 = vcmp.gt.f32.partialorder %v608_v43, 0.0  ;;  %vm627_vm7 = vcmp.gt.f32.partialorder %v595_v44, 0.0  ;;  %v672_v49 = vmul.f32 0.01, %v608_v43 }
  0xed   : > { %v706_v48 = vsel %vm642_vm4, %v610_v37, %v674_v45  ;;  %v659_v50 = vmul.f32 0.01, %v595_v44  ;;  %v611_v51 = vadd.f32 %v1325_v24, %v572_v39  ;;  %v1170_v52 = vpop.f32.mrb[4].mxu0  ;;  %v688_v53 = vsel %vm624_vm5, %v592_v38, %v656_v46 }
  0xee   : > { %v593_v54 = vadd.f32 %v1325_v24, %v554_v40  ;;  %v570_v55 = vmul.f32 %v1320_v22, %v486_v41  ;;  %v559_v56 = vmul.f32 %v1170_v52, %v1320_v22  ;;  %v1186_v57 = vpop.f32.mrb[4].mxu1  ;;  %v435_v58 = vpop.f32.mrb[5].mxu0  ;;  %v704_v13 = vsel %vm640_vm6, %v608_v43, %v672_v49 }
  0xef   : > { %v691_v59 = vsel %vm627_vm7, %v595_v44, %v659_v50  ;;  %vm643_vm8 = vcmp.gt.f32.partialorder %v611_v51, 0.0  ;;  %v675_v60 = vmul.f32 0.01, %v611_v51  ;;  %v575_v61 = vmul.f32 %v1186_v57, %v1320_v22  ;;  %v499_v62 = vpop.f32.mrb[5].mxu1  ;;  %v1171_v63 = vpop.f32.mrb[6].mxu0 }
  0xf0   : > { %v1055_v0 = vpack.c.bf16 %v691_v59, %v690_v47  ;;  %vm625_vm9 = vcmp.gt.f32.partialorder %v593_v54, 0.0  ;;  %v657_v1 = vmul.f32 0.01, %v593_v54  ;;  %v609_v2 = vadd.f32 %v1325_v24, %v570_v55  ;;  %v1187_v3 = vpop.f32.mrb[6].mxu1  ;;  %v438_v4 = vpop.f32.mrb[7].mxu0 }
  0xf1   : > { %v707_v5 = vsel %vm643_vm8, %v611_v51, %v675_v60  ;;  %v598_v6 = vadd.f32 %v1325_v24, %v559_v56  ;;  %v614_v7 = vadd.f32 %v1325_v24, %v575_v61  ;;  %v557_v8 = vmul.f32 %v1320_v22, %v435_v58  ;;  %v502_v9 = vpop.f32.mrb[7].mxu1 }
  0xf2   : > { %1127 = vst [vmem:[%s1348_s6 + $0x8] sm:$0xff] %v1055_v0   ;;  %v1095_v10 = vpack.c.bf16 %v707_v5, %v706_v48  ;;  %v689_v11 = vsel %vm625_vm9, %v593_v54, %v657_v1  ;;  %vm641_vm10 = vcmp.gt.f32.partialorder %v609_v2, 0.0  ;;  %v673_v12 = vmul.f32 0.01, %v609_v2 }
  0xf3   : > { %v1050_v14 = vpack.c.bf16 %v689_v11, %v688_v53  ;;  %vm630_vm11 = vcmp.gt.f32.partialorder %v598_v6, 0.0  ;;  %v662_v15 = vmul.f32 0.01, %v598_v6  ;;  %v678_v17 = vmul.f32 0.01, %v614_v7 }
  0xf4   : > { %1135 = vst [vmem:[%s1348_s6 + $0x48] sm:$0xff] %v1095_v10   ;;  %v705_v16 = vsel %vm641_vm10, %v609_v2, %v673_v12  ;;  %v596_v18 = vadd.f32 %v1325_v24, %v557_v8  ;;  %v573_v19 = vmul.f32 %v1320_v22, %v499_v62  ;;  %vm646_vm12 = vcmp.gt.f32.partialorder %v614_v7, 0.0 }
  0xf5   : > { %1051 = vst [vmem:[%s1348_s6] sm:$0xff] %v1050_v14   ;;  %v1090_v20 = vpack.c.bf16 %v705_v16, %v704_v13  ;;  %v560_v21 = vmul.f32 %v1171_v63, %v1320_v22  ;;  %v576_v23 = vmul.f32 %v1187_v3, %v1320_v22  ;;  %v1174_v25 = vpop.f32.mrb[8].mxu0  ;;  %v694_v26 = vsel %vm630_vm11, %v598_v6, %v662_v15 }
  0xf6   : > { %vm628_vm13 = vcmp.gt.f32.partialorder %v596_v18, 0.0  ;;  %v660_v27 = vmul.f32 0.01, %v596_v18  ;;  %v612_v28 = vadd.f32 %v1325_v24, %v573_v19  ;;  %v1190_v29 = vpop.f32.mrb[8].mxu1  ;;  %v451_v30 = vpop.f32.mrb[9].mxu0  ;;  %v558_v33 = vmul.f32 %v1320_v22, %v438_v4 }
  0xf7   : > { %1134 = vst [vmem:[%s1348_s6 + $0x40] sm:$0xff] %v1090_v20   ;;  %v599_v31 = vadd.f32 %v1325_v24, %v560_v21  ;;  %v615_v32 = vadd.f32 %v1325_v24, %v576_v23  ;;  %v574_v34 = vmul.f32 %v1320_v22, %v502_v9  ;;  %v515_v35 = vpop.f32.mrb[9].mxu1  ;;  %v1175_v36 = vpop.f32.mrb[10].mxu0  ;;  %v710_v37 = vsel %vm646_vm12, %v614_v7, %v678_v17 }
  0xf8   : > { %v692_v38 = vsel %vm628_vm13, %v596_v18, %v660_v27  ;;  %vm644_vm14 = vcmp.gt.f32.partialorder %v612_v28, 0.0  ;;  %v563_v39 = vmul.f32 %v1174_v25, %v1320_v22  ;;  %v1191_v40 = vpop.f32.mrb[10].mxu1  ;;  %v454_v41 = vpop.f32.mrb[11].mxu0  ;;  %v676_v44 = vmul.f32 0.01, %v612_v28 }
  0xf9   : > { %vm631_vm15 = vcmp.gt.f32.partialorder %v599_v31, 0.0  ;;  %v663_v42 = vmul.f32 0.01, %v599_v31  ;;  %vm647_vm0 = vcmp.gt.f32.partialorder %v615_v32, 0.0  ;;  %v679_v43 = vmul.f32 0.01, %v615_v32 }
  0xfa   : > { %v597_v45 = vadd.f32 %v1325_v24, %v558_v33  ;;  %v613_v46 = vadd.f32 %v1325_v24, %v574_v34  ;;  %v602_v47 = vadd.f32 %v1325_v24, %v563_v39  ;;  %v518_v48 = vpop.f32.mrb[11].mxu1  ;;  %v579_v51 = vmul.f32 %v1190_v29, %v1320_v22 }
  0xfb   : > { %v695_v49 = vsel %vm631_vm15, %v599_v31, %v663_v42  ;;  %v711_v50 = vsel %vm647_vm0, %v615_v32, %v679_v43  ;;  %v561_v52 = vmul.f32 %v1320_v22, %v451_v30  ;;  %v577_v61 = vmul.f32 %v1320_v22, %v515_v35 }
  0xfc   : > { %v1065_v53 = vpack.c.bf16 %v695_v49, %v694_v26  ;;  %v1105_v54 = vpack.c.bf16 %v711_v50, %v710_v37  ;;  %vm629_vm1 = vcmp.gt.f32.partialorder %v597_v45, 0.0  ;;  %v661_v55 = vmul.f32 0.01, %v597_v45 }
  0xfd   : > { %vm645_vm2 = vcmp.gt.f32.partialorder %v613_v46, 0.0  ;;  %v677_v56 = vmul.f32 0.01, %v613_v46  ;;  %vm634_vm3 = vcmp.gt.f32.partialorder %v602_v47, 0.0  ;;  %v666_v57 = vmul.f32 0.01, %v602_v47 }
  0xfe   : > { %1129 = vst [vmem:[%s1348_s6 + $0x18] sm:$0xff] %v1065_v53   ;;  %1137 = vst [vmem:[%s1348_s6 + $0x58] sm:$0xff] %v1105_v54   ;;  %v693_v58 = vsel %vm629_vm1, %v597_v45, %v661_v55  ;;  %v618_v59 = vadd.f32 %v1325_v24, %v579_v51  ;;  %v600_v60 = vadd.f32 %v1325_v24, %v561_v52  ;;  %v1178_v62 = vpop.f32.mrb[12].mxu0  ;;  %v1194_v63 = vpop.f32.mrb[12].mxu1 }
  0xff   : > { %v708_v0 = vsel %vm644_vm14, %v612_v28, %v676_v44  ;;  %v1060_v1 = vpack.c.bf16 %v693_v58, %v692_v38  ;;  %v709_v2 = vsel %vm645_vm2, %v613_v46, %v677_v56  ;;  %v564_v3 = vmul.f32 %v1175_v36, %v1320_v22  ;;  %v467_v4 = vpop.f32.mrb[13].mxu0  ;;  %v531_v5 = vpop.f32.mrb[13].mxu1 }
 0x100   : > { %v1100_v6 = vpack.c.bf16 %v709_v2, %v708_v0  ;;  %vm650_vm4 = vcmp.gt.f32.partialorder %v618_v59, 0.0  ;;  %v682_v7 = vmul.f32 0.01, %v618_v59  ;;  %v1179_v8 = vpop.f32.mrb[14].mxu0  ;;  %v1195_v9 = vpop.f32.mrb[14].mxu1  ;;  %v698_v10 = vsel %vm634_vm3, %v602_v47, %v666_v57 }
 0x101   : > { %1128 = vst [vmem:[%s1348_s6 + $0x10] sm:$0xff] %v1060_v1   ;;  %v616_v11 = vadd.f32 %v1325_v24, %v577_v61  ;;  %v603_v12 = vadd.f32 %v1325_v24, %v564_v3  ;;  %v580_v13 = vmul.f32 %v1191_v40, %v1320_v22  ;;  %v470_v14 = vpop.f32.mrb[15].mxu0  ;;  %v534_v15 = vpop.f32.mrb[15].mxu1  ;;  %vm632_vm5 = vcmp.gt.f32.partialorder %v600_v60, 0.0 }
 0x102   : > { %1136 = vst [vmem:[%s1348_s6 + $0x50] sm:$0xff] %v1100_v6   ;;  %v562_v16 = vmul.f32 %v1320_v22, %v454_v41  ;;  %v578_v17 = vmul.f32 %v1320_v22, %v518_v48  ;;  %v567_v18 = vmul.f32 %v1178_v62, %v1320_v22  ;;  %v714_v19 = vsel %vm650_vm4, %v618_v59, %v682_v7 }
 0x103   : > { %v664_v20 = vmul.f32 0.01, %v600_v60  ;;  %v680_v21 = vmul.f32 0.01, %v616_v11  ;;  %vm635_vm6 = vcmp.gt.f32.partialorder %v603_v12, 0.0  ;;  %v619_v25 = vadd.f32 %v1325_v24, %v580_v13 }
 0x104   : > { %v667_v23 = vmul.f32 0.01, %v603_v12  ;;  %v601_v26 = vadd.f32 %v1325_v24, %v562_v16  ;;  %v617_v27 = vadd.f32 %v1325_v24, %v578_v17  ;;  %vm648_vm7 = vcmp.gt.f32.partialorder %v616_v11, 0.0 }
 0x105   : > { %v606_v28 = vadd.f32 %v1325_v24, %v567_v18  ;;  %v583_v29 = vmul.f32 %v1194_v63, %v1320_v22  ;;  %v565_v30 = vmul.f32 %v1320_v22, %v467_v4  ;;  %vm651_vm8 = vcmp.gt.f32.partialorder %v619_v25, 0.0 }
 0x106   : > { %v699_v31 = vsel %vm635_vm6, %v603_v12, %v667_v23  ;;  %v683_v32 = vmul.f32 0.01, %v619_v25  ;;  %vm633_vm9 = vcmp.gt.f32.partialorder %v601_v26, 0.0  ;;  %v665_v34 = vmul.f32 0.01, %v601_v26 }
 0x107   : > { %v1075_v33 = vpack.c.bf16 %v699_v31, %v698_v10  ;;  %vm649_vm10 = vcmp.gt.f32.partialorder %v617_v27, 0.0  ;;  %v681_v35 = vmul.f32 0.01, %v617_v27  ;;  %v696_v36 = vsel %vm632_vm5, %v600_v60, %v664_v20 }
 0x108   : > { %v712_v37 = vsel %vm648_vm7, %v616_v11, %v680_v21  ;;  %v715_v38 = vsel %vm651_vm8, %v619_v25, %v683_v32  ;;  %v670_v39 = vmul.f32 0.01, %v606_v28  ;;  %v697_v41 = vsel %vm633_vm9, %v601_v26, %v665_v34 }
 0x109   : > { %1131 = vst [vmem:[%s1348_s6 + $0x28] sm:$0xff] %v1075_v33   ;;  %v1115_v40 = vpack.c.bf16 %v715_v38, %v714_v19  ;;  %v713_v42 = vsel %vm649_vm10, %v617_v27, %v681_v35  ;;  %v622_v43 = vadd.f32 %v1325_v24, %v583_v29  ;;  %v1070_v44 = vpack.c.bf16 %v697_v41, %v696_v36 }
 0x10a   : > { %v1110_v45 = vpack.c.bf16 %v713_v42, %v712_v37  ;;  %vm638_vm11 = vcmp.gt.f32.partialorder %v606_v28, 0.0  ;;  %v604_v46 = vadd.f32 %v1325_v24, %v565_v30  ;;  %v581_v47 = vmul.f32 %v1320_v22, %v531_v5 }
 0x10b   : > { %1139 = vst [vmem:[%s1348_s6 + $0x68] sm:$0xff] %v1115_v40   ;;  %1130 = vst [vmem:[%s1348_s6 + $0x20] sm:$0xff] %v1070_v44   ;;  %v568_v48 = vmul.f32 %v1179_v8, %v1320_v22  ;;  %v584_v49 = vmul.f32 %v1195_v9, %v1320_v22  ;;  %v566_v50 = vmul.f32 %v1320_v22, %v470_v14  ;;  %v686_v53 = vmul.f32 0.01, %v622_v43 }
 0x10c   : > { %1138 = vst [vmem:[%s1348_s6 + $0x60] sm:$0xff] %v1110_v45   ;;  %v582_v51 = vmul.f32 %v1320_v22, %v534_v15  ;;  %v702_v52 = vsel %vm638_vm11, %v606_v28, %v670_v39  ;;  %v620_v54 = vadd.f32 %v1325_v24, %v581_v47  ;;  %vm654_vm12 = vcmp.gt.f32.partialorder %v622_v43, 0.0 }
 0x10d   : > { %v607_v55 = vadd.f32 %v1325_v24, %v568_v48  ;;  %v623_v56 = vadd.f32 %v1325_v24, %v584_v49  ;;  %v605_v57 = vadd.f32 %v1325_v24, %v566_v50  ;;  %vm636_vm13 = vcmp.gt.f32.partialorder %v604_v46, 0.0 }
 0x10e   : > { %v621_v58 = vadd.f32 %v1325_v24, %v582_v51  ;;  %v668_v59 = vmul.f32 0.01, %v604_v46  ;;  %v684_v60 = vmul.f32 0.01, %v620_v54  ;;  %vm652_vm0 = vcmp.gt.f32.partialorder %v620_v54, 0.0 }
 0x10f   : > { %vm639_vm14 = vcmp.gt.f32.partialorder %v607_v55, 0.0  ;;  %v671_v61 = vmul.f32 0.01, %v607_v55  ;;  %vm655_vm15 = vcmp.gt.f32.partialorder %v623_v56, 0.0  ;;  %v687_v22 = vmul.f32 0.01, %v623_v56 }
 0x110   : > { %vm637_vm1 = vcmp.gt.f32.partialorder %v605_v57, 0.0  ;;  %v669_v62 = vmul.f32 0.01, %v605_v57  ;;  %vm653_vm2 = vcmp.gt.f32.partialorder %v621_v58, 0.0  ;;  %v718_v63 = vsel %vm654_vm12, %v622_v43, %v686_v53 }
 0x111   : > { %v703_v0 = vsel %vm639_vm14, %v607_v55, %v671_v61  ;;  %v719_v1 = vsel %vm655_vm15, %v623_v56, %v687_v22  ;;  %v685_v24 = vmul.f32 0.01, %v621_v58  ;;  %v700_v2 = vsel %vm636_vm13, %v604_v46, %v668_v59 }
 0x112   : > { %v1085_v3 = vpack.c.bf16 %v703_v0, %v702_v52  ;;  %v1125_v4 = vpack.c.bf16 %v719_v1, %v718_v63  ;;  %v701_v5 = vsel %vm637_vm1, %v605_v57, %v669_v62  ;;  %v716_v6 = vsel %vm652_vm0, %v620_v54, %v684_v60 }
 0x113   : > { %v1080_v7 = vpack.c.bf16 %v701_v5, %v700_v2  ;;  %v717_v8 = vsel %vm653_vm2, %v621_v58, %v685_v24 }
 0x114   : > { %1133 = vst [vmem:[%s1348_s6 + $0x38] sm:$0xff] %v1085_v3   ;;  %1141 = vst [vmem:[%s1348_s6 + $0x78] sm:$0xff] %v1125_v4   ;;  %v1120_v9 = vpack.c.bf16 %v717_v8, %v716_v6 }
 0x115   : > { %1132 = vst [vmem:[%s1348_s6 + $0x30] sm:$0xff] %v1080_v7  }
 0x116   : > { %1140 = vst [vmem:[%s1348_s6 + $0x70] sm:$0xff] %v1120_v9  }
 0x117 PF: > { %s14_s15 = sadd.s32 1, %s1233_s15  }
 0x118   : > { %p11_p4 = scmp.ge.s32.totalorder %s14_s15, 6  }
 0x11a   :  { %13 = sbr.rel (!%p11_p4) target bundleno = 1 (0x1), region = 66 }

// kernel: vae_forward.10
= control target key start
LH: loop header
LB: loop body
LE: loop exit
PB: predicated region body
PF: predicated region fallthrough
CT: control target
= control target key end

     0   :  { %s685_s15 = smov 0   ;;  %s742_s0 = inlined_call_operand.vmem [shape: bf16[128,108], index: 0, kind: input, shape index: {}]   ;;  %s743_s1 = inlined_call_operand.vmem [shape: bf16[108,128], index: 1, kind: input, shape index: {}]   ;;  %s744_s2 = inlined_call_operand.vmem [shape: f32[1,128], index: 2, kind: input, shape index: {}]   ;;  %s745_s3 = inlined_call_operand.vmem [shape: f32[1,128], index: 3, kind: input, shape index: {}]   ;;  %s746_s4 = inlined_call_operand.vmem [shape: bf16[128,128], index: 4, kind: output, shape index: {}]  }
   0x1 LB: > { %s517_s16 = sadd.s32 4294967295, %s658_s15   ;;  %p521_p0 = scmp.ge.s32.totalorder %s658_s15, 1  ;;  %s658_s15 = sphi %s685_s15, %s14_s15  }
   0x2   : > { %p163_p1 = scmp.lt.s32.totalorder %s658_s15, 3 }
   0x4   : > { %p164_p2 = pnand %p521_p0, %p163_p1 }
   0x5   : > { %v641_v0 = vld [vmem:[%s743_s1] sm:$0xff] (!%p164_p2)   ;;  %v642_v1 = vld [vmem:[%s743_s1 + $0x8] sm:$0xff] (!%p164_p2)   ;;  %s522_s21 = sshll.u32 (!%p164_p2), %s517_s16, 3  ;;  %v643_v2 = vld [vmem:[%s743_s1 + $0x10] sm:$0xff] (!%p164_p2)   ;;  %vm285_vm0 = vcmask (!%p164_p2), 883712   ;;  %vm298_vm1 = vcmask (!%p164_p2), 1045504  }
   0x6   : > { %167 = sbr.rel (%p164_p2) target bundleno = 261 (0x105), region = 36  ;;  %595 = vmatprep.subr.bf16.mxu0 (!%p164_p2), %v641_v0  ;;  %617 = vmatprep.subr.bf16.mxu1 (!%p164_p2), %v641_v0  ;;  %p190_p3 = scmp.lt.s32.totalorder (!%p164_p2), %s522_s21, 15  ;;  %v644_v3 = vld [vmem:[%s743_s1 + $0x18] sm:$0xff] (!%p164_p2)   ;;  %v645_v6 = vld [vmem:[%s743_s1 + $0x20] sm:$0xff] (!%p164_p2)   ;;  %v646_v7 = vld [vmem:[%s743_s1 + $0x28] sm:$0xff] (!%p164_p2)  }
   0x7   : > { %596 = vmatpush3.bf16.msra.mxu0 (!%p164_p2), %v641_v0  ;;  %624 = vmatpush3.bf16.msra.mxu1 (!%p164_p2), %v641_v0  ;;  %v647_v8 = vld [vmem:[%s743_s1 + $0x30] sm:$0x3f] (!%p164_p2)   ;;  %v541_v12 = vld [vmem:[%s744_s2] ss:$0 sm:$0xff] (!%p164_p2) }
   0x8   : > { %597 = vmatprep.subr.bf16.mxu0 (!%p164_p2), %v642_v1  ;;  %618 = vmatprep.subr.bf16.mxu1 (!%p164_p2), %v642_v1  ;;  %v300_v9 = vsel (!%p164_p2), %vm298_vm1, %v647_v8, 0  ;;  %v542_v14 = vld [vmem:[%s745_s3] ss:$0 sm:$0xff] (!%p164_p2) }
   0xb   : > { %598 = vmatpush3.bf16.msra.mxu0 (!%p164_p2), %v642_v1  ;;  %625 = vmatpush3.bf16.msra.mxu1 (!%p164_p2), %v642_v1 }
   0xc   : > { %599 = vmatprep.subr.bf16.mxu0 (!%p164_p2), %v643_v2  ;;  %619 = vmatprep.subr.bf16.mxu1 (!%p164_p2), %v643_v2 }
   0xd   : > { %s748_s21 = smov (!%p190_p3, %s522_s21), 15 }
   0xe   : > { %s523_s24 = sshll.u32 %s748_s21, 2 }
   0xf   : > { %s193_s29 = scalar_lea.vmem %s742_s0, %s523_s24  ;;  %600 = vmatpush3.bf16.msra.mxu0 %v643_v2  ;;  %626 = vmatpush3.bf16.msra.mxu1 %v643_v2  ;;  %s199_s17 = scalar_lea.vmem %s746_s4, %s523_s24 }
  0x10   : > { %v648_v4 = vld [vmem:[%s193_s29] sm:$0xff]   ;;  %v649_v5 = vld [vmem:[%s193_s29 + $0x10] sm:$0xff]   ;;  %601 = vmatprep.subr.bf16.mxu0 %v644_v3  ;;  %620 = vmatprep.subr.bf16.mxu1 %v644_v3  ;;  %v650_v10 = vld [vmem:[%s193_s29 + $0x8] sm:$0xff]  }
  0x11   : > { %609 = vmatprep.mubr.msk.bf16.mxu0 %vm285_vm0, %v648_v4  ;;  %613 = vmatprep.mubr.msk.bf16.mxu1 %vm285_vm0, %v649_v5  ;;  %v651_v11 = vld [vmem:[%s193_s29 + $0x18] sm:$0xff]  }
  0x13   : > { %602 = vmatpush3.bf16.msra.mxu0 %v644_v3  ;;  %627 = vmatpush3.bf16.msra.mxu1 %v644_v3 }
  0x14   : > { %603 = vmatprep.subr.bf16.mxu0 %v645_v6  ;;  %621 = vmatprep.subr.bf16.mxu1 %v645_v6 }
  0x17   : > { %604 = vmatpush3.bf16.msra.mxu0 %v645_v6  ;;  %628 = vmatpush3.bf16.msra.mxu1 %v645_v6 }
  0x18   : > { %605 = vmatprep.subr.bf16.mxu0 %v646_v7  ;;  %622 = vmatprep.subr.bf16.mxu1 %v646_v7 }
  0x1b   : > { %606 = vmatpush3.bf16.msra.mxu0 %v646_v7  ;;  %629 = vmatpush3.bf16.msra.mxu1 %v646_v7 }
  0x1c   : > { %631 = vmatprep.subr.msk.bf16.mxu0 %vm298_vm1, %v647_v8  ;;  %632 = vmatprep.subr.msk.bf16.mxu1 %vm298_vm1, %v647_v8 }
  0x1f   : > { %608 = vmatpush3.bf16.msra.mxu0 %v300_v9  ;;  %630 = vmatpush3.bf16.msra.mxu1 %v300_v9 }
  0x22   : > { %610 = vmatmul.mubr.msk.bf16.vlgmr.msra.gmra.mrb[0].mxu0 %vm285_vm0, %v650_v10  ;;  %614 = vmatmul.mubr.msk.bf16.vlgmr.msra.gmra.mrb[0].mxu1 %vm285_vm0, %v651_v11 }
  0xf5   : > { %v611_v13 = vpop.f32.mrb[0].mxu0  ;;  %v615_v15 = vpop.f32.mrb[0].mxu1 }
  0xf6   : > { %v376_v16 = vmul.f32 %v611_v13, %v541_v12  ;;  %v380_v17 = vmul.f32 %v615_v15, %v541_v12  ;;  %v336_v18 = vpop.f32.mrb[1].mxu0  ;;  %v352_v19 = vpop.f32.mrb[1].mxu1 }
  0xf7   : > { %v374_v20 = vmul.f32 %v541_v12, %v336_v18  ;;  %v378_v21 = vmul.f32 %v541_v12, %v352_v19  ;;  %v612_v22 = vpop.f32.mrb[2].mxu0  ;;  %v616_v23 = vpop.f32.mrb[2].mxu1 }
  0xf8   : > { %v391_v24 = vadd.f32 %v542_v14, %v376_v16  ;;  %v395_v25 = vadd.f32 %v542_v14, %v380_v17  ;;  %v377_v26 = vmul.f32 %v612_v22, %v541_v12  ;;  %v381_v27 = vmul.f32 %v616_v23, %v541_v12  ;;  %v339_v28 = vpop.f32.mrb[3].mxu0  ;;  %v355_v29 = vpop.f32.mrb[3].mxu1 }
  0xf9   : > { %v389_v30 = vadd.f32 %v542_v14, %v374_v20  ;;  %v393_v31 = vadd.f32 %v542_v14, %v378_v21  ;;  %v375_v32 = vmul.f32 %v541_v12, %v339_v28  ;;  %v379_v33 = vmul.f32 %v541_v12, %v355_v29 }
  0xfa   : > { %vm399_vm2 = vcmp.gt.f32.partialorder %v391_v24, 0.0  ;;  %v407_v34 = vmul.f32 0.01, %v391_v24  ;;  %vm403_vm3 = vcmp.gt.f32.partialorder %v395_v25, 0.0  ;;  %v411_v35 = vmul.f32 0.01, %v395_v25 }
  0xfb   : > { %vm397_vm4 = vcmp.gt.f32.partialorder %v389_v30, 0.0  ;;  %v405_v36 = vmul.f32 0.01, %v389_v30  ;;  %vm401_vm5 = vcmp.gt.f32.partialorder %v393_v31, 0.0  ;;  %v409_v37 = vmul.f32 0.01, %v393_v31 }
  0xfc   : > { %v392_v38 = vadd.f32 %v542_v14, %v377_v26  ;;  %v396_v39 = vadd.f32 %v542_v14, %v381_v27  ;;  %v415_v40 = vsel %vm399_vm2, %v391_v24, %v407_v34  ;;  %v419_v41 = vsel %vm403_vm3, %v395_v25, %v411_v35 }
  0xfd   : > { %v390_v42 = vadd.f32 %v542_v14, %v375_v32  ;;  %v394_v43 = vadd.f32 %v542_v14, %v379_v33  ;;  %v413_v48 = vsel %vm397_vm4, %v389_v30, %v405_v36  ;;  %v417_v49 = vsel %vm401_vm5, %v393_v31, %v409_v37 }
  0xfe   : > { %vm400_vm6 = vcmp.gt.f32.partialorder %v392_v38, 0.0  ;;  %v408_v44 = vmul.f32 0.01, %v392_v38  ;;  %vm404_vm7 = vcmp.gt.f32.partialorder %v396_v39, 0.0  ;;  %v412_v45 = vmul.f32 0.01, %v396_v39 }
  0xff   : > { %vm398_vm8 = vcmp.gt.f32.partialorder %v390_v42, 0.0  ;;  %v406_v46 = vmul.f32 0.01, %v390_v42  ;;  %vm402_vm9 = vcmp.gt.f32.partialorder %v394_v43, 0.0  ;;  %v410_v47 = vmul.f32 0.01, %v394_v43 }
 0x100   : > { %v416_v50 = vsel %vm400_vm6, %v392_v38, %v408_v44  ;;  %v420_v51 = vsel %vm404_vm7, %v396_v39, %v412_v45 }
 0x101   : > { %v569_v52 = vpack.c.bf16 %v416_v50, %v415_v40  ;;  %v579_v53 = vpack.c.bf16 %v420_v51, %v419_v41  ;;  %v414_v54 = vsel %vm398_vm8, %v390_v42, %v406_v46  ;;  %v418_v55 = vsel %vm402_vm9, %v394_v43, %v410_v47 }
 0x102   : > { %v564_v56 = vpack.c.bf16 %v414_v54, %v413_v48  ;;  %v574_v57 = vpack.c.bf16 %v418_v55, %v417_v49 }
 0x103   : > { %581 = vst [vmem:[%s199_s17 + $0x8] sm:$0xff] %v569_v52   ;;  %583 = vst [vmem:[%s199_s17 + $0x18] sm:$0xff] %v579_v53  }
 0x104   : > { %565 = vst [vmem:[%s199_s17] sm:$0xff] %v564_v56   ;;  %582 = vst [vmem:[%s199_s17 + $0x10] sm:$0xff] %v574_v57  }
 0x105 PF: > { %s14_s15 = sadd.s32 1, %s658_s15  }
 0x106   : > { %p11_p4 = scmp.ge.s32.totalorder %s14_s15, 4  }
 0x108   :  { %13 = sbr.rel (!%p11_p4) target bundleno = 1 (0x1), region = 66 }

// kernel: vae_forward.11
= control target key start
LH: loop header
LB: loop body
LE: loop exit
PB: predicated region body
PF: predicated region fallthrough
CT: control target
= control target key end

     0   :  { %v270_v0 = vmov 0   ;;  %vm137_vm0 = vcmask 719872   ;;  %vm141_vm1 = vcmask 1043456   ;;  %s353_s1 = inlined_call_operand.vmem [shape: bf16[216,128], index: 1, kind: input, shape index: {}]   ;;  %s354_s0 = inlined_call_operand.vmem [shape: bf16[16,216], index: 0, kind: input, shape index: {}]   ;;  %s355_s2 = inlined_call_operand.vmem [shape: f32[1,128], index: 2, kind: input, shape index: {}]   ;;  %s356_s3 = inlined_call_operand.vmem [shape: f32[1,128], index: 3, kind: input, shape index: {}]   ;;  %s357_s4 = inlined_call_operand.vmem [shape: bf16[16,128], index: 4, kind: output, shape index: {}]  }
   0x1   :  { %145 = vmatprep.subr.bf16.mxu0 %v270_v0  ;;  %v253_v1 = vld [vmem:[%s353_s1] sm:$0xff]   ;;  %v254_v2 = vld [vmem:[%s353_s1 + $0x8] sm:$0xff]   ;;  %v255_v3 = vld [vmem:[%s353_s1 + $0x10] sm:$0xff]  }
   0x2   :  { %146 = vmatpush1.bf16.msra.mxu0 %v253_v1  ;;  %v256_v4 = vld [vmem:[%s353_s1 + $0x18] sm:$0xff]   ;;  %v257_v5 = vld [vmem:[%s353_s1 + $0x20] sm:$0xff]   ;;  %v258_v7 = vld [vmem:[%s353_s1 + $0x28] sm:$0xff]  }
   0x3   :  { %147 = vmatprep.subr.bf16.mxu0 %v270_v0  ;;  %v269_v6 = vld [vmem:[%s354_s0 + $0x4] ss:$8 sps:$4 sm:$0xff]   ;;  %v259_v8 = vld [vmem:[%s353_s1 + $0x30] sm:$0xff]   ;;  %v260_v9 = vld [vmem:[%s353_s1 + $0x38] sm:$0xff]  }
   0x4   :  { %240 = vmatprep.mubr.msk.bf16.mxu0 %vm137_vm0, %v269_v6  ;;  %v261_v10 = vld [vmem:[%s353_s1 + $0x40] sm:$0xff]   ;;  %v262_v11 = vld [vmem:[%s353_s1 + $0x48] sm:$0xff]   ;;  %v263_v12 = vld [vmem:[%s353_s1 + $0x50] sm:$0xff]  }
   0x5   :  { %v264_v13 = vld [vmem:[%s353_s1 + $0x58] sm:$0xff]   ;;  %v265_v14 = vld [vmem:[%s353_s1 + $0x60] sm:$0xff]   ;;  %v266_v15 = vld [vmem:[%s353_s1 + $0x68] ss:$0 sps:$4 sm:$0xff]  }
   0x6   :  { %148 = vmatpush1.bf16.msra.mxu0 %v254_v2  ;;  %v143_v16 = vsel %vm141_vm1, %v266_v15, 0  ;;  %v267_v17 = vld [vmem:[%s354_s0] ss:$8 sps:$4 sm:$0xff]  }
   0x7   :  { %149 = vmatprep.subr.bf16.mxu0 %v270_v0  ;;  %v241_v18 = vld [vmem:[%s355_s2] ss:$0 sm:$0xff] }
   0x8   :  { %v242_v20 = vld [vmem:[%s356_s3] ss:$0 sm:$0xff] }
   0xa   :  { %150 = vmatpush1.bf16.msra.mxu0 %v255_v3 }
   0xb   :  { %151 = vmatprep.subr.bf16.mxu0 %v270_v0 }
   0xe   :  { %152 = vmatpush1.bf16.msra.mxu0 %v256_v4 }
   0xf   :  { %153 = vmatprep.subr.bf16.mxu0 %v270_v0 }
  0x12   :  { %154 = vmatpush1.bf16.msra.mxu0 %v257_v5 }
  0x13   :  { %155 = vmatprep.subr.bf16.mxu0 %v270_v0 }
  0x16   :  { %156 = vmatpush1.bf16.msra.mxu0 %v258_v7 }
  0x17   :  { %157 = vmatprep.subr.bf16.mxu0 %v270_v0 }
  0x1a   :  { %158 = vmatpush1.bf16.msra.mxu0 %v259_v8 }
  0x1b   :  { %159 = vmatprep.subr.bf16.mxu0 %v270_v0 }
  0x1e   :  { %160 = vmatpush1.bf16.msra.mxu0 %v260_v9 }
  0x1f   :  { %161 = vmatprep.subr.bf16.mxu0 %v270_v0 }
  0x22   :  { %162 = vmatpush1.bf16.msra.mxu0 %v261_v10 }
  0x23   :  { %163 = vmatprep.subr.bf16.mxu0 %v270_v0 }
  0x26   :  { %164 = vmatpush1.bf16.msra.mxu0 %v262_v11 }
  0x27   :  { %165 = vmatprep.subr.bf16.mxu0 %v270_v0 }
  0x2a   :  { %166 = vmatpush1.bf16.msra.mxu0 %v263_v12 }
  0x2b   :  { %167 = vmatprep.subr.bf16.mxu0 %v270_v0 }
  0x2e   :  { %168 = vmatpush1.bf16.msra.mxu0 %v264_v13 }
  0x2f   :  { %169 = vmatprep.subr.bf16.mxu0 %v270_v0 }
  0x32   :  { %170 = vmatpush1.bf16.msra.mxu0 %v265_v14 }
  0x33   :  { %171 = vmatprep.subr.bf16.mxu0 %v270_v0 }
  0x36   :  { %172 = vmatpush1.bf16.msra.mxu0 %v143_v16 }
  0x39   :  { %178 = vmatmul.mubr.bf16.vlgmr.msra.gmra.mrb[0].mxu0 %v267_v17 }
 0x10c   :  { %v179_v19 = vpop.f32.mrb[0].mxu0 }
 0x10d   :  { %v193_v21 = vmul.f32 %v241_v18, %v179_v19  ;;  %v181_v22 = vpop.f32.mrb[1].mxu0 }
 0x10e   :  { %v182_v23 = vpop.f32.mrb[2].mxu0 }
 0x10f   :  { %v202_v24 = vadd.f32 %v242_v20, %v193_v21  ;;  %v194_v25 = vmul.f32 %v241_v18, %v182_v23  ;;  %v184_v26 = vpop.f32.mrb[3].mxu0 }
 0x111   :  { %v206_v27 = vmul.f32 0.01, %v202_v24  ;;  %v203_v28 = vadd.f32 %v242_v20, %v194_v25  ;;  %vm204_vm2 = vcmp.gt.f32.partialorder %v202_v24, 0.0 }
 0x113   :  { %vm205_vm3 = vcmp.gt.f32.partialorder %v203_v28, 0.0  ;;  %v207_v29 = vmul.f32 0.01, %v203_v28  ;;  %v208_v30 = vsel %vm204_vm2, %v202_v24, %v206_v27 }
 0x115   :  { %v209_v31 = vsel %vm205_vm3, %v203_v28, %v207_v29 }
 0x116   :  { %v250_v32 = vpack.c.bf16 %v209_v31, %v208_v30 }
 0x118   :  { %251 = vst [vmem:[%s357_s4] sm:$0xff] %v250_v32  }

// kernel: vae_forward.13
= control target key start
LH: loop header
LB: loop body
LE: loop exit
PB: predicated region body
PF: predicated region fallthrough
CT: control target
= control target key end

     0   :  { %v149_v0 = vmov 0.0   ;;  %vm150_vm0 = vmmov 0   ;;  %vm41_vm1 = vcmask 261120   ;;  %s194_s1 = inlined_call_operand.vmem [shape: bf16[32,128], index: 1, kind: input, shape index: {}]   ;;  %s195_s0 = inlined_call_operand.vmem [shape: bf16[16,32], index: 0, kind: input, shape index: {}]   ;;  %s196_s2 = inlined_call_operand.vmem [shape: f32[1,128], index: 2, kind: input, shape index: {}]   ;;  %s197_s3 = inlined_call_operand.vmem [shape: f32[1,128], index: 3, kind: input, shape index: {}]   ;;  %s198_s4 = inlined_call_operand.vmem [shape: bf16[16,128], index: 4, kind: output, shape index: {}]  }
   0x1   :  { %136 = vmatprep.subr.bf16.mxu0 %v149_v0  ;;  %v146_v1 = vld [vmem:[%s194_s1] sm:$0xff]   ;;  %140 = vmatprep.mubr.msk.bf16.mxu0 %vm150_vm0, %v149_v0  ;;  %v147_v2 = vld [vmem:[%s194_s1 + $0x8] sm:$0xff]  }
   0x2   :  { %137 = vmatpush3.bf16.msra.mxu0 %v146_v1  ;;  %v148_v3 = vld [vmem:[%s195_s0] sm:$0xff]  }
   0x3   :  { %138 = vmatprep.subr.bf16.mxu0 %v149_v0  ;;  %v122_v4 = vld [vmem:[%s196_s2] ss:$0 sm:$0xff] }
   0x4   :  { %v123_v8 = vld [vmem:[%s197_s3] ss:$0 sm:$0xff] }
   0x6   :  { %139 = vmatpush3.bf16.msra.mxu0 %v147_v2 }
   0x9   :  { %141 = vmatmul.mubr.msk.bf16.vlgmr.msra.gmra.mrb[0].mxu0 %vm41_vm1, %v148_v3 }
  0xdc   :  { %v79_v5 = vpop.f32.mrb[0].mxu0 }
  0xdd   :  { %v93_v6 = vmul.f32 %v122_v4, %v79_v5  ;;  %v142_v7 = vpop.f32.mrb[1].mxu0 }
  0xde   :  { %v82_v9 = vpop.f32.mrb[2].mxu0 }
  0xdf   :  { %v94_v10 = vmul.f32 %v122_v4, %v82_v9  ;;  %v143_v11 = vpop.f32.mrb[3].mxu0  ;;  %v102_v12 = vadd.f32 %v123_v8, %v93_v6 }
  0xe1   :  { %v103_v13 = vadd.f32 %v123_v8, %v94_v10 }
  0xe3   :  { %v131_v14 = vpack.c.bf16 %v103_v13, %v102_v12 }
  0xe5   :  { %132 = vst [vmem:[%s198_s4] sm:$0xff] %v131_v14  }

// kernel: vae_forward.12
= control target key start
LH: loop header
LB: loop body
LE: loop exit
PB: predicated region body
PF: predicated region fallthrough
CT: control target
= control target key end

     0   :  { %v257_v1 = vmov 0   ;;  %v41_v18 = vlaneseq  ;;  %s371_s1 = inlined_call_operand.vmem [shape: bf16[128,256], index: 1, kind: input, shape index: {}]   ;;  %s372_s0 = inlined_call_operand.vmem [shape: bf16[16,128], index: 0, kind: input, shape index: {}]   ;;  %s373_s2 = inlined_call_operand.vmem [shape: f32[1,256], index: 2, kind: input, shape index: {}]   ;;  %s374_s4 = inlined_call_operand.vmem [shape: f32[16,128], index: 4, kind: output, shape index: {0}]   ;;  %s375_s3 = inlined_call_operand.vmem [shape: f32[16,128], index: 3, kind: input, shape index: {}]   ;;  %s376_s5 = inlined_call_operand.vmem [shape: f32[16,128], index: 5, kind: output, shape index: {1}]   ;;  %s377_s6 = inlined_call_operand.vmem [shape: f32[16,128], index: 6, kind: output, shape index: {2}]  }
   0x1   :  { %v228_v0 = vld [vmem:[%s371_s1 + $0x4] ss:$8 sps:$4 sm:$0xff]   ;;  %169 = vmatprep.mubr.bf16.mxu0 %v257_v1  ;;  %v230_v2 = vld [vmem:[%s371_s1] ss:$8 sps:$4 sm:$0xff]   ;;  %v231_v3 = vld [vmem:[%s371_s1 + $0x14] ss:$8 sps:$4 sm:$0xff]  }
   0x2   :  { %137 = vmatprep.subr.bf16.mxu0 %v228_v0  ;;  %v233_v4 = vld [vmem:[%s371_s1 + $0x10] ss:$8 sps:$4 sm:$0xff]   ;;  %v234_v5 = vld [vmem:[%s371_s1 + $0x24] ss:$8 sps:$4 sm:$0xff]   ;;  %v236_v6 = vld [vmem:[%s371_s1 + $0x20] ss:$8 sps:$4 sm:$0xff]  }
   0x3   :  { %138 = vmatpush1.bf16.msra.mxu0 %v230_v2  ;;  %v237_v7 = vld [vmem:[%s371_s1 + $0x34] ss:$8 sps:$4 sm:$0xff]   ;;  %v239_v8 = vld [vmem:[%s371_s1 + $0x30] ss:$8 sps:$4 sm:$0xff]   ;;  %v240_v9 = vld [vmem:[%s371_s1 + $0x44] ss:$8 sps:$4 sm:$0xff]  }
   0x4   :  { %139 = vmatprep.subr.bf16.mxu0 %v231_v3  ;;  %v242_v10 = vld [vmem:[%s371_s1 + $0x40] ss:$8 sps:$4 sm:$0xff]   ;;  %v243_v11 = vld [vmem:[%s371_s1 + $0x54] ss:$8 sps:$4 sm:$0xff]   ;;  %v245_v12 = vld [vmem:[%s371_s1 + $0x50] ss:$8 sps:$4 sm:$0xff]  }
   0x5   :  { %v246_v13 = vld [vmem:[%s371_s1 + $0x64] ss:$8 sps:$4 sm:$0xff]   ;;  %v248_v14 = vld [vmem:[%s371_s1 + $0x60] ss:$8 sps:$4 sm:$0xff]   ;;  %v249_v15 = vld [vmem:[%s371_s1 + $0x74] ss:$8 sps:$4 sm:$0xff]  }
   0x6   :  { %v251_v16 = vld [vmem:[%s371_s1 + $0x70] ss:$8 sps:$4 sm:$0xff]   ;;  %v252_v17 = vld [vmem:[%s372_s0] sm:$0xff]   ;;  %v42_v19 = vshrl.u32 %v41_v18, 7  ;;  %v191_v39 = vld [vmem:[%s375_s3 + $0x8] sm:$0xff] }
   0x7   :  { %140 = vmatpush1.bf16.msra.mxu0 %v233_v4  ;;  %v39_v21 = vld [vmem:[%s373_s2] sm:$0x3] }
   0x8   :  { %141 = vmatprep.subr.bf16.mxu0 %v234_v5  ;;  %v43_v20 = vsub.s32 0, %v42_v19  ;;  %v47_v22 = vsub.s32 1, %v42_v19  ;;  %v190_v37 = vld [vmem:[%s375_s3] sm:$0xff] }
   0xa   :  { %v44_v23 = vrot.slane %v39_v21, %v43_v20  ;;  %v48_v24 = vrot.slane %v39_v21, %v47_v22 }
   0xb   :  { %142 = vmatpush1.bf16.msra.mxu0 %v236_v6 }
   0xc   :  { %143 = vmatprep.subr.bf16.mxu0 %v237_v7 }
   0xf   :  { %144 = vmatpush1.bf16.msra.mxu0 %v239_v8 }
  0x10   :  { %145 = vmatprep.subr.bf16.mxu0 %v240_v9 }
  0x13   :  { %146 = vmatpush1.bf16.msra.mxu0 %v242_v10 }
  0x14   :  { %147 = vmatprep.subr.bf16.mxu0 %v243_v11 }
  0x17   :  { %148 = vmatpush1.bf16.msra.mxu0 %v245_v12 }
  0x18   :  { %149 = vmatprep.subr.bf16.mxu0 %v246_v13 }
  0x1b   :  { %150 = vmatpush1.bf16.msra.mxu0 %v248_v14 }
  0x1c   :  { %151 = vmatprep.subr.bf16.mxu0 %v249_v15 }
  0x1f   :  { %152 = vmatpush1.bf16.msra.mxu0 %v251_v16 }
  0x22   :  { %170 = vmatmul.mubr.bf16.vlgmr.msra.gmra.mrb[0].mxu0 %v252_v17 }
  0xf5   :  { %v171_v25 = vpop.f32.mrb[0].mxu0 }
  0xf6   :  { %v172_v26 = vadd.f32 %v171_v25, %v44_v23  ;;  %v173_v27 = vpop.f32.mrb[1].mxu0 }
  0xf7   :  { %v174_v28 = vadd.f32 %v173_v27, %v48_v24  ;;  %v175_v29 = vpop.f32.mrb[2].mxu0 }
  0xf8   :  { %186 = vst [vmem:[%s374_s4] sm:$0xff] %v172_v26  ;;  %v176_v30 = vadd.f32 %v175_v29, %v44_v23  ;;  %v177_v31 = vpop.f32.mrb[3].mxu0 }
  0xf9   :  { %v180_v32 = vmul.f32 0.5, %v174_v28  ;;  %v178_v33 = vadd.f32 %v177_v31, %v48_v24 }
  0xfa   :  { %187 = vst [vmem:[%s374_s4 + $0x8] sm:$0xff] %v176_v30 }
  0xfb   :  { %v182_v34 = vmul.f32 1.442695, %v180_v32  ;;  %v181_v35 = vmul.f32 0.5, %v178_v33 }
  0xfd   :  { %253 = vpow2.f32 %v182_v34  ;;  %v184_v36 = vmul.f32 1.442695, %v181_v35 }
  0xff   :  { %255 = vpow2.f32 %v184_v36 }
 0x107   :  { %v254_v38 = vpop.eup %253 }
 0x108   :  { %188 = vst [vmem:[%s376_s5] sm:$0xff] %v254_v38  ;;  %v192_v40 = vmul.f32 %v254_v38, %v190_v37 }
 0x109   :  { %v256_v41 = vpop.eup %255 }
 0x10a   :  { %v194_v42 = vadd.f32 %v192_v40, %v172_v26  ;;  %189 = vst [vmem:[%s376_s5 + $0x8] sm:$0xff] %v256_v41  ;;  %v193_v43 = vmul.f32 %v256_v41, %v191_v39 }
 0x10c   :  { %196 = vst [vmem:[%s377_s6] sm:$0xff] %v194_v42  ;;  %v195_v44 = vadd.f32 %v193_v43, %v176_v30 }
 0x10e   :  { %197 = vst [vmem:[%s377_s6 + $0x8] sm:$0xff] %v195_v44 }

// kernel: vae_forward.14
= control target key start
LH: loop header
LB: loop body
LE: loop exit
PB: predicated region body
PF: predicated region fallthrough
CT: control target
= control target key end

     0   :  { %v229_v0 = vmov 0.0   ;;  %vm230_vm0 = vmmov 0   ;;  %s292_s1 = inlined_call_operand.vmem [shape: bf16[128,128], index: 1, kind: input, shape index: {}]   ;;  %s293_s0 = inlined_call_operand.vmem [shape: bf16[16,128], index: 0, kind: input, shape index: {}]   ;;  %s294_s2 = inlined_call_operand.vmem [shape: f32[1,128], index: 2, kind: input, shape index: {}]   ;;  %s295_s3 = inlined_call_operand.vmem [shape: f32[1,128], index: 3, kind: input, shape index: {}]   ;;  %s296_s4 = inlined_call_operand.vmem [shape: bf16[16,128], index: 4, kind: output, shape index: {}]  }
   0x1   :  { %198 = vmatprep.subr.bf16.mxu0 %v229_v0  ;;  %v220_v1 = vld [vmem:[%s292_s1] sm:$0xff]   ;;  %214 = vmatprep.mubr.msk.bf16.mxu0 %vm230_vm0, %v229_v0  ;;  %v221_v2 = vld [vmem:[%s292_s1 + $0x8] sm:$0xff]   ;;  %v222_v3 = vld [vmem:[%s292_s1 + $0x10] sm:$0xff]  }
   0x2   :  { %199 = vmatpush3.bf16.msra.mxu0 %v220_v1  ;;  %v223_v4 = vld [vmem:[%s292_s1 + $0x18] sm:$0xff]   ;;  %v224_v5 = vld [vmem:[%s292_s1 + $0x20] sm:$0xff]   ;;  %v225_v6 = vld [vmem:[%s292_s1 + $0x28] sm:$0xff]  }
   0x3   :  { %200 = vmatprep.subr.bf16.mxu0 %v229_v0  ;;  %v226_v7 = vld [vmem:[%s292_s1 + $0x30] sm:$0xff]   ;;  %v227_v8 = vld [vmem:[%s292_s1 + $0x38] sm:$0xff]   ;;  %v228_v9 = vld [vmem:[%s293_s0] sm:$0xff]  }
   0x4   :  { %v178_v10 = vld [vmem:[%s294_s2] ss:$0 sm:$0xff] }
   0x5   :  { %v179_v12 = vld [vmem:[%s295_s3] ss:$0 sm:$0xff] }
   0x6   :  { %201 = vmatpush3.bf16.msra.mxu0 %v221_v2 }
   0x7   :  { %202 = vmatprep.subr.bf16.mxu0 %v229_v0 }
   0xa   :  { %203 = vmatpush3.bf16.msra.mxu0 %v222_v3 }
   0xb   :  { %204 = vmatprep.subr.bf16.mxu0 %v229_v0 }
   0xe   :  { %205 = vmatpush3.bf16.msra.mxu0 %v223_v4 }
   0xf   :  { %206 = vmatprep.subr.bf16.mxu0 %v229_v0 }
  0x12   :  { %207 = vmatpush3.bf16.msra.mxu0 %v224_v5 }
  0x13   :  { %208 = vmatprep.subr.bf16.mxu0 %v229_v0 }
  0x16   :  { %209 = vmatpush3.bf16.msra.mxu0 %v225_v6 }
  0x17   :  { %210 = vmatprep.subr.bf16.mxu0 %v229_v0 }
  0x1a   :  { %211 = vmatpush3.bf16.msra.mxu0 %v226_v7 }
  0x1b   :  { %212 = vmatprep.subr.bf16.mxu0 %v229_v0 }
  0x1e   :  { %213 = vmatpush3.bf16.msra.mxu0 %v227_v8 }
  0x21   :  { %215 = vmatmul.mubr.bf16.vlgmr.msra.gmra.mrb[0].mxu0 %v228_v9 }
  0xf4   :  { %v124_v11 = vpop.f32.mrb[0].mxu0 }
  0xf5   :  { %v138_v13 = vmul.f32 %v178_v10, %v124_v11  ;;  %v216_v14 = vpop.f32.mrb[1].mxu0 }
  0xf6   :  { %v127_v15 = vpop.f32.mrb[2].mxu0 }
  0xf7   :  { %v147_v16 = vadd.f32 %v179_v12, %v138_v13  ;;  %v139_v17 = vmul.f32 %v178_v10, %v127_v15  ;;  %v217_v18 = vpop.f32.mrb[3].mxu0 }
  0xf9   :  { %v151_v19 = vmul.f32 0.01, %v147_v16  ;;  %v148_v20 = vadd.f32 %v179_v12, %v139_v17  ;;  %vm149_vm1 = vcmp.gt.f32.partialorder %v147_v16, 0.0 }
  0xfb   :  { %vm150_vm2 = vcmp.gt.f32.partialorder %v148_v20, 0.0  ;;  %v152_v21 = vmul.f32 0.01, %v148_v20  ;;  %v153_v22 = vsel %vm149_vm1, %v147_v16, %v151_v19 }
  0xfd   :  { %v154_v23 = vsel %vm150_vm2, %v148_v20, %v152_v21 }
  0xfe   :  { %v187_v24 = vpack.c.bf16 %v154_v23, %v153_v22 }
 0x100   :  { %188 = vst [vmem:[%s296_s4] sm:$0xff] %v187_v24  }

// kernel: vae_forward.15
= control target key start
LH: loop header
LB: loop body
LE: loop exit
PB: predicated region body
PF: predicated region fallthrough
CT: control target
= control target key end

     0   :  { %s635_s15 = smov 0   ;;  %s683_s0 = inlined_call_operand.vmem [shape: bf16[128,64], index: 0, kind: input, shape index: {}]   ;;  %s684_s1 = inlined_call_operand.vmem [shape: bf16[64,128], index: 1, kind: input, shape index: {}]   ;;  %s685_s2 = inlined_call_operand.vmem [shape: f32[1,128], index: 2, kind: input, shape index: {}]   ;;  %s686_s3 = inlined_call_operand.vmem [shape: f32[1,128], index: 3, kind: input, shape index: {}]   ;;  %s687_s4 = inlined_call_operand.vmem [shape: bf16[128,128], index: 4, kind: output, shape index: {}]  }
   0x1 LB: > { %s490_s16 = sadd.s32 4294967295, %s608_s15   ;;  %p494_p0 = scmp.ge.s32.totalorder %s608_s15, 1  ;;  %s608_s15 = sphi %s635_s15, %s14_s15  }
   0x2   : > { %p163_p1 = scmp.lt.s32.totalorder %s608_s15, 3 }
   0x4   : > { %p164_p2 = pnand %p494_p0, %p163_p1 }
   0x5   : > { %v594_v0 = vld [vmem:[%s684_s1] sm:$0xff] (!%p164_p2)   ;;  %s495_s19 = sshll.u32 (!%p164_p2), %s490_s16, 3  ;;  %v595_v1 = vld [vmem:[%s684_s1 + $0x8] sm:$0xff] (!%p164_p2)   ;;  %v596_v2 = vld [vmem:[%s684_s1 + $0x10] sm:$0xff] (!%p164_p2)   ;;  %vm262_vm0 = vcmask (!%p164_p2), 523264  }
   0x6   : > { %167 = sbr.rel (%p164_p2) target bundleno = 249 (0xf9), region = 36  ;;  %p190_p3 = scmp.lt.s32.totalorder (!%p164_p2), %s495_s19, 15  ;;  %562 = vmatprep.subr.bf16.mxu0 (!%p164_p2), %v594_v0  ;;  %578 = vmatprep.subr.bf16.mxu1 (!%p164_p2), %v594_v0  ;;  %v597_v3 = vld [vmem:[%s684_s1 + $0x18] sm:$0xff] (!%p164_p2)   ;;  %v511_v8 = vld [vmem:[%s685_s2] ss:$0 sm:$0xff] (!%p164_p2) }
   0x7   : > { %563 = vmatpush3.bf16.msra.mxu0 (!%p164_p2), %v594_v0  ;;  %582 = vmatpush3.bf16.msra.mxu1 (!%p164_p2), %v594_v0  ;;  %v512_v10 = vld [vmem:[%s686_s3] ss:$0 sm:$0xff] (!%p164_p2) }
   0x8   : > { %564 = vmatprep.subr.bf16.mxu0 (!%p164_p2), %v595_v1  ;;  %579 = vmatprep.subr.bf16.mxu1 (!%p164_p2), %v595_v1 }
   0xb   : > { %565 = vmatpush3.bf16.msra.mxu0 (!%p164_p2), %v595_v1  ;;  %583 = vmatpush3.bf16.msra.mxu1 (!%p164_p2), %v595_v1 }
   0xc   : > { %566 = vmatprep.subr.bf16.mxu0 (!%p164_p2), %v596_v2  ;;  %580 = vmatprep.subr.bf16.mxu1 (!%p164_p2), %v596_v2 }
   0xd   : > { %s689_s19 = smov (!%p190_p3, %s495_s19), 15 }
   0xe   : > { %s496_s24 = sshll.u32 %s689_s19, 2 }
   0xf   : > { %s193_s29 = scalar_lea.vmem %s683_s0, %s496_s24  ;;  %567 = vmatpush3.bf16.msra.mxu0 %v596_v2  ;;  %584 = vmatpush3.bf16.msra.mxu1 %v596_v2  ;;  %s199_s10 = scalar_lea.vmem %s687_s4, %s496_s24 }
  0x10   : > { %v598_v4 = vld [vmem:[%s193_s29] sm:$0xff]   ;;  %v599_v5 = vld [vmem:[%s193_s29 + $0x10] sm:$0xff]   ;;  %568 = vmatprep.subr.bf16.mxu0 %v597_v3  ;;  %581 = vmatprep.subr.bf16.mxu1 %v597_v3  ;;  %v600_v6 = vld [vmem:[%s193_s29 + $0x8] sm:$0xff]  }
  0x11   : > { %570 = vmatprep.mubr.msk.bf16.mxu0 %vm262_vm0, %v598_v4  ;;  %574 = vmatprep.mubr.msk.bf16.mxu1 %vm262_vm0, %v599_v5  ;;  %v601_v7 = vld [vmem:[%s193_s29 + $0x18] sm:$0xff]  }
  0x13   : > { %569 = vmatpush3.bf16.msra.mxu0 %v597_v3  ;;  %585 = vmatpush3.bf16.msra.mxu1 %v597_v3 }
  0x16   : > { %571 = vmatmul.mubr.msk.bf16.vlgmr.msra.gmra.mrb[0].mxu0 %vm262_vm0, %v600_v6  ;;  %575 = vmatmul.mubr.msk.bf16.vlgmr.msra.gmra.mrb[0].mxu1 %vm262_vm0, %v601_v7 }
  0xe9   : > { %v572_v9 = vpop.f32.mrb[0].mxu0  ;;  %v576_v11 = vpop.f32.mrb[0].mxu1 }
  0xea   : > { %v349_v12 = vmul.f32 %v572_v9, %v511_v8  ;;  %v353_v13 = vmul.f32 %v576_v11, %v511_v8  ;;  %v309_v14 = vpop.f32.mrb[1].mxu0  ;;  %v325_v15 = vpop.f32.mrb[1].mxu1 }
  0xeb   : > { %v347_v16 = vmul.f32 %v511_v8, %v309_v14  ;;  %v351_v17 = vmul.f32 %v511_v8, %v325_v15  ;;  %v573_v18 = vpop.f32.mrb[2].mxu0  ;;  %v577_v19 = vpop.f32.mrb[2].mxu1 }
  0xec   : > { %v364_v20 = vadd.f32 %v512_v10, %v349_v12  ;;  %v368_v21 = vadd.f32 %v512_v10, %v353_v13  ;;  %v350_v22 = vmul.f32 %v573_v18, %v511_v8  ;;  %v354_v23 = vmul.f32 %v577_v19, %v511_v8  ;;  %v312_v24 = vpop.f32.mrb[3].mxu0  ;;  %v328_v25 = vpop.f32.mrb[3].mxu1 }
  0xed   : > { %v362_v26 = vadd.f32 %v512_v10, %v347_v16  ;;  %v366_v27 = vadd.f32 %v512_v10, %v351_v17  ;;  %v348_v28 = vmul.f32 %v511_v8, %v312_v24  ;;  %v352_v29 = vmul.f32 %v511_v8, %v328_v25 }
  0xee   : > { %vm372_vm1 = vcmp.gt.f32.partialorder %v364_v20, 0.0  ;;  %v380_v30 = vmul.f32 0.01, %v364_v20  ;;  %vm376_vm2 = vcmp.gt.f32.partialorder %v368_v21, 0.0  ;;  %v384_v31 = vmul.f32 0.01, %v368_v21 }
  0xef   : > { %vm370_vm3 = vcmp.gt.f32.partialorder %v362_v26, 0.0  ;;  %v378_v32 = vmul.f32 0.01, %v362_v26  ;;  %vm374_vm4 = vcmp.gt.f32.partialorder %v366_v27, 0.0  ;;  %v382_v33 = vmul.f32 0.01, %v366_v27 }
  0xf0   : > { %v365_v34 = vadd.f32 %v512_v10, %v350_v22  ;;  %v369_v35 = vadd.f32 %v512_v10, %v354_v23  ;;  %v388_v36 = vsel %vm372_vm1, %v364_v20, %v380_v30  ;;  %v392_v37 = vsel %vm376_vm2, %v368_v21, %v384_v31 }
  0xf1   : > { %v363_v38 = vadd.f32 %v512_v10, %v348_v28  ;;  %v367_v39 = vadd.f32 %v512_v10, %v352_v29  ;;  %v386_v44 = vsel %vm370_vm3, %v362_v26, %v378_v32  ;;  %v390_v45 = vsel %vm374_vm4, %v366_v27, %v382_v33 }
  0xf2   : > { %vm373_vm5 = vcmp.gt.f32.partialorder %v365_v34, 0.0  ;;  %v381_v40 = vmul.f32 0.01, %v365_v34  ;;  %vm377_vm6 = vcmp.gt.f32.partialorder %v369_v35, 0.0  ;;  %v385_v41 = vmul.f32 0.01, %v369_v35 }
  0xf3   : > { %vm371_vm7 = vcmp.gt.f32.partialorder %v363_v38, 0.0  ;;  %v379_v42 = vmul.f32 0.01, %v363_v38  ;;  %vm375_vm8 = vcmp.gt.f32.partialorder %v367_v39, 0.0  ;;  %v383_v43 = vmul.f32 0.01, %v367_v39 }
  0xf4   : > { %v389_v46 = vsel %vm373_vm5, %v365_v34, %v381_v40  ;;  %v393_v47 = vsel %vm377_vm6, %v369_v35, %v385_v41 }
  0xf5   : > { %v539_v48 = vpack.c.bf16 %v389_v46, %v388_v36  ;;  %v549_v49 = vpack.c.bf16 %v393_v47, %v392_v37  ;;  %v387_v50 = vsel %vm371_vm7, %v363_v38, %v379_v42  ;;  %v391_v51 = vsel %vm375_vm8, %v367_v39, %v383_v43 }
  0xf6   : > { %v534_v52 = vpack.c.bf16 %v387_v50, %v386_v44  ;;  %v544_v53 = vpack.c.bf16 %v391_v51, %v390_v45 }
  0xf7   : > { %551 = vst [vmem:[%s199_s10 + $0x8] sm:$0xff] %v539_v48   ;;  %553 = vst [vmem:[%s199_s10 + $0x18] sm:$0xff] %v549_v49  }
  0xf8   : > { %535 = vst [vmem:[%s199_s10] sm:$0xff] %v534_v52   ;;  %552 = vst [vmem:[%s199_s10 + $0x10] sm:$0xff] %v544_v53  }
  0xf9 PF: > { %s14_s15 = sadd.s32 1, %s608_s15  }
  0xfa   : > { %p11_p4 = scmp.ge.s32.totalorder %s14_s15, 4  }
  0xfc   :  { %13 = sbr.rel (!%p11_p4) target bundleno = 1 (0x1), region = 66 }

// kernel: vae_forward.16
= control target key start
LH: loop header
LB: loop body
LE: loop exit
PB: predicated region body
PF: predicated region fallthrough
CT: control target
= control target key end

     0   :  { %s1253_s15 = smov 0   ;;  %s1415_s0 = inlined_call_operand.vmem [shape: bf16[1024,32], index: 0, kind: input, shape index: {}]   ;;  %s1416_s1 = inlined_call_operand.vmem [shape: bf16[32,128], index: 1, kind: input, shape index: {}]   ;;  %s1417_s2 = inlined_call_operand.vmem [shape: f32[1,128], index: 2, kind: input, shape index: {}]   ;;  %s1418_s3 = inlined_call_operand.vmem [shape: f32[1,128], index: 3, kind: input, shape index: {}]   ;;  %s1419_s4 = inlined_call_operand.vmem [shape: bf16[1024,128], index: 4, kind: output, shape index: {}]  }
   0x1 LB: > { %s930_s16 = sadd.s32 4294967295, %s1226_s15   ;;  %p934_p0 = scmp.ge.s32.totalorder %s1226_s15, 1  ;;  %s1226_s15 = sphi %s1253_s15, %s14_s15  }
   0x2   : > { %p163_p1 = scmp.lt.s32.totalorder %s1226_s15, 5 }
   0x4   : > { %p164_p2 = pnand %p934_p0, %p163_p1 }
   0x5   : > { %v1202_v0 = vld [vmem:[%s1416_s1] sm:$0xff] (!%p164_p2)   ;;  %s935_s19 = sshll.u32 (!%p164_p2), %s930_s16, 5  ;;  %v1203_v1 = vld [vmem:[%s1416_s1 + $0x8] sm:$0xff] (!%p164_p2)   ;;  %vm330_vm0 = vcmask (!%p164_p2), 261120  }
   0x6   : > { %167 = sbr.rel (%p164_p2) target bundleno = 279 (0x117), region = 36  ;;  %p190_p3 = scmp.lt.s32.totalorder (!%p164_p2), %s935_s19, 127  ;;  %1154 = vmatprep.subr.bf16.mxu0 (!%p164_p2), %v1202_v0  ;;  %1190 = vmatprep.subr.bf16.mxu1 (!%p164_p2), %v1202_v0  ;;  %v1312_v18 = vld [vmem:[%s1417_s2] ss:$0 sm:$0xff] (!%p164_p2) }
   0x7   : > { %1155 = vmatpush3.bf16.msra.mxu0 (!%p164_p2), %v1202_v0  ;;  %1192 = vmatpush3.bf16.msra.mxu1 (!%p164_p2), %v1202_v0  ;;  %v1317_v20 = vld [vmem:[%s1418_s3] ss:$0 sm:$0xff] (!%p164_p2) }
   0x8   : > { %1156 = vmatprep.subr.bf16.mxu0 (!%p164_p2), %v1203_v1  ;;  %1191 = vmatprep.subr.bf16.mxu1 (!%p164_p2), %v1203_v1 }
   0xb   : > { %1157 = vmatpush3.bf16.msra.mxu0 (!%p164_p2), %v1203_v1  ;;  %1193 = vmatpush3.bf16.msra.mxu1 (!%p164_p2), %v1203_v1 }
   0xd   : > { %s1421_s19 = smov (!%p190_p3, %s935_s19), 127 }
   0xe   : > { %s936_s22 = sshll.u32 %s1421_s19, 2 }
   0xf   : > { %s1275_s25 = scalar_lea.vmem %s1415_s0, %s936_s22  ;;  %s1340_s6 = scalar_lea.vmem %s1419_s4, %s936_s22 }
  0x10   : > { %v1204_v2 = vld [vmem:[%s1275_s25] sm:$0xff]   ;;  %v1206_v4 = vld [vmem:[%s1275_s25 + $0x8] sm:$0xff]   ;;  %v1208_v6 = vld [vmem:[%s1275_s25 + $0x10] sm:$0xff]  }
  0x11   : > { %v1205_v3 = vld [vmem:[%s1275_s25 + $0x40] sm:$0xff]   ;;  %1158 = vmatprep.mubr.msk.bf16.mxu0 %vm330_vm0, %v1204_v2  ;;  %v1207_v5 = vld [vmem:[%s1275_s25 + $0x48] sm:$0xff]   ;;  %v1209_v7 = vld [vmem:[%s1275_s25 + $0x50] sm:$0xff]  }
  0x12   : > { %1174 = vmatprep.mubr.msk.bf16.mxu1 %vm330_vm0, %v1205_v3  ;;  %1159 = vmatmul.mubr.msk.bf16.vlgmr.msra.gmra.mrb[0].mxu0 %vm330_vm0, %v1206_v4  ;;  %v1210_v8 = vld [vmem:[%s1275_s25 + $0x18] sm:$0xff]   ;;  %v1212_v10 = vld [vmem:[%s1275_s25 + $0x20] sm:$0xff]   ;;  %v1214_v12 = vld [vmem:[%s1275_s25 + $0x28] sm:$0xff]  }
  0x13   : > { %1175 = vmatmul.mubr.msk.bf16.vlgmr.msra.gmra.mrb[0].mxu1 %vm330_vm0, %v1207_v5  ;;  %1162 = vmatprep.mubr.msk.bf16.mxu0 %vm330_vm0, %v1208_v6  ;;  %v1211_v9 = vld [vmem:[%s1275_s25 + $0x58] sm:$0xff]   ;;  %v1213_v11 = vld [vmem:[%s1275_s25 + $0x60] sm:$0xff]   ;;  %v1215_v13 = vld [vmem:[%s1275_s25 + $0x68] sm:$0xff]  }
  0x14   : > { %1178 = vmatprep.mubr.msk.bf16.mxu1 %vm330_vm0, %v1209_v7  ;;  %v1216_v14 = vld [vmem:[%s1275_s25 + $0x30] sm:$0xff]   ;;  %v1218_v16 = vld [vmem:[%s1275_s25 + $0x38] sm:$0xff]  }
  0x15   : > { %v1217_v15 = vld [vmem:[%s1275_s25 + $0x70] sm:$0xff]   ;;  %v1219_v17 = vld [vmem:[%s1275_s25 + $0x78] sm:$0xff]  }
  0x1a   : > { %1163 = vmatmul.mubr.msk.bf16.gmra.mrb[4].mxu0 %vm330_vm0, %v1210_v8 }
  0x1b   : > { %1179 = vmatmul.mubr.msk.bf16.gmra.mrb[4].mxu1 %vm330_vm0, %v1211_v9  ;;  %1166 = vmatprep.mubr.msk.bf16.mxu0 %vm330_vm0, %v1212_v10 }
  0x1c   : > { %1182 = vmatprep.mubr.msk.bf16.mxu1 %vm330_vm0, %v1213_v11 }
  0x22   : > { %1167 = vmatmul.mubr.msk.bf16.gmra.mrb[8].mxu0 %vm330_vm0, %v1214_v12 }
  0x23   : > { %1183 = vmatmul.mubr.msk.bf16.gmra.mrb[8].mxu1 %vm330_vm0, %v1215_v13  ;;  %1170 = vmatprep.mubr.msk.bf16.mxu0 %vm330_vm0, %v1216_v14 }
  0x24   : > { %1186 = vmatprep.mubr.msk.bf16.mxu1 %vm330_vm0, %v1217_v15 }
  0x2a   : > { %1171 = vmatmul.mubr.msk.bf16.gmra.mrb[12].mxu0 %vm330_vm0, %v1218_v16 }
  0x2b   : > { %1187 = vmatmul.mubr.msk.bf16.gmra.mrb[12].mxu1 %vm330_vm0, %v1219_v17 }
  0xe5   : > { %v1160_v19 = vpop.f32.mrb[0].mxu0 }
  0xe6   : > { %v549_v21 = vmul.f32 %v1160_v19, %v1312_v18  ;;  %v1176_v22 = vpop.f32.mrb[0].mxu1  ;;  %v413_v23 = vpop.f32.mrb[1].mxu0 }
  0xe7   : > { %v565_v24 = vmul.f32 %v1176_v22, %v1312_v18  ;;  %v547_v25 = vmul.f32 %v1312_v18, %v413_v23  ;;  %v477_v26 = vpop.f32.mrb[1].mxu1  ;;  %v1161_v27 = vpop.f32.mrb[2].mxu0 }
  0xe8   : > { %v588_v28 = vadd.f32 %v1317_v20, %v549_v21  ;;  %v563_v29 = vmul.f32 %v1312_v18, %v477_v26  ;;  %v550_v30 = vmul.f32 %v1161_v27, %v1312_v18  ;;  %v1177_v31 = vpop.f32.mrb[2].mxu1  ;;  %v416_v32 = vpop.f32.mrb[3].mxu0 }
  0xe9   : > { %v604_v33 = vadd.f32 %v1317_v20, %v565_v24  ;;  %v586_v34 = vadd.f32 %v1317_v20, %v547_v25  ;;  %v566_v35 = vmul.f32 %v1177_v31, %v1312_v18  ;;  %v548_v36 = vmul.f32 %v1312_v18, %v416_v32  ;;  %v480_v37 = vpop.f32.mrb[3].mxu1 }
  0xea   : > { %vm620_vm1 = vcmp.gt.f32.partialorder %v588_v28, 0.0  ;;  %v652_v38 = vmul.f32 0.01, %v588_v28  ;;  %v602_v39 = vadd.f32 %v1317_v20, %v563_v29  ;;  %v589_v40 = vadd.f32 %v1317_v20, %v550_v30 }
  0xeb   : > { %vm636_vm2 = vcmp.gt.f32.partialorder %v604_v33, 0.0  ;;  %v668_v41 = vmul.f32 0.01, %v604_v33  ;;  %vm618_vm3 = vcmp.gt.f32.partialorder %v586_v34, 0.0  ;;  %v650_v42 = vmul.f32 0.01, %v586_v34 }
  0xec   : > { %v684_v43 = vsel %vm620_vm1, %v588_v28, %v652_v38  ;;  %vm634_vm4 = vcmp.gt.f32.partialorder %v602_v39, 0.0  ;;  %vm621_vm5 = vcmp.gt.f32.partialorder %v589_v40, 0.0  ;;  %v666_v45 = vmul.f32 0.01, %v602_v39 }
  0xed   : > { %v700_v44 = vsel %vm636_vm2, %v604_v33, %v668_v41  ;;  %v653_v46 = vmul.f32 0.01, %v589_v40  ;;  %v605_v47 = vadd.f32 %v1317_v20, %v566_v35  ;;  %v1164_v48 = vpop.f32.mrb[4].mxu0  ;;  %v682_v49 = vsel %vm618_vm3, %v586_v34, %v650_v42 }
  0xee   : > { %v587_v50 = vadd.f32 %v1317_v20, %v548_v36  ;;  %v564_v51 = vmul.f32 %v1312_v18, %v480_v37  ;;  %v553_v52 = vmul.f32 %v1164_v48, %v1312_v18  ;;  %v1180_v53 = vpop.f32.mrb[4].mxu1  ;;  %v429_v54 = vpop.f32.mrb[5].mxu0  ;;  %v698_v9 = vsel %vm634_vm4, %v602_v39, %v666_v45 }
  0xef   : > { %v685_v55 = vsel %vm621_vm5, %v589_v40, %v653_v46  ;;  %vm637_vm6 = vcmp.gt.f32.partialorder %v605_v47, 0.0  ;;  %v669_v56 = vmul.f32 0.01, %v605_v47  ;;  %v569_v57 = vmul.f32 %v1180_v53, %v1312_v18  ;;  %v493_v58 = vpop.f32.mrb[5].mxu1  ;;  %v1165_v59 = vpop.f32.mrb[6].mxu0 }
  0xf0   : > { %v1049_v60 = vpack.c.bf16 %v685_v55, %v684_v43  ;;  %vm619_vm7 = vcmp.gt.f32.partialorder %v587_v50, 0.0  ;;  %v651_v61 = vmul.f32 0.01, %v587_v50  ;;  %v603_v62 = vadd.f32 %v1317_v20, %v564_v51  ;;  %v1181_v63 = vpop.f32.mrb[6].mxu1  ;;  %v432_v0 = vpop.f32.mrb[7].mxu0 }
  0xf1   : > { %v701_v1 = vsel %vm637_vm6, %v605_v47, %v669_v56  ;;  %v592_v2 = vadd.f32 %v1317_v20, %v553_v52  ;;  %v608_v3 = vadd.f32 %v1317_v20, %v569_v57  ;;  %v551_v4 = vmul.f32 %v1312_v18, %v429_v54  ;;  %v496_v5 = vpop.f32.mrb[7].mxu1 }
  0xf2   : > { %1121 = vst [vmem:[%s1340_s6 + $0x8] sm:$0xff] %v1049_v60   ;;  %v1089_v6 = vpack.c.bf16 %v701_v1, %v700_v44  ;;  %v683_v7 = vsel %vm619_vm7, %v587_v50, %v651_v61  ;;  %vm635_vm8 = vcmp.gt.f32.partialorder %v603_v62, 0.0  ;;  %v667_v8 = vmul.f32 0.01, %v603_v62 }
  0xf3   : > { %v1044_v10 = vpack.c.bf16 %v683_v7, %v682_v49  ;;  %vm624_vm9 = vcmp.gt.f32.partialorder %v592_v2, 0.0  ;;  %v656_v11 = vmul.f32 0.01, %v592_v2  ;;  %v672_v13 = vmul.f32 0.01, %v608_v3 }
  0xf4   : > { %1129 = vst [vmem:[%s1340_s6 + $0x48] sm:$0xff] %v1089_v6   ;;  %v699_v12 = vsel %vm635_vm8, %v603_v62, %v667_v8  ;;  %v590_v14 = vadd.f32 %v1317_v20, %v551_v4  ;;  %v567_v15 = vmul.f32 %v1312_v18, %v493_v58  ;;  %vm640_vm10 = vcmp.gt.f32.partialorder %v608_v3, 0.0 }
  0xf5   : > { %1045 = vst [vmem:[%s1340_s6] sm:$0xff] %v1044_v10   ;;  %v1084_v16 = vpack.c.bf16 %v699_v12, %v698_v9  ;;  %v554_v17 = vmul.f32 %v1165_v59, %v1312_v18  ;;  %v570_v19 = vmul.f32 %v1181_v63, %v1312_v18  ;;  %v1168_v21 = vpop.f32.mrb[8].mxu0  ;;  %v688_v22 = vsel %vm624_vm9, %v592_v2, %v656_v11 }
  0xf6   : > { %vm622_vm11 = vcmp.gt.f32.partialorder %v590_v14, 0.0  ;;  %v654_v23 = vmul.f32 0.01, %v590_v14  ;;  %v606_v24 = vadd.f32 %v1317_v20, %v567_v15  ;;  %v1184_v25 = vpop.f32.mrb[8].mxu1  ;;  %v445_v26 = vpop.f32.mrb[9].mxu0  ;;  %v552_v29 = vmul.f32 %v1312_v18, %v432_v0 }
  0xf7   : > { %1128 = vst [vmem:[%s1340_s6 + $0x40] sm:$0xff] %v1084_v16   ;;  %v593_v27 = vadd.f32 %v1317_v20, %v554_v17  ;;  %v609_v28 = vadd.f32 %v1317_v20, %v570_v19  ;;  %v568_v30 = vmul.f32 %v1312_v18, %v496_v5  ;;  %v509_v31 = vpop.f32.mrb[9].mxu1  ;;  %v1169_v32 = vpop.f32.mrb[10].mxu0  ;;  %v704_v33 = vsel %vm640_vm10, %v608_v3, %v672_v13 }
  0xf8   : > { %v686_v34 = vsel %vm622_vm11, %v590_v14, %v654_v23  ;;  %vm638_vm12 = vcmp.gt.f32.partialorder %v606_v24, 0.0  ;;  %v557_v35 = vmul.f32 %v1168_v21, %v1312_v18  ;;  %v1185_v36 = vpop.f32.mrb[10].mxu1  ;;  %v448_v37 = vpop.f32.mrb[11].mxu0  ;;  %v670_v40 = vmul.f32 0.01, %v606_v24 }
  0xf9   : > { %vm625_vm13 = vcmp.gt.f32.partialorder %v593_v27, 0.0  ;;  %v657_v38 = vmul.f32 0.01, %v593_v27  ;;  %vm641_vm14 = vcmp.gt.f32.partialorder %v609_v28, 0.0  ;;  %v673_v39 = vmul.f32 0.01, %v609_v28 }
  0xfa   : > { %v591_v41 = vadd.f32 %v1317_v20, %v552_v29  ;;  %v607_v42 = vadd.f32 %v1317_v20, %v568_v30  ;;  %v596_v43 = vadd.f32 %v1317_v20, %v557_v35  ;;  %v512_v44 = vpop.f32.mrb[11].mxu1  ;;  %v573_v47 = vmul.f32 %v1184_v25, %v1312_v18 }
  0xfb   : > { %v689_v45 = vsel %vm625_vm13, %v593_v27, %v657_v38  ;;  %v705_v46 = vsel %vm641_vm14, %v609_v28, %v673_v39  ;;  %v555_v48 = vmul.f32 %v1312_v18, %v445_v26  ;;  %v571_v57 = vmul.f32 %v1312_v18, %v509_v31 }
  0xfc   : > { %v1059_v49 = vpack.c.bf16 %v689_v45, %v688_v22  ;;  %v1099_v50 = vpack.c.bf16 %v705_v46, %v704_v33  ;;  %vm623_vm15 = vcmp.gt.f32.partialorder %v591_v41, 0.0  ;;  %v655_v51 = vmul.f32 0.01, %v591_v41 }
  0xfd   : > { %vm639_vm0 = vcmp.gt.f32.partialorder %v607_v42, 0.0  ;;  %v671_v52 = vmul.f32 0.01, %v607_v42  ;;  %vm628_vm1 = vcmp.gt.f32.partialorder %v596_v43, 0.0  ;;  %v660_v53 = vmul.f32 0.01, %v596_v43 }
  0xfe   : > { %1123 = vst [vmem:[%s1340_s6 + $0x18] sm:$0xff] %v1059_v49   ;;  %1131 = vst [vmem:[%s1340_s6 + $0x58] sm:$0xff] %v1099_v50   ;;  %v687_v54 = vsel %vm623_vm15, %v591_v41, %v655_v51  ;;  %v612_v55 = vadd.f32 %v1317_v20, %v573_v47  ;;  %v594_v56 = vadd.f32 %v1317_v20, %v555_v48  ;;  %v1172_v58 = vpop.f32.mrb[12].mxu0  ;;  %v1188_v59 = vpop.f32.mrb[12].mxu1 }
  0xff   : > { %v702_v60 = vsel %vm638_vm12, %v606_v24, %v670_v40  ;;  %v1054_v61 = vpack.c.bf16 %v687_v54, %v686_v34  ;;  %v703_v62 = vsel %vm639_vm0, %v607_v42, %v671_v52  ;;  %v558_v63 = vmul.f32 %v1169_v32, %v1312_v18  ;;  %v461_v0 = vpop.f32.mrb[13].mxu0  ;;  %v525_v1 = vpop.f32.mrb[13].mxu1 }
 0x100   : > { %v1094_v2 = vpack.c.bf16 %v703_v62, %v702_v60  ;;  %vm644_vm2 = vcmp.gt.f32.partialorder %v612_v55, 0.0  ;;  %v676_v3 = vmul.f32 0.01, %v612_v55  ;;  %v1173_v4 = vpop.f32.mrb[14].mxu0  ;;  %v1189_v5 = vpop.f32.mrb[14].mxu1  ;;  %v692_v6 = vsel %vm628_vm1, %v596_v43, %v660_v53 }
 0x101   : > { %1122 = vst [vmem:[%s1340_s6 + $0x10] sm:$0xff] %v1054_v61   ;;  %v610_v7 = vadd.f32 %v1317_v20, %v571_v57  ;;  %v597_v8 = vadd.f32 %v1317_v20, %v558_v63  ;;  %v574_v9 = vmul.f32 %v1185_v36, %v1312_v18  ;;  %v464_v10 = vpop.f32.mrb[15].mxu0  ;;  %v528_v11 = vpop.f32.mrb[15].mxu1  ;;  %vm626_vm3 = vcmp.gt.f32.partialorder %v594_v56, 0.0 }
 0x102   : > { %1130 = vst [vmem:[%s1340_s6 + $0x50] sm:$0xff] %v1094_v2   ;;  %v556_v12 = vmul.f32 %v1312_v18, %v448_v37  ;;  %v572_v13 = vmul.f32 %v1312_v18, %v512_v44  ;;  %v561_v14 = vmul.f32 %v1172_v58, %v1312_v18  ;;  %v708_v15 = vsel %vm644_vm2, %v612_v55, %v676_v3 }
 0x103   : > { %v658_v16 = vmul.f32 0.01, %v594_v56  ;;  %v674_v17 = vmul.f32 0.01, %v610_v7  ;;  %vm629_vm4 = vcmp.gt.f32.partialorder %v597_v8, 0.0  ;;  %v613_v21 = vadd.f32 %v1317_v20, %v574_v9 }
 0x104   : > { %v661_v19 = vmul.f32 0.01, %v597_v8  ;;  %v595_v22 = vadd.f32 %v1317_v20, %v556_v12  ;;  %v611_v23 = vadd.f32 %v1317_v20, %v572_v13  ;;  %vm642_vm5 = vcmp.gt.f32.partialorder %v610_v7, 0.0 }
 0x105   : > { %v600_v24 = vadd.f32 %v1317_v20, %v561_v14  ;;  %v577_v25 = vmul.f32 %v1188_v59, %v1312_v18  ;;  %v559_v26 = vmul.f32 %v1312_v18, %v461_v0  ;;  %vm645_vm6 = vcmp.gt.f32.partialorder %v613_v21, 0.0 }
 0x106   : > { %v693_v27 = vsel %vm629_vm4, %v597_v8, %v661_v19  ;;  %v677_v28 = vmul.f32 0.01, %v613_v21  ;;  %vm627_vm7 = vcmp.gt.f32.partialorder %v595_v22, 0.0  ;;  %v659_v30 = vmul.f32 0.01, %v595_v22 }
 0x107   : > { %v1069_v29 = vpack.c.bf16 %v693_v27, %v692_v6  ;;  %vm643_vm8 = vcmp.gt.f32.partialorder %v611_v23, 0.0  ;;  %v675_v31 = vmul.f32 0.01, %v611_v23  ;;  %v690_v32 = vsel %vm626_vm3, %v594_v56, %v658_v16 }
 0x108   : > { %v706_v33 = vsel %vm642_vm5, %v610_v7, %v674_v17  ;;  %v709_v34 = vsel %vm645_vm6, %v613_v21, %v677_v28  ;;  %v664_v35 = vmul.f32 0.01, %v600_v24  ;;  %v691_v37 = vsel %vm627_vm7, %v595_v22, %v659_v30 }
 0x109   : > { %1125 = vst [vmem:[%s1340_s6 + $0x28] sm:$0xff] %v1069_v29   ;;  %v1109_v36 = vpack.c.bf16 %v709_v34, %v708_v15  ;;  %v707_v38 = vsel %vm643_vm8, %v611_v23, %v675_v31  ;;  %v616_v39 = vadd.f32 %v1317_v20, %v577_v25  ;;  %v1064_v40 = vpack.c.bf16 %v691_v37, %v690_v32 }
 0x10a   : > { %v1104_v41 = vpack.c.bf16 %v707_v38, %v706_v33  ;;  %vm632_vm9 = vcmp.gt.f32.partialorder %v600_v24, 0.0  ;;  %v598_v42 = vadd.f32 %v1317_v20, %v559_v26  ;;  %v575_v43 = vmul.f32 %v1312_v18, %v525_v1 }
 0x10b   : > { %1133 = vst [vmem:[%s1340_s6 + $0x68] sm:$0xff] %v1109_v36   ;;  %1124 = vst [vmem:[%s1340_s6 + $0x20] sm:$0xff] %v1064_v40   ;;  %v562_v44 = vmul.f32 %v1173_v4, %v1312_v18  ;;  %v578_v45 = vmul.f32 %v1189_v5, %v1312_v18  ;;  %v560_v46 = vmul.f32 %v1312_v18, %v464_v10  ;;  %v680_v49 = vmul.f32 0.01, %v616_v39 }
 0x10c   : > { %1132 = vst [vmem:[%s1340_s6 + $0x60] sm:$0xff] %v1104_v41   ;;  %v576_v47 = vmul.f32 %v1312_v18, %v528_v11  ;;  %v696_v48 = vsel %vm632_vm9, %v600_v24, %v664_v35  ;;  %v614_v50 = vadd.f32 %v1317_v20, %v575_v43  ;;  %vm648_vm10 = vcmp.gt.f32.partialorder %v616_v39, 0.0 }
 0x10d   : > { %v601_v51 = vadd.f32 %v1317_v20, %v562_v44  ;;  %v617_v52 = vadd.f32 %v1317_v20, %v578_v45  ;;  %v599_v53 = vadd.f32 %v1317_v20, %v560_v46  ;;  %vm630_vm11 = vcmp.gt.f32.partialorder %v598_v42, 0.0 }
 0x10e   : > { %v615_v54 = vadd.f32 %v1317_v20, %v576_v47  ;;  %v662_v55 = vmul.f32 0.01, %v598_v42  ;;  %v678_v56 = vmul.f32 0.01, %v614_v50  ;;  %vm646_vm14 = vcmp.gt.f32.partialorder %v614_v50, 0.0 }
 0x10f   : > { %vm633_vm12 = vcmp.gt.f32.partialorder %v601_v51, 0.0  ;;  %v665_v57 = vmul.f32 0.01, %v601_v51  ;;  %vm649_vm13 = vcmp.gt.f32.partialorder %v617_v52, 0.0  ;;  %v681_v18 = vmul.f32 0.01, %v617_v52 }
 0x110   : > { %vm631_vm15 = vcmp.gt.f32.partialorder %v599_v53, 0.0  ;;  %v663_v58 = vmul.f32 0.01, %v599_v53  ;;  %vm647_vm0 = vcmp.gt.f32.partialorder %v615_v54, 0.0  ;;  %v712_v59 = vsel %vm648_vm10, %v616_v39, %v680_v49 }
 0x111   : > { %v697_v60 = vsel %vm633_vm12, %v601_v51, %v665_v57  ;;  %v713_v61 = vsel %vm649_vm13, %v617_v52, %v681_v18  ;;  %v679_v20 = vmul.f32 0.01, %v615_v54  ;;  %v694_v62 = vsel %vm630_vm11, %v598_v42, %v662_v55 }
 0x112   : > { %v1079_v63 = vpack.c.bf16 %v697_v60, %v696_v48  ;;  %v1119_v0 = vpack.c.bf16 %v713_v61, %v712_v59  ;;  %v695_v1 = vsel %vm631_vm15, %v599_v53, %v663_v58  ;;  %v710_v2 = vsel %vm646_vm14, %v614_v50, %v678_v56 }
 0x113   : > { %v1074_v3 = vpack.c.bf16 %v695_v1, %v694_v62  ;;  %v711_v4 = vsel %vm647_vm0, %v615_v54, %v679_v20 }
 0x114   : > { %1127 = vst [vmem:[%s1340_s6 + $0x38] sm:$0xff] %v1079_v63   ;;  %1135 = vst [vmem:[%s1340_s6 + $0x78] sm:$0xff] %v1119_v0   ;;  %v1114_v5 = vpack.c.bf16 %v711_v4, %v710_v2 }
 0x115   : > { %1126 = vst [vmem:[%s1340_s6 + $0x30] sm:$0xff] %v1074_v3  }
 0x116   : > { %1134 = vst [vmem:[%s1340_s6 + $0x70] sm:$0xff] %v1114_v5  }
 0x117 PF: > { %s14_s15 = sadd.s32 1, %s1226_s15  }
 0x118   : > { %p11_p4 = scmp.ge.s32.totalorder %s14_s15, 6  }
 0x11a   :  { %13 = sbr.rel (!%p11_p4) target bundleno = 1 (0x1), region = 66 }

// kernel: vae_forward.17
= control target key start
LH: loop header
LB: loop body
LE: loop exit
PB: predicated region body
PF: predicated region fallthrough
CT: control target
= control target key end

     0   :  { %9 = vsyncpa [#allocation3], 0  ;;  %s1952_s0 = inlined_call_operand.hbm [shape: bf16[8192,108], index: 0, kind: input, shape index: {}]   ;;  %s1953_s1 = inlined_call_operand.hbm [shape: bf16[108,128], index: 1, kind: input, shape index: {}]   ;;  %s1954_s2 = inlined_call_operand.hbm [shape: f32[1,128], index: 2, kind: input, shape index: {}]   ;;  %s1955_s3 = inlined_call_operand.hbm [shape: f32[1,128], index: 3, kind: input, shape index: {}]   ;;  %s1956_s4 = inlined_call_operand.vmem [shape: f32[8192,128], index: 4, kind: output, shape index: {}]  }
   0x1   :  { %11 = vsyncpa [#allocation3 + $0x1], 0 }
   0x2   :  { %12 = vsyncpa [#allocation5], 0 }
   0x3   :  { %13 = vsyncpa [#allocation8], 0  ;;  %s1566_s15 = smov 0   ;;  %s1568_s16 = smov 0  }
   0x4   :  { %s1570_s17 = smov 0   ;;  %s1572_s18 = smov 0  }
   0x5 LB: > { %s1008_s19 = sadd.s32 4294967295, %s1533_s18   ;;  %p39_p0 = scmp.ne.s32.totalorder %s1525_s16, %s1521_s15  ;;  %s1533_s18 = sphi %s1572_s18, %s1973_s18   ;;  %s1529_s17 = sphi %s1570_s17, %s1972_s17   ;;  %s1525_s16 = sphi %s1568_s16, %s1971_s16   ;;  %s1521_s15 = sphi %s1566_s15, %s1970_s15  }
   0x6   : > { %p1588_p1 = scmp.eq.s32.totalorder %s1008_s19, 0  ;;  %p1010_p2 = scmp.ge.s32.totalorder %s1533_s18, 1 }
   0x7   : > { %p139_p3 = scmp.lt.s32.totalorder %s1533_s18, 33  ;;  %s1535_s23 = smov [#allocation4]  }
   0x8   : > { %s1961_s20 = scalar_select %p1588_p1, 1, 0 }
   0x9   : > { %p1596_p4 = por %p1588_p1, %p39_p0  ;;  %p1600_p5 = pnand %p1010_p2, %p139_p3 }
   0xa   : > { %s151_s24 = sshll.u32 %s1535_s23, 4  ;;  %s1536_s26 = smov [#allocation6]   ;;  %s1604_s24 = int_to_ptr.vmem [resolvable:$true] %s151_s24 }
   0xb   : > { %s1962_s21 = scalar_select %p1596_p4, 1, 0 }
   0xc   : > { %s1963_s22 = scalar_select %p1600_p5, 1, 0 }
   0xd   : > { %p1168_p6 = pneg %p1600_p5  ;;  %s165_s27 = sshll.u32 %s1536_s26, 4  ;;  %s1614_s27 = int_to_ptr.vmem [resolvable:$true] %s165_s27 }
   0xe   : > { %s1537_s28 = smov [#allocation7]   ;;  %s1377_s6 = scalar_lea.hbm %s1953_s1, 896 }
   0xf   : > { %p1610_p7 = pnand %p1168_p6, %p1588_p1  ;;  %s1616_s29 = sshll.u32 %s1537_s28, 4  ;;  %s177_s29 = int_to_ptr.vmem [resolvable:$true] %s1616_s29 }
  0x10   : > { %p1378_p8 = scmp.ne.s32.totalorder %s1953_s1, %s1377_s6  ;;  %p1384_p12 = scmp.lt.u32.totalorder %s1377_s6, %s1953_s1 }
  0x11   : > { %p1626_p9 = pneg %p1610_p7 }
  0x13   : > { %p1380_p10 = pnand %p1626_p9, %p1378_p8 }
  0x15   : > { %p1381_p11 = pneg %p1380_p10 }
  0x17   : > { %p1386_p13 = pnand %p1384_p12, %p1381_p11 }
  0x19   : > { %1389 = shalt.err (!%p1386_p13)
}
  0x1a   : > { %s1390_s12 = scalar_lea.vmem %s1604_s24, 896  ;;  %p1398_p6 = scmp.lt.s32.totalorder %s1604_s24, %s1604_s24 }
  0x1b   : > { %p1391_p0 = scmp.ne.s32.totalorder %s1604_s24, %s1390_s12  ;;  %p1399_p1 = scmp.lt.s32.totalorder %s1390_s12, %s1390_s12 }
  0x1d   : > { %p1393_p2 = pnand %p1391_p0, %p1626_p9  ;;  %p1400_p8 = por %p1399_p1, %p1398_p6 }
  0x1f   : > { %p1394_p3 = pneg %p1393_p2 }
  0x21   : > { %p1401_p10 = pnand %p1400_p8, %p1394_p3 }
  0x23   : > { %1404 = shalt.err (!%p1401_p10)
}
  0x24   : > { %s1538_s13 = smov 64   ;;  %s1539_s14 = smov 4  }
  0x25   : > { %1171 = dma.hbm_to_vmem [thread:$0]  (!%p1610_p7), %s1953_s1, 896, %s1604_s24, [#allocation5], %s1538_s13, %s1538_s13, %s1539_s14  }
  0x26   : > { %s1405_s30 = scalar_lea.hbm %s1954_s2, 16 }
  0x27   : > { %p1406_p1 = scmp.ne.s32.totalorder %s1954_s2, %s1405_s30  ;;  %p1412_p13 = scmp.lt.u32.totalorder %s1405_s30, %s1954_s2 }
  0x29   : > { %p1408_p11 = pnand %p1406_p1, %p1626_p9 }
  0x2b   : > { %p1409_p12 = pneg %p1408_p11 }
  0x2d   : > { %p1414_p0 = pnand %p1412_p13, %p1409_p12 }
  0x2f   : > { %1417 = shalt.err (!%p1414_p0)
}
  0x30   : > { %s1418_s24 = scalar_lea.vmem %s1614_s27, 16  ;;  %s1425_s10 = scalar_lea.vmem %s1614_s27, 32 }
  0x31   : > { %p1419_p2 = scmp.ne.s32.totalorder %s1614_s27, %s1418_s24  ;;  %p1426_p8 = scmp.lt.s32.totalorder %s1614_s27, %s1614_s27 }
  0x32   : > { %p1427_p10 = scmp.lt.s32.totalorder %s1425_s10, %s1418_s24 }
  0x33   : > { %p1421_p3 = pnand %p1419_p2, %p1626_p9 }
  0x34   : > { %p1428_p1 = por %p1427_p10, %p1426_p8 }
  0x35   : > { %p1422_p6 = pneg %p1421_p3 }
  0x37   : > { %p1429_p11 = pnand %p1428_p1, %p1422_p6 }
  0x39   : > { %1432 = shalt.err (!%p1429_p11)
}
  0x3a   : > { %1174 = dma.hbm_to_vmem [thread:$0]  (!%p1610_p7), %s1954_s2, 16, %s1614_s27, [#allocation5]  }
  0x3b   : > { %s1433_s26 = scalar_lea.hbm %s1955_s3, 16 }
  0x3c   : > { %p1434_p12 = scmp.ne.s32.totalorder %s1955_s3, %s1433_s26  ;;  %p1440_p2 = scmp.lt.u32.totalorder %s1433_s26, %s1955_s3 }
  0x3e   : > { %p1436_p13 = pnand %p1434_p12, %p1626_p9 }
  0x40   : > { %p1437_p0 = pneg %p1436_p13 }
  0x42   : > { %p1442_p3 = pnand %p1440_p2, %p1437_p0 }
  0x44   : > { %1445 = shalt.err (!%p1442_p3)
}
  0x45   : > { %s1446_s7 = scalar_lea.vmem %s177_s29, 16  ;;  %s1453_s27 = scalar_lea.vmem %s177_s29, 32 }
  0x46   : > { %p1447_p6 = scmp.ne.s32.totalorder %s177_s29, %s1446_s7  ;;  %p1454_p1 = scmp.lt.s32.totalorder %s177_s29, %s177_s29 }
  0x47   : > { %p1455_p11 = scmp.lt.s32.totalorder %s1453_s27, %s1446_s7 }
  0x48   : > { %p1449_p8 = pnand %p1447_p6, %p1626_p9 }
  0x49   : > { %p1456_p4 = por %p1455_p11, %p1454_p1 }
  0x4a   : > { %p1450_p10 = pneg %p1449_p8 }
  0x4c   : > { %p1457_p5 = pnand %p1456_p4, %p1450_p10 }
  0x4e   : > { %1460 = shalt.err (!%p1457_p5)
}
  0x4f   : > { %1177 = dma.hbm_to_vmem [thread:$0]  (!%p1610_p7), %s1955_s3, 16, %s177_s29, [#allocation8]  }
  0x50   : > { %s1694_s9 = sadd.s32 1, %s1533_s18   ;;  %s26_s11 = sadd.s32 1, %s1529_s17 }
  0x51   : > { %s23_s10 = ssub.s32 %s1533_s18, %s1694_s9  ;;  %p33_p5 = scmp.ne.s32.totalorder %s1529_s17, %s1525_s16 }
  0x52   : > { %p24_p4 = scmp.eq.s32.totalorder %s23_s10, 0  ;;  %p34_p9 = scmp.eq.s32.totalorder %s1533_s18, 0 }
  0x53   : > { %p1185_p12 = scmp.lt.s32.totalorder %s1533_s18, 32  ;;  %s187_s12 = sand.u32 1, %s1529_s17  }
  0x54   : > { %s1704_s25 = scalar_select %p24_p4, %s1529_s17, %s26_s11  }
  0x55   : > { %p35_p13 = por %p34_p9, %p33_p5  ;;  %s1015_s15 = sshll.u32 %s187_s12, 7 }
  0x56   : > { %s1068_s23 = sshll.u32 %s1533_s18, 11  ;;  %s191_s29 = scalar_lea.vmem [#allocation2], %s1015_s15 }
  0x57   : > { %s1711_s30 = scalar_lea.hbm %s1952_s0, %s1068_s23  ;;  %s198_s5 = sshll.u32 %s191_s29, 4  ;;  %s1713_s5 = int_to_ptr.vmem [resolvable:$true] %s198_s5 }
  0x58   : > { %p1715_p7 = pnand %p1185_p12, %p35_p13  ;;  %s1719_s7 = scalar_lea.sflag [#allocation3], %s187_s12 }
  0x59   : > { %s1461_s27 = scalar_lea.hbm %s1711_s30, 2048  ;;  %s1466_s10 = scalar_lea.hbm %s1952_s0, 65536 }
  0x5a   : > { %p1462_p0 = scmp.ne.s32.totalorder %s1711_s30, %s1461_s27  ;;  %p1463_p2 = pneg %p1715_p7 }
  0x5b   : > { %p1467_p8 = scmp.lt.u32.totalorder %s1711_s30, %s1952_s0  ;;  %p1468_p10 = scmp.lt.u32.totalorder %s1466_s10, %s1461_s27 }
  0x5c   : > { %p1464_p3 = pnand %p1463_p2, %p1462_p0  ;;  %p1470_p11 = scmp.lt.u32.totalorder %s1461_s27, %s1711_s30 }
  0x5d   : > { %p1469_p1 = por %p1468_p10, %p1467_p8 }
  0x5e   : > { %p1465_p6 = pneg %p1464_p3 }
  0x5f   : > { %p1471_p4 = por %p1470_p11, %p1469_p1 }
  0x61   : > { %p1472_p5 = pnand %p1471_p4, %p1465_p6 }
  0x63   : > { %1475 = shalt.err (!%p1472_p5)
}
  0x64   : > { %s1476_s12 = scalar_lea.vmem %s1713_s5, 2048  ;;  %s1540_s23 = smov [#allocation2]  }
  0x65   : > { %p1477_p9 = scmp.ne.s32.totalorder %s1713_s5, %s1476_s12  ;;  %s1481_s26 = sshll.u32 %s1540_s23, 4  ;;  %s1482_s26 = int_to_ptr.vmem [resolvable:$false] %s1481_s26 }
  0x66   : > { %s1483_s28 = scalar_lea.vmem %s1482_s26, 4096  ;;  %p1484_p0 = scmp.lt.s32.totalorder %s1713_s5, %s1482_s26 }
  0x67   : > { %p1479_p12 = pnand %p1477_p9, %p1463_p2  ;;  %p1485_p3 = scmp.lt.s32.totalorder %s1483_s28, %s1476_s12 }
  0x69   : > { %p1480_p13 = pneg %p1479_p12  ;;  %p1486_p8 = por %p1485_p3, %p1484_p0 }
  0x6b   : > { %p1487_p10 = pnand %p1486_p8, %p1480_p13 }
  0x6d   : > { %1490 = shalt.err (!%p1487_p10)
}
  0x6e   : > { %1181 = dma.hbm_to_vmem [thread:$0]  (!%p1715_p7), %s1711_s30, 2048, %s1713_s5, %s1719_s7, %s1538_s13, %s1538_s13, %s1539_s14  }
  0x6f   : > { %p1967_p2 = scmp.ne.s32.totalorder %s1963_s22, 0 }
  0x70   : > { %s212_s29 = sand.u32 (!%p1967_p2), 1, %s1525_s16   ;;  %p1968_p6 = scmp.ne.s32.totalorder (!%p1967_p2), %s1962_s21, 0 }
  0x71   : > { %210 = sbr.rel (%p1967_p2) target bundleno = 459 (0x1cb), region = 36  ;;  %s1019_s27 = sshll.u32 (!%p1967_p2), %s212_s29, 7 }
  0x72   : > { %s213_s8 = scalar_lea.sflag (!%p1967_p2), [#allocation3], %s212_s29  ;;  %s1753_s24 = scalar_lea.vmem (!%p1967_p2), [#allocation2], %s1019_s27 }
  0x78   : > { %1508 = dma.done.wait (%p1968_p6), %s213_s8, 2048  }
  0x79   : > { %1510 = vsyncadd (%p1968_p6), %s213_s8, 4294965248  ;;  %p1969_p1 = scmp.ne.s32.totalorder %s1961_s20, 0 }
  0x7b   : > { %1512 = dma.done.wait (%p1969_p1), [#allocation5], 912  }
  0x7c   : > { %1514 = vsyncadd (%p1969_p1), [#allocation5], 4294966384 }
  0x7d   : > { %1516 = dma.done.wait (%p1969_p1), [#allocation8], 16  }
  0x7e   : > { %1518 = vsyncadd (%p1969_p1), [#allocation8], 4294967280  ;;  %v1226_v0 = vld [vmem:[#allocation4] sm:$0xff]   ;;  %v1227_v1 = vld [vmem:[#allocation4 + $0x8] sm:$0xff]   ;;  %vm428_vm0 = vcmask 883712   ;;  %vm477_vm1 = vcmask 1045504  }
  0x7f   : > { %1092 = vmatprep.subr.bf16.mxu0 %v1226_v0  ;;  %1138 = vmatprep.subr.bf16.mxu1 %v1226_v0  ;;  %v1228_v2 = vld [vmem:[#allocation4 + $0x10] sm:$0xff]   ;;  %v1229_v3 = vld [vmem:[#allocation4 + $0x18] sm:$0xff]   ;;  %v1233_v4 = vld [vmem:[%s1753_s24] sm:$0xff]   ;;  %s1832_s20 = sshll.u32 %s1008_s19, 5 }
  0x80   : > { %1093 = vmatpush3.bf16.msra.mxu0 %v1226_v0  ;;  %1145 = vmatpush3.bf16.msra.mxu1 %v1226_v0  ;;  %v1234_v5 = vld [vmem:[%s1753_s24 + $0x40] sm:$0xff]   ;;  %v1231_v7 = vld [vmem:[#allocation4 + $0x28] sm:$0xff]   ;;  %v1232_v8 = vld [vmem:[#allocation4 + $0x30] sm:$0x3f]   ;;  %p255_p7 = scmp.lt.s32.totalorder %s1832_s20, 1023 }
  0x81   : > { %1094 = vmatprep.subr.bf16.mxu0 %v1227_v1  ;;  %1139 = vmatprep.subr.bf16.mxu1 %v1227_v1  ;;  %v1230_v6 = vld [vmem:[#allocation4 + $0x20] sm:$0xff]   ;;  %v479_v9 = vsel %vm477_vm1, %v1232_v8, 0  ;;  %v1235_v10 = vld [vmem:[%s1753_s24 + $0x8] sm:$0xff]   ;;  %v1237_v12 = vld [vmem:[%s1753_s24 + $0x10] sm:$0xff]  }
  0x82   : > { %1106 = vmatprep.mubr.msk.bf16.mxu0 %vm428_vm0, %v1233_v4  ;;  %1122 = vmatprep.mubr.msk.bf16.mxu1 %vm428_vm0, %v1234_v5  ;;  %v1236_v11 = vld [vmem:[%s1753_s24 + $0x48] sm:$0xff]   ;;  %v1238_v13 = vld [vmem:[%s1753_s24 + $0x50] sm:$0xff]   ;;  %v1239_v14 = vld [vmem:[%s1753_s24 + $0x18] sm:$0xff]   ;;  %s1975_s20 = smov (!%p255_p7, %s1832_s20), 1023 }
  0x83   : > { %v1240_v15 = vld [vmem:[%s1753_s24 + $0x58] sm:$0xff]   ;;  %v1241_v16 = vld [vmem:[%s1753_s24 + $0x20] sm:$0xff]   ;;  %v1243_v18 = vld [vmem:[%s1753_s24 + $0x28] sm:$0xff]   ;;  %s1024_s18 = sshll.u32 %s1975_s20, 3 }
  0x84   : > { %1095 = vmatpush3.bf16.msra.mxu0 %v1227_v1  ;;  %1146 = vmatpush3.bf16.msra.mxu1 %v1227_v1  ;;  %v1242_v17 = vld [vmem:[%s1753_s24 + $0x60] sm:$0xff]   ;;  %v1244_v19 = vld [vmem:[%s1753_s24 + $0x68] sm:$0xff]   ;;  %v1245_v20 = vld [vmem:[%s1753_s24 + $0x30] sm:$0xff]   ;;  %s1876_s22 = scalar_lea.vmem %s1956_s4, %s1024_s18 }
  0x85   : > { %1096 = vmatprep.subr.bf16.mxu0 %v1228_v2  ;;  %1140 = vmatprep.subr.bf16.mxu1 %v1228_v2  ;;  %v1246_v21 = vld [vmem:[%s1753_s24 + $0x70] sm:$0xff]   ;;  %v1247_v22 = vld [vmem:[%s1753_s24 + $0x38] sm:$0xff]  }
  0x86   : > { %v1248_v23 = vld [vmem:[%s1753_s24 + $0x78] sm:$0xff]  }
  0x87   : > { %v1799_v24 = vld [vmem:[#allocation6] ss:$0 sm:$0xff]  ;;  %v1801_v26 = vld [vmem:[#allocation7] ss:$0 sm:$0xff] }
  0x88   : > { %1097 = vmatpush3.bf16.msra.mxu0 %v1228_v2  ;;  %1147 = vmatpush3.bf16.msra.mxu1 %v1228_v2 }
  0x89   : > { %1098 = vmatprep.subr.bf16.mxu0 %v1229_v3  ;;  %1141 = vmatprep.subr.bf16.mxu1 %v1229_v3 }
  0x8c   : > { %1099 = vmatpush3.bf16.msra.mxu0 %v1229_v3  ;;  %1148 = vmatpush3.bf16.msra.mxu1 %v1229_v3 }
  0x8d   : > { %1100 = vmatprep.subr.bf16.mxu0 %v1230_v6  ;;  %1142 = vmatprep.subr.bf16.mxu1 %v1230_v6 }
  0x90   : > { %1101 = vmatpush3.bf16.msra.mxu0 %v1230_v6  ;;  %1149 = vmatpush3.bf16.msra.mxu1 %v1230_v6 }
  0x91   : > { %1102 = vmatprep.subr.bf16.mxu0 %v1231_v7  ;;  %1143 = vmatprep.subr.bf16.mxu1 %v1231_v7 }
  0x94   : > { %1103 = vmatpush3.bf16.msra.mxu0 %v1231_v7  ;;  %1150 = vmatpush3.bf16.msra.mxu1 %v1231_v7 }
  0x95   : > { %1152 = vmatprep.subr.msk.bf16.mxu0 %vm477_vm1, %v1232_v8  ;;  %1153 = vmatprep.subr.msk.bf16.mxu1 %vm477_vm1, %v1232_v8 }
  0x98   : > { %1105 = vmatpush3.bf16.msra.mxu0 %v479_v9  ;;  %1151 = vmatpush3.bf16.msra.mxu1 %v479_v9 }
  0x9b   : > { %1107 = vmatmul.mubr.msk.bf16.vlgmr.msra.gmra.mrb[0].mxu0 %vm428_vm0, %v1235_v10  ;;  %1123 = vmatmul.mubr.msk.bf16.vlgmr.msra.gmra.mrb[0].mxu1 %vm428_vm0, %v1236_v11 }
  0x9c   : > { %1110 = vmatprep.mubr.msk.bf16.mxu0 %vm428_vm0, %v1237_v12  ;;  %1126 = vmatprep.mubr.msk.bf16.mxu1 %vm428_vm0, %v1238_v13 }
  0xa3   : > { %1111 = vmatmul.mubr.msk.bf16.gmra.mrb[4].mxu0 %vm428_vm0, %v1239_v14  ;;  %1127 = vmatmul.mubr.msk.bf16.gmra.mrb[4].mxu1 %vm428_vm0, %v1240_v15 }
  0xa4   : > { %1114 = vmatprep.mubr.msk.bf16.mxu0 %vm428_vm0, %v1241_v16  ;;  %1130 = vmatprep.mubr.msk.bf16.mxu1 %vm428_vm0, %v1242_v17 }
  0xab   : > { %1115 = vmatmul.mubr.msk.bf16.gmra.mrb[8].mxu0 %vm428_vm0, %v1243_v18  ;;  %1131 = vmatmul.mubr.msk.bf16.gmra.mrb[8].mxu1 %vm428_vm0, %v1244_v19 }
  0xac   : > { %1118 = vmatprep.mubr.msk.bf16.mxu0 %vm428_vm0, %v1245_v20  ;;  %1134 = vmatprep.mubr.msk.bf16.mxu1 %vm428_vm0, %v1246_v21 }
  0xb3   : > { %1119 = vmatmul.mubr.msk.bf16.gmra.mrb[12].mxu0 %vm428_vm0, %v1247_v22  ;;  %1135 = vmatmul.mubr.msk.bf16.gmra.mrb[12].mxu1 %vm428_vm0, %v1248_v23 }
 0x16e   : > { %v1108_v25 = vpop.f32.mrb[0].mxu0  ;;  %v1124_v27 = vpop.f32.mrb[0].mxu1 }
 0x16f   : > { %v651_v28 = vmul.f32 %v1108_v25, %v1799_v24  ;;  %v667_v29 = vmul.f32 %v1124_v27, %v1799_v24  ;;  %v515_v30 = vpop.f32.mrb[1].mxu0  ;;  %v579_v31 = vpop.f32.mrb[1].mxu1 }
 0x170   : > { %v649_v32 = vmul.f32 %v1799_v24, %v515_v30  ;;  %v665_v33 = vmul.f32 %v1799_v24, %v579_v31  ;;  %v1109_v34 = vpop.f32.mrb[2].mxu0  ;;  %v1125_v35 = vpop.f32.mrb[2].mxu1 }
 0x171   : > { %v690_v36 = vadd.f32 %v1801_v26, %v651_v28  ;;  %v706_v37 = vadd.f32 %v1801_v26, %v667_v29  ;;  %v652_v38 = vmul.f32 %v1109_v34, %v1799_v24  ;;  %v668_v39 = vmul.f32 %v1125_v35, %v1799_v24  ;;  %v518_v40 = vpop.f32.mrb[3].mxu0  ;;  %v582_v41 = vpop.f32.mrb[3].mxu1 }
 0x172   : > { %v688_v42 = vadd.f32 %v1801_v26, %v649_v32  ;;  %v704_v43 = vadd.f32 %v1801_v26, %v665_v33  ;;  %v650_v44 = vmul.f32 %v1799_v24, %v518_v40  ;;  %v666_v45 = vmul.f32 %v1799_v24, %v582_v41 }
 0x173   : > { %v722_v46 = vsub.f32 0.0, %v690_v36  ;;  %v738_v47 = vsub.f32 0.0, %v706_v37  ;;  %v691_v48 = vadd.f32 %v1801_v26, %v652_v38  ;;  %v707_v49 = vadd.f32 %v1801_v26, %v668_v39 }
 0x174   : > { %v720_v50 = vsub.f32 0.0, %v688_v42  ;;  %v736_v51 = vsub.f32 0.0, %v704_v43  ;;  %v689_v52 = vadd.f32 %v1801_v26, %v650_v44  ;;  %v705_v53 = vadd.f32 %v1801_v26, %v666_v45 }
 0x175   : > { %v756_v54 = vmul.f32 1.442695, %v722_v46  ;;  %v788_v55 = vmul.f32 1.442695, %v738_v47  ;;  %v723_v56 = vsub.f32 0.0, %v691_v48  ;;  %v739_v57 = vsub.f32 0.0, %v707_v49 }
 0x176   : > { %v752_v58 = vmul.f32 1.442695, %v720_v50  ;;  %v784_v59 = vmul.f32 1.442695, %v736_v51  ;;  %v721_v60 = vsub.f32 0.0, %v689_v52  ;;  %v737_v61 = vsub.f32 0.0, %v705_v53 }
 0x177   : > { %1249 = vpow2.f32 %v756_v54  ;;  %v758_v62 = vmul.f32 1.442695, %v723_v56  ;;  %v790_v63 = vmul.f32 1.442695, %v739_v57  ;;  %v1112_v0 = vpop.f32.mrb[4].mxu0  ;;  %v1128_v1 = vpop.f32.mrb[4].mxu1 }
 0x178   : > { %1251 = vpow2.f32 %v788_v55  ;;  %v754_v2 = vmul.f32 1.442695, %v721_v60  ;;  %v786_v3 = vmul.f32 1.442695, %v737_v61  ;;  %v655_v4 = vmul.f32 %v1112_v0, %v1799_v24  ;;  %v531_v5 = vpop.f32.mrb[5].mxu0  ;;  %v595_v6 = vpop.f32.mrb[5].mxu1 }
 0x179   : > { %1253 = vpow2.f32 %v752_v58  ;;  %v671_v7 = vmul.f32 %v1128_v1, %v1799_v24  ;;  %v653_v8 = vmul.f32 %v1799_v24, %v531_v5  ;;  %v669_v9 = vmul.f32 %v1799_v24, %v595_v6  ;;  %v1113_v10 = vpop.f32.mrb[6].mxu0  ;;  %v1129_v11 = vpop.f32.mrb[6].mxu1 }
 0x17a   : > { %1255 = vpow2.f32 %v784_v59  ;;  %v694_v12 = vadd.f32 %v1801_v26, %v655_v4  ;;  %v656_v13 = vmul.f32 %v1113_v10, %v1799_v24  ;;  %v672_v14 = vmul.f32 %v1129_v11, %v1799_v24  ;;  %v534_v15 = vpop.f32.mrb[7].mxu0  ;;  %v598_v16 = vpop.f32.mrb[7].mxu1 }
 0x17b   : > { %1257 = vpow2.f32 %v758_v62  ;;  %v710_v17 = vadd.f32 %v1801_v26, %v671_v7  ;;  %v692_v18 = vadd.f32 %v1801_v26, %v653_v8  ;;  %v708_v19 = vadd.f32 %v1801_v26, %v669_v9 }
 0x17c   : > { %1259 = vpow2.f32 %v790_v63  ;;  %v726_v20 = vsub.f32 0.0, %v694_v12  ;;  %v695_v21 = vadd.f32 %v1801_v26, %v656_v13  ;;  %v711_v28 = vadd.f32 %v1801_v26, %v672_v14 }
 0x17d   : > { %1261 = vpow2.f32 %v754_v2  ;;  %v742_v22 = vsub.f32 0.0, %v710_v17  ;;  %v724_v23 = vsub.f32 0.0, %v692_v18  ;;  %v740_v25 = vsub.f32 0.0, %v708_v19 }
 0x17e   : > { %1263 = vpow2.f32 %v786_v3  ;;  %v764_v27 = vmul.f32 1.442695, %v726_v20  ;;  %v1116_v29 = vpop.f32.mrb[8].mxu0  ;;  %v1132_v30 = vpop.f32.mrb[8].mxu1  ;;  %v654_v34 = vmul.f32 %v1799_v24, %v534_v15  ;;  %v670_v35 = vmul.f32 %v1799_v24, %v598_v16 }
 0x17f   : > { %v796_v31 = vmul.f32 1.442695, %v742_v22  ;;  %v760_v32 = vmul.f32 1.442695, %v724_v23  ;;  %v792_v33 = vmul.f32 1.442695, %v740_v25  ;;  %v659_v50 = vmul.f32 %v1116_v29, %v1799_v24 }
 0x180   : > { %1265 = vpow2.f32 %v764_v27  ;;  %v547_v36 = vpop.f32.mrb[9].mxu0  ;;  %v611_v37 = vpop.f32.mrb[9].mxu1  ;;  %v727_v39 = vsub.f32 0.0, %v695_v21  ;;  %v693_v44 = vadd.f32 %v1801_v26, %v654_v34  ;;  %v743_v49 = vsub.f32 0.0, %v711_v28 }
 0x181   : > { %v1250_v38 = vpop.eup %1249  ;;  %1267 = vpow2.f32 %v796_v31  ;;  %v1117_v40 = vpop.f32.mrb[10].mxu0  ;;  %v709_v53 = vadd.f32 %v1801_v26, %v670_v35  ;;  %v675_v57 = vmul.f32 %v1132_v30, %v1799_v24  ;;  %v657_v61 = vmul.f32 %v1799_v24, %v547_v36 }
 0x182   : > { %v1133_v41 = vpop.f32.mrb[10].mxu1  ;;  %v1252_v42 = vpop.eup %1251  ;;  %v818_v43 = vadd.f32 1.0, %v1250_v38  ;;  %1269 = vpow2.f32 %v760_v32  ;;  %v766_v56 = vmul.f32 1.442695, %v727_v39  ;;  %v725_v60 = vsub.f32 0.0, %v693_v44 }
 0x183   : > { %v550_v45 = vpop.f32.mrb[11].mxu0  ;;  %v1839_v46 = vpop.f32.mrb[11].mxu1  ;;  %v834_v48 = vadd.f32 1.0, %v1252_v42  ;;  %1271 = vpow2.f32 %v792_v33  ;;  %v798_v2 = vmul.f32 1.442695, %v743_v49  ;;  %v698_v3 = vadd.f32 %v1801_v26, %v659_v50 }
 0x184   : > { %v1254_v47 = vpop.eup %1253  ;;  %1273 = vrcp.f32 %v818_v43  ;;  %v741_v8 = vsub.f32 0.0, %v709_v53  ;;  %v673_v9 = vmul.f32 %v1799_v24, %v611_v37  ;;  %v714_v13 = vadd.f32 %v1801_v26, %v675_v57 }
 0x185   : > { %v1256_v51 = vpop.eup %1255  ;;  %v816_v52 = vadd.f32 1.0, %v1254_v47  ;;  %1275 = vrcp.f32 %v834_v48  ;;  %v660_v14 = vmul.f32 %v1117_v40, %v1799_v24  ;;  %v762_v18 = vmul.f32 1.442695, %v725_v60 }
 0x186   : > { %v1258_v54 = vpop.eup %1257  ;;  %v832_v55 = vadd.f32 1.0, %v1256_v51  ;;  %v1120_v62 = vpop.f32.mrb[12].mxu0  ;;  %v696_v19 = vadd.f32 %v1801_v26, %v657_v61  ;;  %v676_v20 = vmul.f32 %v1133_v41, %v1799_v24  ;;  %v712_v23 = vadd.f32 %v1801_v26, %v673_v9 }
 0x187   : > { %v1260_v58 = vpop.eup %1259  ;;  %1277 = vrcp.f32 %v816_v52  ;;  %v819_v59 = vadd.f32 1.0, %v1258_v54  ;;  %v1850_v63 = vpop.f32.mrb[12].mxu1  ;;  %v658_v25 = vmul.f32 %v1799_v24, %v550_v45  ;;  %v730_v29 = vsub.f32 0.0, %v698_v3 }
 0x188   : > { %v1262_v0 = vpop.eup %1261  ;;  %1279 = vrcp.f32 %v832_v55  ;;  %v835_v1 = vadd.f32 1.0, %v1260_v58  ;;  %v1853_v4 = vpop.f32.mrb[13].mxu0  ;;  %v699_v30 = vadd.f32 %v1801_v26, %v660_v14  ;;  %v794_v33 = vmul.f32 1.442695, %v741_v8 }
 0x189   : > { %v1855_v5 = vpop.f32.mrb[13].mxu1  ;;  %v1264_v6 = vpop.eup %1263  ;;  %1281 = vrcp.f32 %v819_v59  ;;  %v817_v7 = vadd.f32 1.0, %v1262_v0  ;;  %v746_v34 = vsub.f32 0.0, %v714_v13  ;;  %v728_v37 = vsub.f32 0.0, %v696_v19 }
 0x18a   : > { %v1858_v10 = vpop.f32.mrb[14].mxu0  ;;  %v1860_v11 = vpop.f32.mrb[14].mxu1  ;;  %1283 = vrcp.f32 %v835_v1  ;;  %v833_v12 = vadd.f32 1.0, %v1264_v6  ;;  %v715_v38 = vadd.f32 %v1801_v26, %v676_v20  ;;  %v744_v40 = vsub.f32 0.0, %v712_v23 }
 0x18b   : > { %v1865_v15 = vpop.f32.mrb[15].mxu0  ;;  %v1867_v16 = vpop.f32.mrb[15].mxu1  ;;  %1285 = vrcp.f32 %v817_v7  ;;  %v697_v41 = vadd.f32 %v1801_v26, %v658_v25  ;;  %v674_v42 = vmul.f32 %v1799_v24, %v1839_v46  ;;  %v772_v44 = vmul.f32 1.442695, %v730_v29 }
 0x18c   : > { %v1266_v17 = vpop.eup %1265  ;;  %1287 = vrcp.f32 %v833_v12  ;;  %v731_v45 = vsub.f32 0.0, %v699_v30  ;;  %v663_v47 = vmul.f32 %v1120_v62, %v1799_v24  ;;  %v804_v49 = vmul.f32 1.442695, %v746_v34 }
 0x18d   : > { %v1268_v21 = vpop.eup %1267  ;;  %v822_v22 = vadd.f32 1.0, %v1266_v17  ;;  %1289 = vpow2.f32 %v766_v56  ;;  %v713_v50 = vadd.f32 %v1801_v26, %v674_v42  ;;  %v768_v46 = vmul.f32 1.442695, %v728_v37 }
 0x18e   : > { %v1270_v27 = vpop.eup %1269  ;;  %v838_v28 = vadd.f32 1.0, %v1268_v21  ;;  %v747_v52 = vsub.f32 0.0, %v715_v38  ;;  %v702_v53 = vadd.f32 %v1801_v26, %v663_v47  ;;  %v800_v55 = vmul.f32 1.442695, %v744_v40 }
 0x18f   : > { %v1272_v31 = vpop.eup %1271  ;;  %1291 = vrcp.f32 %v822_v22  ;;  %v820_v32 = vadd.f32 1.0, %v1270_v27  ;;  %v729_v56 = vsub.f32 0.0, %v697_v41  ;;  %v774_v58 = vmul.f32 1.442695, %v731_v45 }
 0x190   : > { %v1274_v35 = vpop.eup %1273  ;;  %1293 = vrcp.f32 %v838_v28  ;;  %v836_v36 = vadd.f32 1.0, %v1272_v31  ;;  %v745_v59 = vsub.f32 0.0, %v713_v50  ;;  %v734_v61 = vsub.f32 0.0, %v702_v53 }
 0x191   : > { %v1276_v39 = vpop.eup %1275  ;;  %882 = vst [vmem:[%s1876_s22 + $0x10] sm:$0xff] %v1274_v35  ;;  %1295 = vrcp.f32 %v820_v32  ;;  %v806_v0 = vmul.f32 1.442695, %v747_v52  ;;  %v679_v1 = vmul.f32 %v1850_v63, %v1799_v24  ;;  %v770_v6 = vmul.f32 1.442695, %v729_v56 }
 0x192   : > { %v1278_v43 = vpop.eup %1277  ;;  %898 = vst [vmem:[%s1876_s22 + $0x90] sm:$0xff] %v1276_v39  ;;  %1297 = vrcp.f32 %v836_v36  ;;  %v802_v8 = vmul.f32 1.442695, %v745_v59  ;;  %v780_v12 = vmul.f32 1.442695, %v734_v61  ;;  %v661_v63 = vmul.f32 %v1799_v24, %v1853_v4 }
 0x193   : > { %v1280_v48 = vpop.eup %1279  ;;  %880 = vst [vmem:[%s1876_s22] sm:$0xff] %v1278_v43  ;;  %1299 = vpow2.f32 %v798_v2  ;;  %v718_v14 = vadd.f32 %v1801_v26, %v679_v1  ;;  %v677_v20 = vmul.f32 %v1799_v24, %v1855_v5  ;;  %v664_v23 = vmul.f32 %v1858_v10, %v1799_v24 }
 0x194   : > { %v1282_v51 = vpop.eup %1281  ;;  %896 = vst [vmem:[%s1876_s22 + $0x80] sm:$0xff] %v1280_v48  ;;  %1301 = vpow2.f32 %v762_v18  ;;  %v680_v29 = vmul.f32 %v1860_v11, %v1799_v24  ;;  %v700_v31 = vadd.f32 %v1801_v26, %v661_v63  ;;  %v662_v5 = vmul.f32 %v1799_v24, %v1865_v15 }
 0x195   : > { %v1284_v54 = vpop.eup %1283  ;;  %883 = vst [vmem:[%s1876_s22 + $0x18] sm:$0xff] %v1282_v51  ;;  %1303 = vpow2.f32 %v794_v33  ;;  %v750_v28 = vsub.f32 0.0, %v718_v14  ;;  %v716_v10 = vadd.f32 %v1801_v26, %v677_v20  ;;  %v678_v34 = vmul.f32 %v1799_v24, %v1867_v16 }
 0x196   : > { %v1286_v57 = vpop.eup %1285  ;;  %899 = vst [vmem:[%s1876_s22 + $0x98] sm:$0xff] %v1284_v54  ;;  %1305 = vpow2.f32 %v772_v44  ;;  %v703_v36 = vadd.f32 %v1801_v26, %v664_v23  ;;  %v719_v15 = vadd.f32 %v1801_v26, %v680_v29  ;;  %v732_v42 = vsub.f32 0.0, %v700_v31 }
 0x197   : > { %v1288_v60 = vpop.eup %1287  ;;  %881 = vst [vmem:[%s1876_s22 + $0x8] sm:$0xff] %v1286_v57  ;;  %1307 = vpow2.f32 %v804_v49  ;;  %v812_v39 = vmul.f32 1.442695, %v750_v28  ;;  %v701_v43 = vadd.f32 %v1801_v26, %v662_v5  ;;  %v748_v24 = vsub.f32 0.0, %v716_v10 }
 0x198   : > { %v1290_v62 = vpop.eup %1289  ;;  %897 = vst [vmem:[%s1876_s22 + $0x88] sm:$0xff] %v1288_v60  ;;  %1309 = vpow2.f32 %v768_v46  ;;  %v717_v16 = vadd.f32 %v1801_v26, %v678_v34  ;;  %v735_v48 = vsub.f32 0.0, %v703_v36  ;;  %v751_v51 = vsub.f32 0.0, %v719_v15 }
 0x199   : > { %v1292_v2 = vpop.eup %1291  ;;  %v823_v3 = vadd.f32 1.0, %v1290_v62  ;;  %1311 = vpow2.f32 %v800_v55  ;;  %v776_v53 = vmul.f32 1.442695, %v732_v42  ;;  %v733_v54 = vsub.f32 0.0, %v701_v43 }
 0x19a   : > { %v1294_v7 = vpop.eup %1293  ;;  %886 = vst [vmem:[%s1876_s22 + $0x30] sm:$0xff] %v1292_v2  ;;  %1313 = vpow2.f32 %v774_v58  ;;  %v808_v26 = vmul.f32 1.442695, %v748_v24  ;;  %v749_v57 = vsub.f32 0.0, %v717_v16  ;;  %v782_v59 = vmul.f32 1.442695, %v735_v48 }
 0x19b   : > { %v1296_v9 = vpop.eup %1295  ;;  %902 = vst [vmem:[%s1876_s22 + $0xb0] sm:$0xff] %v1294_v7  ;;  %1315 = vrcp.f32 %v823_v3  ;;  %v814_v61 = vmul.f32 1.442695, %v751_v51 }
 0x19c   : > { %v1298_v13 = vpop.eup %1297  ;;  %884 = vst [vmem:[%s1876_s22 + $0x20] sm:$0xff] %v1296_v9  ;;  %1317 = vpow2.f32 %v806_v0  ;;  %v778_v0 = vmul.f32 1.442695, %v733_v54  ;;  %v810_v2 = vmul.f32 1.442695, %v749_v57 }
 0x19d   : > { %v1300_v17 = vpop.eup %1299  ;;  %900 = vst [vmem:[%s1876_s22 + $0xa0] sm:$0xff] %v1298_v13  ;;  %1319 = vpow2.f32 %v770_v6 }
 0x19e   : > { %v1302_v18 = vpop.eup %1301  ;;  %v839_v19 = vadd.f32 1.0, %v1300_v17  ;;  %1321 = vpow2.f32 %v802_v8 }
 0x19f   : > { %v1304_v21 = vpop.eup %1303  ;;  %v821_v22 = vadd.f32 1.0, %v1302_v18  ;;  %1323 = vpow2.f32 %v780_v12 }
 0x1a0   : > { %v1306_v25 = vpop.eup %1305  ;;  %1325 = vrcp.f32 %v839_v19  ;;  %v837_v27 = vadd.f32 1.0, %v1304_v21 }
 0x1a1   : > { %v1308_v4 = vpop.eup %1307  ;;  %1327 = vrcp.f32 %v821_v22  ;;  %v826_v30 = vadd.f32 1.0, %v1306_v25 }
 0x1a2   : > { %v1310_v32 = vpop.eup %1309  ;;  %1329 = vrcp.f32 %v837_v27  ;;  %v842_v33 = vadd.f32 1.0, %v1308_v4 }
 0x1a3   : > { %v1312_v35 = vpop.eup %1311  ;;  %1331 = vrcp.f32 %v826_v30  ;;  %v824_v11 = vadd.f32 1.0, %v1310_v32 }
 0x1a4   : > { %v1314_v37 = vpop.eup %1313  ;;  %1333 = vrcp.f32 %v842_v33  ;;  %v840_v38 = vadd.f32 1.0, %v1312_v35 }
 0x1a5   : > { %v1316_v40 = vpop.eup %1315  ;;  %1335 = vrcp.f32 %v824_v11  ;;  %v827_v41 = vadd.f32 1.0, %v1314_v37 }
 0x1a6   : > { %v1318_v44 = vpop.eup %1317  ;;  %887 = vst [vmem:[%s1876_s22 + $0x38] sm:$0xff] %v1316_v40  ;;  %1337 = vrcp.f32 %v840_v38 }
 0x1a7   : > { %v1320_v45 = vpop.eup %1319  ;;  %1339 = vrcp.f32 %v827_v41  ;;  %v843_v47 = vadd.f32 1.0, %v1318_v44 }
 0x1a8   : > { %v1322_v49 = vpop.eup %1321  ;;  %v825_v50 = vadd.f32 1.0, %v1320_v45  ;;  %1341 = vpow2.f32 %v812_v39 }
 0x1a9   : > { %v1324_v46 = vpop.eup %1323  ;;  %1343 = vrcp.f32 %v843_v47  ;;  %v841_v52 = vadd.f32 1.0, %v1322_v49 }
 0x1aa   : > { %v1326_v55 = vpop.eup %1325  ;;  %1345 = vrcp.f32 %v825_v50  ;;  %v830_v56 = vadd.f32 1.0, %v1324_v46 }
 0x1ab   : > { %v1328_v58 = vpop.eup %1327  ;;  %903 = vst [vmem:[%s1876_s22 + $0xb8] sm:$0xff] %v1326_v55  ;;  %1347 = vrcp.f32 %v841_v52 }
 0x1ac   : > { %v1330_v60 = vpop.eup %1329  ;;  %885 = vst [vmem:[%s1876_s22 + $0x28] sm:$0xff] %v1328_v58  ;;  %1349 = vrcp.f32 %v830_v56 }
 0x1ad   : > { %v1332_v62 = vpop.eup %1331  ;;  %901 = vst [vmem:[%s1876_s22 + $0xa8] sm:$0xff] %v1330_v60  ;;  %1351 = vpow2.f32 %v776_v53 }
 0x1ae   : > { %v1334_v1 = vpop.eup %1333  ;;  %890 = vst [vmem:[%s1876_s22 + $0x50] sm:$0xff] %v1332_v62  ;;  %1353 = vpow2.f32 %v808_v26 }
 0x1af   : > { %v1336_v3 = vpop.eup %1335  ;;  %906 = vst [vmem:[%s1876_s22 + $0xd0] sm:$0xff] %v1334_v1  ;;  %1355 = vpow2.f32 %v782_v59 }
 0x1b0   : > { %v1338_v6 = vpop.eup %1337  ;;  %888 = vst [vmem:[%s1876_s22 + $0x40] sm:$0xff] %v1336_v3  ;;  %1357 = vpow2.f32 %v814_v61 }
 0x1b1   : > { %v1340_v7 = vpop.eup %1339  ;;  %904 = vst [vmem:[%s1876_s22 + $0xc0] sm:$0xff] %v1338_v6  ;;  %1359 = vpow2.f32 %v778_v0 }
 0x1b2   : > { %v1342_v8 = vpop.eup %1341  ;;  %891 = vst [vmem:[%s1876_s22 + $0x58] sm:$0xff] %v1340_v7  ;;  %1361 = vpow2.f32 %v810_v2 }
 0x1b3   : > { %v1344_v9 = vpop.eup %1343  ;;  %v846_v12 = vadd.f32 1.0, %v1342_v8 }
 0x1b4   : > { %v1346_v13 = vpop.eup %1345  ;;  %907 = vst [vmem:[%s1876_s22 + $0xd8] sm:$0xff] %v1344_v9 }
 0x1b5   : > { %v1348_v14 = vpop.eup %1347  ;;  %889 = vst [vmem:[%s1876_s22 + $0x48] sm:$0xff] %v1346_v13  ;;  %1363 = vrcp.f32 %v846_v12 }
 0x1b6   : > { %v1350_v17 = vpop.eup %1349  ;;  %905 = vst [vmem:[%s1876_s22 + $0xc8] sm:$0xff] %v1348_v14 }
 0x1b7   : > { %v1352_v63 = vpop.eup %1351  ;;  %894 = vst [vmem:[%s1876_s22 + $0x70] sm:$0xff] %v1350_v17 }
 0x1b8   : > { %v1354_v18 = vpop.eup %1353  ;;  %v828_v19 = vadd.f32 1.0, %v1352_v63 }
 0x1b9   : > { %v1356_v20 = vpop.eup %1355  ;;  %v844_v21 = vadd.f32 1.0, %v1354_v18 }
 0x1ba   : > { %v1358_v22 = vpop.eup %1357  ;;  %1365 = vrcp.f32 %v828_v19  ;;  %v831_v23 = vadd.f32 1.0, %v1356_v20 }
 0x1bb   : > { %v1360_v25 = vpop.eup %1359  ;;  %1367 = vrcp.f32 %v844_v21  ;;  %v847_v27 = vadd.f32 1.0, %v1358_v22 }
 0x1bc   : > { %v1362_v28 = vpop.eup %1361  ;;  %1369 = vrcp.f32 %v831_v23  ;;  %v829_v29 = vadd.f32 1.0, %v1360_v25 }
 0x1bd   : > { %1371 = vrcp.f32 %v847_v27  ;;  %v845_v4 = vadd.f32 1.0, %v1362_v28 }
 0x1be   : > { %1373 = vrcp.f32 %v829_v29 }
 0x1bf   : > { %v1364_v30 = vpop.eup %1363  ;;  %1375 = vrcp.f32 %v845_v4 }
 0x1c0   : > { %910 = vst [vmem:[%s1876_s22 + $0xf0] sm:$0xff] %v1364_v30 }
 0x1c4   : > { %v1366_v31 = vpop.eup %1365 }
 0x1c5   : > { %v1368_v5 = vpop.eup %1367  ;;  %892 = vst [vmem:[%s1876_s22 + $0x60] sm:$0xff] %v1366_v31 }
 0x1c6   : > { %v1370_v32 = vpop.eup %1369  ;;  %908 = vst [vmem:[%s1876_s22 + $0xe0] sm:$0xff] %v1368_v5 }
 0x1c7   : > { %v1372_v33 = vpop.eup %1371  ;;  %895 = vst [vmem:[%s1876_s22 + $0x78] sm:$0xff] %v1370_v32 }
 0x1c8   : > { %v1374_v10 = vpop.eup %1373  ;;  %911 = vst [vmem:[%s1876_s22 + $0xf8] sm:$0xff] %v1372_v33 }
 0x1c9   : > { %v1376_v34 = vpop.eup %1375  ;;  %893 = vst [vmem:[%s1876_s22 + $0x68] sm:$0xff] %v1374_v10 }
 0x1ca   : > { %909 = vst [vmem:[%s1876_s22 + $0xe8] sm:$0xff] %v1376_v34 }
 0x1cb PF: > { %p16_p11 = scmp.ge.s32.totalorder %s1694_s9, 34   ;;  %s1970_s15 = smov %s1525_s16 }
 0x1cc   : > { %s1971_s16 = smov %s1529_s17  ;;  %s1972_s17 = smov %s1704_s25 }
 0x1cd   : > { %s1973_s18 = smov %s1694_s9  ;;  %18 = sbr.rel (!%p16_p11) target bundleno = 5 (0x5), region = 88 }
 0x1d4   :  { %934 = vsyncpa [#allocation3], 1 }
 0x1d5   :  { %936 = vsyncpa [#allocation3 + $0x1], 1 }
 0x1d6   :  { %937 = vsyncpa [#allocation5], 1 }
 0x1d7   :  { %938 = vsyncpa [#allocation8], 1 }

</bundles_post_ra>
